<compile_context>
chip_gen: v5e
topology: v5e:2x2
jax: 0.10.0
libtpu: 0.0.40
codegen_flags: <defaults>
</compile_context>

<pallas_src>
import numpy as np
import jax
import jax.numpy as jnp
from jax.experimental import pallas as pl
from jax.experimental.pallas import tpu as pltpu


# --------------------------- weight layout helpers ---------------------------
def _interleave_gates(wf, wb, H):
    """(in, 4H), (in, 4H) -> (in, 8H) with cols [i_f i_b f_f f_b g_f g_b o_f o_b]."""
    parts = []
    for g in range(4):
        parts.append(wf[:, g * H:(g + 1) * H])
        parts.append(wb[:, g * H:(g + 1) * H])
    return jnp.concatenate(parts, axis=-1)


def _vmem_padded_bytes(shape, dtype):
    """Rough VMEM footprint of an array: lanes pad to 128, sublanes to 8/16/32."""
    itemsize = np.dtype(dtype).itemsize
    sub = {4: 8, 2: 16, 1: 32}.get(itemsize, 8)
    dims = list(shape)
    if len(dims) == 1:
        dims = [1] + dims
    dims[-1] = -(-dims[-1] // 128) * 128
    dims[-2] = -(-dims[-2] // sub) * sub
    n = 1
    for d in dims:
        n *= d
    return n * itemsize


# ----------------------------- Pallas kernel --------------------------------
def _bilstm_fused_kernel(vf_ref, vb_ref, x_ref, win_ref, whh_ref, b_ref,
                         out_ref, hn_ref, cn_ref, gx_ref):
    T, B, H2 = out_ref.shape          # H2 = 2*H  (lanes [:H] fwd, [H:] bwd)
    H = H2 // 2
    G = 4 * H2                        # 8*H gate width

    def sig(x):                       # sigmoid via a single EUP tanh push
        return 0.5 * jnp.tanh(0.5 * x) + 0.5

    # ---- (1) time-parallel input projection, hoisted out of the recurrence.
    # Single (T*B, E) @ (E, 8H) bf16 MXU matmul (f32 acc); both directions'
    # gate columns are interleaved [i_f i_b f_f f_b g_f g_b o_f o_b]; both
    # biases folded in here once.  Row r of gx corresponds to (t, b)=(r//B, r%B).
    gx_ref[...] = (
        jnp.dot(x_ref[...], win_ref[...], preferred_element_type=jnp.float32)
        + b_ref[...])

    # ---- (2) hoisted lane-selection masks (built once, reused every step).
    gate_lane = jax.lax.broadcasted_iota(jnp.int32, (B, G), 1)
    gate_is_fwd = (gate_lane % H2) < H            # (B, 8H) bool
    half_lane = jax.lax.broadcasted_iota(jnp.int32, (B, H2), 1)
    half_is_fwd = half_lane < H                   # (B, 2H) bool

    whh = whh_ref[...]                # (2H, 8H) bf16, block-diag + interleaved

    h = jnp.zeros((B, H2), jnp.float32)   # [h_f | h_b]
    c = jnp.zeros((B, H2), jnp.float32)   # [c_f | c_b]

    # ---- (3) fused fwd+bwd recurrence, fully unrolled (T static & small).
    for k in range(T):
        # fwd gate lanes come from time k, bwd gate lanes from time T-1-k
        gx_f = gx_ref[pl.ds(k * B, B), :]              # (B, 8H) f32
        gx_b = gx_ref[pl.ds((T - 1 - k) * B, B), :]    # (B, 8H) f32
        gx_k = jnp.where(gate_is_fwd, gx_f, gx_b)

        gates = gx_k + jnp.dot(h.astype(whh.dtype), whh,
                               preferred_element_type=jnp.float32)
        # gate-interleaved layout: each 2H-wide slice is [fwd H | bwd H]
        i = sig(gates[:, 0 * H2:1 * H2])
        f = sig(gates[:, 1 * H2:2 * H2])
        g = jnp.tanh(gates[:, 2 * H2:3 * H2])
        o = sig(gates[:, 3 * H2:4 * H2])
        c_new = f * c + i * g
        h_new = o * jnp.tanh(c_new)

        # per-step validity: fwd half valid iff k < len, bwd half iff
        # (T-1-k) < len.  jnp.where keeps padded/invalid lanes NaN-safe.
        mf = vf_ref[k]                                  # (B, 1) f32 {0,1}
        mb = vb_ref[k]                                  # (B, 1) f32 {0,1}
        valid = jnp.where(half_is_fwd, mf, mb) > 0.5    # (B, 2H) bool

        out_val = jnp.where(valid, h_new, 0.0)          # zero past seq length
        h = jnp.where(valid, h_new, h)                  # freeze state past len
        c = jnp.where(valid, c_new, c)

        out_ref[k, :, 0:H] = out_val[:, 0:H].astype(out_ref.dtype)
        out_ref[T - 1 - k, :, H:H2] = out_val[:, H:H2].astype(out_ref.dtype)

    hn_ref[0] = h[:, 0:H]
    hn_ref[1] = h[:, H:H2]
    cn_ref[0] = c[:, 0:H]
    cn_ref[1] = c[:, H:H2]


# ------------------------------ wrapper --------------------------------------
def encoder_forward(tokens, lengths, params):
    """tokens: (T, B) int32, lengths: (B,) int32.
    Returns (outputs (T, B, 2H) bf16, (h_n (2, B, H) f32, c_n (2, B, H) f32))."""
    T, B = tokens.shape
    E = params["wih_f"].shape[0]
    H = params["whh_f"].shape[0]
    H2, G = 2 * H, 8 * H

    # --- glue: batch padding (sublane-dense), embedding gather, layout prep ---
    # TODO(synk): at B_pad=16 the per-step recurrent matmul fills only a small
    # fraction of the MXU rows; batch more sequences per call when possible.
    B_pad = max(16, ((B + 15) // 16) * 16)
    tok_p = jnp.pad(tokens, ((0, 0), (0, B_pad - B)))          # pad token = 0
    len_p = jnp.pad(lengths.astype(jnp.int32), (0, B_pad - B)) # pad len = 0

    emb_tbl = params["embedding"].astype(jnp.bfloat16)
    x = emb_tbl[tok_p].reshape(T * B_pad, E)       # (T*B_pad, E) bf16, single copy

    # fused, gate-interleaved weights: cols = [i_f i_b f_f f_b g_f g_b o_f o_b]
    w_in = _interleave_gates(params["wih_f"], params["wih_b"], H
                             ).astype(jnp.bfloat16)             # (E, 8H)
    z_hh = jnp.zeros_like(params["whh_f"])
    whh_blk = jnp.concatenate(
        [_interleave_gates(params["whh_f"], z_hh, H),           # h_f rows
         _interleave_gates(z_hh, params["whh_b"], H)],          # h_b rows
        axis=0).astype(jnp.bfloat16)                            # (2H, 8H)
    b_cat = _interleave_gates(params["b_f"], params["b_b"], H)  # (1, 8H) f32

    # per-(t, b) validity and its time reverse (pack_padded emulation)
    valid = (jnp.arange(T)[:, None] < len_p[None, :]).astype(jnp.float32)
    vf = valid.reshape(T, B_pad, 1)
    vb = vf[::-1]

    # --- VMEM budget from the actual padded footprint (no grid -> no
    # double-buffering); generous headroom for Mosaic internal scratch. ---
    footprint = (
        2 * _vmem_padded_bytes((T, B_pad, 1), jnp.float32)        # vf, vb
        + _vmem_padded_bytes((T * B_pad, E), jnp.bfloat16)        # x
        + _vmem_padded_bytes((E, G), jnp.bfloat16)                # w_in
        + _vmem_padded_bytes((H2, G), jnp.bfloat16)               # whh
        + _vmem_padded_bytes((1, G), jnp.float32)                 # bias
        + _vmem_padded_bytes((T, B_pad, H2), jnp.bfloat16)        # out
        + 2 * _vmem_padded_bytes((2, B_pad, H), jnp.float32)      # h_n, c_n
        + _vmem_padded_bytes((T * B_pad, G), jnp.float32))        # gx scratch
    vmem_limit = int(2 * footprint) + (4 << 20)

    vmem = pl.BlockSpec(memory_space=pltpu.MemorySpace.VMEM)
    out, h_n, c_n = pl.pallas_call(
        _bilstm_fused_kernel,
        out_shape=(
            jax.ShapeDtypeStruct((T, B_pad, H2), jnp.bfloat16),  # outputs (bf16)
            jax.ShapeDtypeStruct((2, B_pad, H), jnp.float32),    # h_n
            jax.ShapeDtypeStruct((2, B_pad, H), jnp.float32),    # c_n
        ),
        in_specs=[vmem] * 6,
        out_specs=(vmem, vmem, vmem),
        scratch_shapes=[
            pltpu.VMEM((T * B_pad, G), jnp.float32),   # precomputed input gates
        ],
        compiler_params=pltpu.CompilerParams(vmem_limit_bytes=vmem_limit),
    )(vf, vb, x, w_in, whh_blk, b_cat)

    return out[:, :B, :], (h_n[:, :B, :], c_n[:, :B, :])


# --------------------------- parameter init ----------------------------------
def init_params(key, vocab, E, H):
    ks = jax.random.split(key, 9)
    scale = 1.0 / np.sqrt(H)

    def u(k, shape):
        return jax.random.uniform(k, shape, jnp.float32, -scale, scale)

    emb = jax.random.normal(ks[0], (vocab, E), jnp.float32) * 0.1
    emb = emb.at[0].set(0.0)                         # padding_idx=0
    return dict(
        embedding=emb,
        wih_f=u(ks[1], (E, 4 * H)),
        whh_f=u(ks[2], (H, 4 * H)),
        b_f=u(ks[3], (1, 4 * H)) + u(ks[4], (1, 4 * H)),  # bias_ih + bias_hh
        wih_b=u(ks[5], (E, 4 * H)),
        whh_b=u(ks[6], (H, 4 * H)),
        b_b=u(ks[7], (1, 4 * H)) + u(ks[8], (1, 4 * H)),
    )


# --------------------------- numpy reference ----------------------------------
def _ref_forward(tokens, lengths, params):
    """f32 reference of the same math (inputs/weights/recurrent-h rounded to
    bf16 like the kernel's MXU path; gate/state math stays f32)."""
    def bf16(x):
        return np.asarray(jnp.asarray(x).astype(jnp.bfloat16).astype(jnp.float32))

    def sigmoid(x):
        return 1.0 / (1.0 + np.exp(-x))

    emb_tbl = bf16(params["embedding"])
    emb = emb_tbl[np.asarray(tokens)]
    T, B, _ = emb.shape
    H = params["whh_f"].shape[0]
    lengths = np.asarray(lengths)

    def run(wih, whh, b, reverse):
        wih = bf16(wih); whh = bf16(whh); b = np.asarray(b, np.float32)
        h = np.zeros((B, H), np.float32)
        c = np.zeros((B, H), np.float32)
        out = np.zeros((T, B, H), np.float32)
        ts = range(T - 1, -1, -1) if reverse else range(T)
        for t in ts:
            gates = emb[t] @ wih + bf16(h) @ whh + b
            i = sigmoid(gates[:, 0 * H:1 * H])
            f = sigmoid(gates[:, 1 * H:2 * H])
            g = np.tanh(gates[:, 2 * H:3 * H])
            o = sigmoid(gates[:, 3 * H:4 * H])
            c_new = f * c + i * g
            h_new = o * np.tanh(c_new)
            valid = (t < lengths).reshape(B, 1)
            out[t] = np.where(valid, h_new, 0.0)
            h = np.where(valid, h_new, h)
            c = np.where(valid, c_new, c)
        return out, h, c

    of, hf, cf = run(params["wih_f"], params["whh_f"], params["b_f"], False)
    ob, hb, cb = run(params["wih_b"], params["whh_b"], params["b_b"], True)
    outputs = np.concatenate([of, ob], axis=-1)
    return outputs, (np.stack([hf, hb], 0), np.stack([cf, cb], 0))


# ------------------------------- main ----------------------------------------
if __name__ == "__main__":
    # H=64 so the fused 2H lane dimension is exactly 128 (lane-dense vregs).
    T, B, E, H, VOCAB = 8, 4, 32, 64, 20

    key = jax.random.PRNGKey(0)
    pkey, tkey = jax.random.split(key)
    params = init_params(pkey, VOCAB, E, H)

    # variable-length batch, sorted descending (pack_padded_sequence contract),
    # max length == T so pad_packed keeps T timesteps
    lengths_np = np.array([8, 6, 5, 3], dtype=np.int32)
    tok = np.asarray(jax.random.randint(tkey, (T, B), 1, VOCAB), dtype=np.int32)
    tmask = np.arange(T)[:, None] < lengths_np[None, :]
    tok = np.where(tmask, tok, 0)                     # padding token 0 past length

    tokens = jnp.asarray(tok)
    lengths = jnp.asarray(lengths_np)

    encoder = jax.jit(encoder_forward)
    outputs, (h_n, c_n) = encoder(tokens, lengths, params)
    outputs = jax.block_until_ready(outputs)
    h_n = jax.block_until_ready(h_n)
    c_n = jax.block_until_ready(c_n)

    # sanity-check against a pure numpy reference of the same math
    ref_out, (ref_h, ref_c) = _ref_forward(tok, lengths_np, params)
    out_f32 = np.asarray(outputs.astype(jnp.float32))
    np.testing.assert_allclose(out_f32, ref_out, rtol=2e-2, atol=2e-2)
    np.testing.assert_allclose(np.asarray(h_n), ref_h, rtol=2e-2, atol=2e-2)
    np.testing.assert_allclose(np.asarray(c_n), ref_c, rtol=2e-2, atol=2e-2)

    print("KERNEL_OK")
</pallas_src>

<mosaic_0001>
module attributes {stable_mosaic.version = 11 : i64} {
  func.func @_bilstm_fused_kernel(%arg0: memref<8x16x1xf32, #tpu.memory_space<vmem>>, %arg1: memref<8x16x1xf32, #tpu.memory_space<vmem>>, %arg2: memref<128x32xbf16, #tpu.memory_space<vmem>>, %arg3: memref<32x512xbf16, #tpu.memory_space<vmem>>, %arg4: memref<128x512xbf16, #tpu.memory_space<vmem>>, %arg5: memref<1x512xf32, #tpu.memory_space<vmem>>, %arg6: memref<8x16x128xbf16, #tpu.memory_space<vmem>>, %arg7: memref<2x16x64xf32, #tpu.memory_space<vmem>>, %arg8: memref<2x16x64xf32, #tpu.memory_space<vmem>>, %arg9: memref<128x512xf32, #tpu.memory_space<vmem>>) attributes {dimension_semantics = [], scalar_prefetch = 0 : i64, scratch_operands = 1 : i64, tpu.core_type = #tpu.core_type<tc>} {
    %c0 = arith.constant 0 : index
    %c0_0 = arith.constant 0 : index
    %0 = vector.load %arg2[%c0, %c0_0] : memref<128x32xbf16, #tpu.memory_space<vmem>>, vector<128x32xbf16>
    %c0_1 = arith.constant 0 : index
    %c0_2 = arith.constant 0 : index
    %1 = vector.load %arg3[%c0_1, %c0_2] : memref<32x512xbf16, #tpu.memory_space<vmem>>, vector<32x512xbf16>
    %cst = arith.constant dense<0.000000e+00> : vector<128x512xf32>
    %2 = tpu.matmul %0, %1, %cst {dimension_numbers = #tpu.dot_dimension_numbers<[1], [0], [0], [1], [0, 0, 1, 1], [], []>} : vector<128x32xbf16>, vector<32x512xbf16>, vector<128x512xf32> -> vector<128x512xf32>
    %c0_3 = arith.constant 0 : index
    %c0_4 = arith.constant 0 : index
    %3 = vector.load %arg5[%c0_3, %c0_4] : memref<1x512xf32, #tpu.memory_space<vmem>>, vector<1x512xf32>
    %4 = vector.broadcast %3 : vector<1x512xf32> to vector<128x512xf32>
    %5 = arith.addf %2, %4 : vector<128x512xf32>
    %c0_5 = arith.constant 0 : index
    %c0_6 = arith.constant 0 : index
    %6 = vector.load %arg9[%c0_5, %c0_6] : memref<128x512xf32, #tpu.memory_space<vmem>>, vector<128x512xf32>
    tpu.vector_store %arg9[%c0_5, %c0_6], %5 {strides = array<i32>} : memref<128x512xf32, #tpu.memory_space<vmem>>, vector<128x512xf32>,
    %7 = tpu.iota {dimensions = array<i32: 1>} : vector<16x512xi32>
    %c128_i32 = arith.constant 128 : i32
    %c0_i32 = arith.constant 0 : i32
    %8 = arith.cmpi eq, %c128_i32, %c0_i32 : i32
    %c1_i32 = arith.constant 1 : i32
    %9 = arith.select %8, %c1_i32, %c128_i32 : i32
    %10 = vector.broadcast %9 : i32 to vector<16x512xi32>
    %11 = arith.remsi %7, %10 : vector<16x512xi32>
    %c0_i32_7 = arith.constant 0 : i32
    %12 = vector.broadcast %c0_i32_7 : i32 to vector<16x512xi32>
    %13 = arith.cmpi ne, %11, %12 : vector<16x512xi32>
    %c0_i32_8 = arith.constant 0 : i32
    %14 = vector.broadcast %c0_i32_8 : i32 to vector<16x512xi32>
    %15 = arith.cmpi slt, %11, %14 : vector<16x512xi32>
    %c0_i32_9 = arith.constant 0 : i32
    %16 = arith.cmpi slt, %9, %c0_i32_9 : i32
    %17 = vector.broadcast %16 : i1 to vector<16x512xi1>
    %18 = vector.broadcast %17 : vector<16x512xi1> to vector<16x512xi1>
    %19 = arith.xori %15, %18 : vector<16x512xi1>
    %20 = arith.andi %19, %13 : vector<16x512xi1>
    %21 = vector.broadcast %9 : i32 to vector<16x512xi32>
    %22 = arith.addi %11, %21 : vector<16x512xi32>
    %23 = arith.select %20, %22, %11 : vector<16x512xi1>, vector<16x512xi32>
    %c64_i32 = arith.constant 64 : i32
    %24 = vector.broadcast %c64_i32 : i32 to vector<16x512xi32>
    %25 = arith.cmpi slt, %23, %24 : vector<16x512xi32>
    %26 = tpu.iota {dimensions = array<i32: 1>} : vector<16x128xi32>
    %c64_i32_10 = arith.constant 64 : i32
    %27 = vector.broadcast %c64_i32_10 : i32 to vector<16x128xi32>
    %28 = arith.cmpi slt, %26, %27 : vector<16x128xi32>
    %c0_11 = arith.constant 0 : index
    %c0_12 = arith.constant 0 : index
    %29 = vector.load %arg4[%c0_11, %c0_12] : memref<128x512xbf16, #tpu.memory_space<vmem>>, vector<128x512xbf16>
    %cst_13 = arith.constant 0.000000e+00 : f32
    %30 = vector.broadcast %cst_13 : f32 to vector<16x128xf32>
    %cst_14 = arith.constant 0.000000e+00 : f32
    %31 = vector.broadcast %cst_14 : f32 to vector<16x128xf32>
    %c0_15 = arith.constant 0 : index
    %c0_16 = arith.constant 0 : index
    %32 = vector.load %arg9[%c0_15, %c0_16] : memref<128x512xf32, #tpu.memory_space<vmem>>, vector<16x512xf32>
    %c112 = arith.constant 112 : index
    %c0_17 = arith.constant 0 : index
    %33 = vector.load %arg9[%c112, %c0_17] : memref<128x512xf32, #tpu.memory_space<vmem>>, vector<16x512xf32>
    %34 = arith.select %25, %32, %33 : vector<16x512xi1>, vector<16x512xf32>
    %35 = arith.truncf %30 : vector<16x128xf32> to vector<16x128xbf16>
    %cst_18 = arith.constant dense<0.000000e+00> : vector<16x512xf32>
    %36 = tpu.matmul %35, %29, %cst_18 {dimension_numbers = #tpu.dot_dimension_numbers<[1], [0], [0], [1], [0, 0, 1, 1], [], []>} : vector<16x128xbf16>, vector<128x512xbf16>, vector<16x512xf32> -> vector<16x512xf32>
    %37 = arith.addf %34, %36 : vector<16x512xf32>
    %38 = vector.extract_strided_slice %37 {offsets = [0, 0], sizes = [16, 128], strides = [1, 1]} : vector<16x512xf32> to vector<16x128xf32>
    %cst_19 = arith.constant 5.000000e-01 : f32
    %39 = vector.broadcast %cst_19 : f32 to vector<16x128xf32>
    %40 = arith.mulf %39, %38 : vector<16x128xf32>
    %41 = math.tanh %40 : vector<16x128xf32>
    %cst_20 = arith.constant 5.000000e-01 : f32
    %42 = vector.broadcast %cst_20 : f32 to vector<16x128xf32>
    %43 = arith.mulf %42, %41 : vector<16x128xf32>
    %cst_21 = arith.constant 5.000000e-01 : f32
    %44 = vector.broadcast %cst_21 : f32 to vector<16x128xf32>
    %45 = arith.addf %43, %44 : vector<16x128xf32>
    %46 = vector.extract_strided_slice %37 {offsets = [0, 128], sizes = [16, 128], strides = [1, 1]} : vector<16x512xf32> to vector<16x128xf32>
    %cst_22 = arith.constant 5.000000e-01 : f32
    %47 = vector.broadcast %cst_22 : f32 to vector<16x128xf32>
    %48 = arith.mulf %47, %46 : vector<16x128xf32>
    %49 = math.tanh %48 : vector<16x128xf32>
    %cst_23 = arith.constant 5.000000e-01 : f32
    %50 = vector.broadcast %cst_23 : f32 to vector<16x128xf32>
    %51 = arith.mulf %50, %49 : vector<16x128xf32>
    %cst_24 = arith.constant 5.000000e-01 : f32
    %52 = vector.broadcast %cst_24 : f32 to vector<16x128xf32>
    %53 = arith.addf %51, %52 : vector<16x128xf32>
    %54 = vector.extract_strided_slice %37 {offsets = [0, 256], sizes = [16, 128], strides = [1, 1]} : vector<16x512xf32> to vector<16x128xf32>
    %55 = math.tanh %54 : vector<16x128xf32>
    %56 = vector.extract_strided_slice %37 {offsets = [0, 384], sizes = [16, 128], strides = [1, 1]} : vector<16x512xf32> to vector<16x128xf32>
    %cst_25 = arith.constant 5.000000e-01 : f32
    %57 = vector.broadcast %cst_25 : f32 to vector<16x128xf32>
    %58 = arith.mulf %57, %56 : vector<16x128xf32>
    %59 = math.tanh %58 : vector<16x128xf32>
    %cst_26 = arith.constant 5.000000e-01 : f32
    %60 = vector.broadcast %cst_26 : f32 to vector<16x128xf32>
    %61 = arith.mulf %60, %59 : vector<16x128xf32>
    %cst_27 = arith.constant 5.000000e-01 : f32
    %62 = vector.broadcast %cst_27 : f32 to vector<16x128xf32>
    %63 = arith.addf %61, %62 : vector<16x128xf32>
    %64 = arith.mulf %53, %31 : vector<16x128xf32>
    %65 = arith.mulf %45, %55 : vector<16x128xf32>
    %66 = arith.addf %64, %65 : vector<16x128xf32>
    %67 = math.tanh %66 : vector<16x128xf32>
    %68 = arith.mulf %63, %67 : vector<16x128xf32>
    %c0_28 = arith.constant 0 : index
    %c0_29 = arith.constant 0 : index
    %c0_30 = arith.constant 0 : index
    %69 = vector.load %arg0[%c0_28, %c0_29, %c0_30] : memref<8x16x1xf32, #tpu.memory_space<vmem>>, vector<1x16x1xf32>
    %70 = vector.shape_cast %69 : vector<1x16x1xf32> to vector<16x1xf32>
    %c0_31 = arith.constant 0 : index
    %c0_32 = arith.constant 0 : index
    %c0_33 = arith.constant 0 : index
    %71 = vector.load %arg1[%c0_31, %c0_32, %c0_33] : memref<8x16x1xf32, #tpu.memory_space<vmem>>, vector<1x16x1xf32>
    %72 = vector.shape_cast %71 : vector<1x16x1xf32> to vector<16x1xf32>
    %73 = vector.shape_cast %70 : vector<16x1xf32> to vector<16x1xf32>
    %74 = vector.broadcast %73 : vector<16x1xf32> to vector<16x128xf32>
    %75 = vector.shape_cast %72 : vector<16x1xf32> to vector<16x1xf32>
    %76 = vector.broadcast %75 : vector<16x1xf32> to vector<16x128xf32>
    %77 = arith.select %28, %74, %76 : vector<16x128xi1>, vector<16x128xf32>
    %cst_34 = arith.constant 5.000000e-01 : f32
    %78 = vector.broadcast %cst_34 : f32 to vector<16x128xf32>
    %79 = arith.cmpf ogt, %77, %78 : vector<16x128xf32>
    %cst_35 = arith.constant 0.000000e+00 : f32
    %80 = vector.broadcast %cst_35 : f32 to vector<16x128xf32>
    %81 = arith.select %79, %68, %80 : vector<16x128xi1>, vector<16x128xf32>
    %82 = arith.select %79, %68, %30 : vector<16x128xi1>, vector<16x128xf32>
    %83 = arith.select %79, %66, %31 : vector<16x128xi1>, vector<16x128xf32>
    %84 = vector.extract_strided_slice %81 {offsets = [0, 0], sizes = [16, 64], strides = [1, 1]} : vector<16x128xf32> to vector<16x64xf32>
    %85 = arith.truncf %84 : vector<16x64xf32> to vector<16x64xbf16>
    %c0_36 = arith.constant 0 : index
    %c0_37 = arith.constant 0 : index
    %c0_38 = arith.constant 0 : index
    %86 = vector.load %arg6[%c0_36, %c0_37, %c0_38] : memref<8x16x128xbf16, #tpu.memory_space<vmem>>, vector<1x16x64xbf16>
    %87 = vector.shape_cast %86 : vector<1x16x64xbf16> to vector<16x64xbf16>
    %88 = vector.shape_cast %85 : vector<16x64xbf16> to vector<1x16x64xbf16>
    tpu.vector_store %arg6[%c0_36, %c0_37, %c0_38], %88 {strides = array<i32>} : memref<8x16x128xbf16, #tpu.memory_space<vmem>>, vector<1x16x64xbf16>,
    %89 = vector.extract_strided_slice %81 {offsets = [0, 64], sizes = [16, 64], strides = [1, 1]} : vector<16x128xf32> to vector<16x64xf32>
    %90 = arith.truncf %89 : vector<16x64xf32> to vector<16x64xbf16>
    %c7 = arith.constant 7 : index
    %c0_39 = arith.constant 0 : index
    %c64 = arith.constant 64 : index
    %91 = vector.load %arg6[%c7, %c0_39, %c64] : memref<8x16x128xbf16, #tpu.memory_space<vmem>>, vector<1x16x64xbf16>
    %92 = vector.shape_cast %91 : vector<1x16x64xbf16> to vector<16x64xbf16>
    %93 = vector.shape_cast %90 : vector<16x64xbf16> to vector<1x16x64xbf16>
    tpu.vector_store %arg6[%c7, %c0_39, %c64], %93 {strides = array<i32>} : memref<8x16x128xbf16, #tpu.memory_space<vmem>>, vector<1x16x64xbf16>,
    %c16 = arith.constant 16 : index
    %c0_40 = arith.constant 0 : index
    %94 = vector.load %arg9[%c16, %c0_40] : memref<128x512xf32, #tpu.memory_space<vmem>>, vector<16x512xf32>
    %c96 = arith.constant 96 : index
    %c0_41 = arith.constant 0 : index
    %95 = vector.load %arg9[%c96, %c0_41] : memref<128x512xf32, #tpu.memory_space<vmem>>, vector<16x512xf32>
    %96 = arith.select %25, %94, %95 : vector<16x512xi1>, vector<16x512xf32>
    %97 = arith.truncf %82 : vector<16x128xf32> to vector<16x128xbf16>
    %cst_42 = arith.constant dense<0.000000e+00> : vector<16x512xf32>
    %98 = tpu.matmul %97, %29, %cst_42 {dimension_numbers = #tpu.dot_dimension_numbers<[1], [0], [0], [1], [0, 0, 1, 1], [], []>} : vector<16x128xbf16>, vector<128x512xbf16>, vector<16x512xf32> -> vector<16x512xf32>
    %99 = arith.addf %96, %98 : vector<16x512xf32>
    %100 = vector.extract_strided_slice %99 {offsets = [0, 0], sizes = [16, 128], strides = [1, 1]} : vector<16x512xf32> to vector<16x128xf32>
    %cst_43 = arith.constant 5.000000e-01 : f32
    %101 = vector.broadcast %cst_43 : f32 to vector<16x128xf32>
    %102 = arith.mulf %101, %100 : vector<16x128xf32>
    %103 = math.tanh %102 : vector<16x128xf32>
    %cst_44 = arith.constant 5.000000e-01 : f32
    %104 = vector.broadcast %cst_44 : f32 to vector<16x128xf32>
    %105 = arith.mulf %104, %103 : vector<16x128xf32>
    %cst_45 = arith.constant 5.000000e-01 : f32
    %106 = vector.broadcast %cst_45 : f32 to vector<16x128xf32>
    %107 = arith.addf %105, %106 : vector<16x128xf32>
    %108 = vector.extract_strided_slice %99 {offsets = [0, 128], sizes = [16, 128], strides = [1, 1]} : vector<16x512xf32> to vector<16x128xf32>
    %cst_46 = arith.constant 5.000000e-01 : f32
    %109 = vector.broadcast %cst_46 : f32 to vector<16x128xf32>
    %110 = arith.mulf %109, %108 : vector<16x128xf32>
    %111 = math.tanh %110 : vector<16x128xf32>
    %cst_47 = arith.constant 5.000000e-01 : f32
    %112 = vector.broadcast %cst_47 : f32 to vector<16x128xf32>
    %113 = arith.mulf %112, %111 : vector<16x128xf32>
    %cst_48 = arith.constant 5.000000e-01 : f32
    %114 = vector.broadcast %cst_48 : f32 to vector<16x128xf32>
    %115 = arith.addf %113, %114 : vector<16x128xf32>
    %116 = vector.extract_strided_slice %99 {offsets = [0, 256], sizes = [16, 128], strides = [1, 1]} : vector<16x512xf32> to vector<16x128xf32>
    %117 = math.tanh %116 : vector<16x128xf32>
    %118 = vector.extract_strided_slice %99 {offsets = [0, 384], sizes = [16, 128], strides = [1, 1]} : vector<16x512xf32> to vector<16x128xf32>
    %cst_49 = arith.constant 5.000000e-01 : f32
    %119 = vector.broadcast %cst_49 : f32 to vector<16x128xf32>
    %120 = arith.mulf %119, %118 : vector<16x128xf32>
    %121 = math.tanh %120 : vector<16x128xf32>
    %cst_50 = arith.constant 5.000000e-01 : f32
    %122 = vector.broadcast %cst_50 : f32 to vector<16x128xf32>
    %123 = arith.mulf %122, %121 : vector<16x128xf32>
    %cst_51 = arith.constant 5.000000e-01 : f32
    %124 = vector.broadcast %cst_51 : f32 to vector<16x128xf32>
    %125 = arith.addf %123, %124 : vector<16x128xf32>
    %126 = arith.mulf %115, %83 : vector<16x128xf32>
    %127 = arith.mulf %107, %117 : vector<16x128xf32>
    %128 = arith.addf %126, %127 : vector<16x128xf32>
    %129 = math.tanh %128 : vector<16x128xf32>
    %130 = arith.mulf %125, %129 : vector<16x128xf32>
    %c1 = arith.constant 1 : index
    %c0_52 = arith.constant 0 : index
    %c0_53 = arith.constant 0 : index
    %131 = vector.load %arg0[%c1, %c0_52, %c0_53] : memref<8x16x1xf32, #tpu.memory_space<vmem>>, vector<1x16x1xf32>
    %132 = vector.shape_cast %131 : vector<1x16x1xf32> to vector<16x1xf32>
    %c1_54 = arith.constant 1 : index
    %c0_55 = arith.constant 0 : index
    %c0_56 = arith.constant 0 : index
    %133 = vector.load %arg1[%c1_54, %c0_55, %c0_56] : memref<8x16x1xf32, #tpu.memory_space<vmem>>, vector<1x16x1xf32>
    %134 = vector.shape_cast %133 : vector<1x16x1xf32> to vector<16x1xf32>
    %135 = vector.shape_cast %132 : vector<16x1xf32> to vector<16x1xf32>
    %136 = vector.broadcast %135 : vector<16x1xf32> to vector<16x128xf32>
    %137 = vector.shape_cast %134 : vector<16x1xf32> to vector<16x1xf32>
    %138 = vector.broadcast %137 : vector<16x1xf32> to vector<16x128xf32>
    %139 = arith.select %28, %136, %138 : vector<16x128xi1>, vector<16x128xf32>
    %cst_57 = arith.constant 5.000000e-01 : f32
    %140 = vector.broadcast %cst_57 : f32 to vector<16x128xf32>
    %141 = arith.cmpf ogt, %139, %140 : vector<16x128xf32>
    %cst_58 = arith.constant 0.000000e+00 : f32
    %142 = vector.broadcast %cst_58 : f32 to vector<16x128xf32>
    %143 = arith.select %141, %130, %142 : vector<16x128xi1>, vector<16x128xf32>
    %144 = arith.select %141, %130, %82 : vector<16x128xi1>, vector<16x128xf32>
    %145 = arith.select %141, %128, %83 : vector<16x128xi1>, vector<16x128xf32>
    %146 = vector.extract_strided_slice %143 {offsets = [0, 0], sizes = [16, 64], strides = [1, 1]} : vector<16x128xf32> to vector<16x64xf32>
    %147 = arith.truncf %146 : vector<16x64xf32> to vector<16x64xbf16>
    %c1_59 = arith.constant 1 : index
    %c0_60 = arith.constant 0 : index
    %c0_61 = arith.constant 0 : index
    %148 = vector.load %arg6[%c1_59, %c0_60, %c0_61] : memref<8x16x128xbf16, #tpu.memory_space<vmem>>, vector<1x16x64xbf16>
    %149 = vector.shape_cast %148 : vector<1x16x64xbf16> to vector<16x64xbf16>
    %150 = vector.shape_cast %147 : vector<16x64xbf16> to vector<1x16x64xbf16>
    tpu.vector_store %arg6[%c1_59, %c0_60, %c0_61], %150 {strides = array<i32>} : memref<8x16x128xbf16, #tpu.memory_space<vmem>>, vector<1x16x64xbf16>,
    %151 = vector.extract_strided_slice %143 {offsets = [0, 64], sizes = [16, 64], strides = [1, 1]} : vector<16x128xf32> to vector<16x64xf32>
    %152 = arith.truncf %151 : vector<16x64xf32> to vector<16x64xbf16>
    %c6 = arith.constant 6 : index
    %c0_62 = arith.constant 0 : index
    %c64_63 = arith.constant 64 : index
    %153 = vector.load %arg6[%c6, %c0_62, %c64_63] : memref<8x16x128xbf16, #tpu.memory_space<vmem>>, vector<1x16x64xbf16>
    %154 = vector.shape_cast %153 : vector<1x16x64xbf16> to vector<16x64xbf16>
    %155 = vector.shape_cast %152 : vector<16x64xbf16> to vector<1x16x64xbf16>
    tpu.vector_store %arg6[%c6, %c0_62, %c64_63], %155 {strides = array<i32>} : memref<8x16x128xbf16, #tpu.memory_space<vmem>>, vector<1x16x64xbf16>,
    %c32 = arith.constant 32 : index
    %c0_64 = arith.constant 0 : index
    %156 = vector.load %arg9[%c32, %c0_64] : memref<128x512xf32, #tpu.memory_space<vmem>>, vector<16x512xf32>
    %c80 = arith.constant 80 : index
    %c0_65 = arith.constant 0 : index
    %157 = vector.load %arg9[%c80, %c0_65] : memref<128x512xf32, #tpu.memory_space<vmem>>, vector<16x512xf32>
    %158 = arith.select %25, %156, %157 : vector<16x512xi1>, vector<16x512xf32>
    %159 = arith.truncf %144 : vector<16x128xf32> to vector<16x128xbf16>
    %cst_66 = arith.constant dense<0.000000e+00> : vector<16x512xf32>
    %160 = tpu.matmul %159, %29, %cst_66 {dimension_numbers = #tpu.dot_dimension_numbers<[1], [0], [0], [1], [0, 0, 1, 1], [], []>} : vector<16x128xbf16>, vector<128x512xbf16>, vector<16x512xf32> -> vector<16x512xf32>
    %161 = arith.addf %158, %160 : vector<16x512xf32>
    %162 = vector.extract_strided_slice %161 {offsets = [0, 0], sizes = [16, 128], strides = [1, 1]} : vector<16x512xf32> to vector<16x128xf32>
    %cst_67 = arith.constant 5.000000e-01 : f32
    %163 = vector.broadcast %cst_67 : f32 to vector<16x128xf32>
    %164 = arith.mulf %163, %162 : vector<16x128xf32>
    %165 = math.tanh %164 : vector<16x128xf32>
    %cst_68 = arith.constant 5.000000e-01 : f32
    %166 = vector.broadcast %cst_68 : f32 to vector<16x128xf32>
    %167 = arith.mulf %166, %165 : vector<16x128xf32>
    %cst_69 = arith.constant 5.000000e-01 : f32
    %168 = vector.broadcast %cst_69 : f32 to vector<16x128xf32>
    %169 = arith.addf %167, %168 : vector<16x128xf32>
    %170 = vector.extract_strided_slice %161 {offsets = [0, 128], sizes = [16, 128], strides = [1, 1]} : vector<16x512xf32> to vector<16x128xf32>
    %cst_70 = arith.constant 5.000000e-01 : f32
    %171 = vector.broadcast %cst_70 : f32 to vector<16x128xf32>
    %172 = arith.mulf %171, %170 : vector<16x128xf32>
    %173 = math.tanh %172 : vector<16x128xf32>
    %cst_71 = arith.constant 5.000000e-01 : f32
    %174 = vector.broadcast %cst_71 : f32 to vector<16x128xf32>
    %175 = arith.mulf %174, %173 : vector<16x128xf32>
    %cst_72 = arith.constant 5.000000e-01 : f32
    %176 = vector.broadcast %cst_72 : f32 to vector<16x128xf32>
    %177 = arith.addf %175, %176 : vector<16x128xf32>
    %178 = vector.extract_strided_slice %161 {offsets = [0, 256], sizes = [16, 128], strides = [1, 1]} : vector<16x512xf32> to vector<16x128xf32>
    %179 = math.tanh %178 : vector<16x128xf32>
    %180 = vector.extract_strided_slice %161 {offsets = [0, 384], sizes = [16, 128], strides = [1, 1]} : vector<16x512xf32> to vector<16x128xf32>
    %cst_73 = arith.constant 5.000000e-01 : f32
    %181 = vector.broadcast %cst_73 : f32 to vector<16x128xf32>
    %182 = arith.mulf %181, %180 : vector<16x128xf32>
    %183 = math.tanh %182 : vector<16x128xf32>
    %cst_74 = arith.constant 5.000000e-01 : f32
    %184 = vector.broadcast %cst_74 : f32 to vector<16x128xf32>
    %185 = arith.mulf %184, %183 : vector<16x128xf32>
    %cst_75 = arith.constant 5.000000e-01 : f32
    %186 = vector.broadcast %cst_75 : f32 to vector<16x128xf32>
    %187 = arith.addf %185, %186 : vector<16x128xf32>
    %188 = arith.mulf %177, %145 : vector<16x128xf32>
    %189 = arith.mulf %169, %179 : vector<16x128xf32>
    %190 = arith.addf %188, %189 : vector<16x128xf32>
    %191 = math.tanh %190 : vector<16x128xf32>
    %192 = arith.mulf %187, %191 : vector<16x128xf32>
    %c2 = arith.constant 2 : index
    %c0_76 = arith.constant 0 : index
    %c0_77 = arith.constant 0 : index
    %193 = vector.load %arg0[%c2, %c0_76, %c0_77] : memref<8x16x1xf32, #tpu.memory_space<vmem>>, vector<1x16x1xf32>
    %194 = vector.shape_cast %193 : vector<1x16x1xf32> to vector<16x1xf32>
    %c2_78 = arith.constant 2 : index
    %c0_79 = arith.constant 0 : index
    %c0_80 = arith.constant 0 : index
    %195 = vector.load %arg1[%c2_78, %c0_79, %c0_80] : memref<8x16x1xf32, #tpu.memory_space<vmem>>, vector<1x16x1xf32>
    %196 = vector.shape_cast %195 : vector<1x16x1xf32> to vector<16x1xf32>
    %197 = vector.shape_cast %194 : vector<16x1xf32> to vector<16x1xf32>
    %198 = vector.broadcast %197 : vector<16x1xf32> to vector<16x128xf32>
    %199 = vector.shape_cast %196 : vector<16x1xf32> to vector<16x1xf32>
    %200 = vector.broadcast %199 : vector<16x1xf32> to vector<16x128xf32>
    %201 = arith.select %28, %198, %200 : vector<16x128xi1>, vector<16x128xf32>
    %cst_81 = arith.constant 5.000000e-01 : f32
    %202 = vector.broadcast %cst_81 : f32 to vector<16x128xf32>
    %203 = arith.cmpf ogt, %201, %202 : vector<16x128xf32>
    %cst_82 = arith.constant 0.000000e+00 : f32
    %204 = vector.broadcast %cst_82 : f32 to vector<16x128xf32>
    %205 = arith.select %203, %192, %204 : vector<16x128xi1>, vector<16x128xf32>
    %206 = arith.select %203, %192, %144 : vector<16x128xi1>, vector<16x128xf32>
    %207 = arith.select %203, %190, %145 : vector<16x128xi1>, vector<16x128xf32>
    %208 = vector.extract_strided_slice %205 {offsets = [0, 0], sizes = [16, 64], strides = [1, 1]} : vector<16x128xf32> to vector<16x64xf32>
    %209 = arith.truncf %208 : vector<16x64xf32> to vector<16x64xbf16>
    %c2_83 = arith.constant 2 : index
    %c0_84 = arith.constant 0 : index
    %c0_85 = arith.constant 0 : index
    %210 = vector.load %arg6[%c2_83, %c0_84, %c0_85] : memref<8x16x128xbf16, #tpu.memory_space<vmem>>, vector<1x16x64xbf16>
    %211 = vector.shape_cast %210 : vector<1x16x64xbf16> to vector<16x64xbf16>
    %212 = vector.shape_cast %209 : vector<16x64xbf16> to vector<1x16x64xbf16>
    tpu.vector_store %arg6[%c2_83, %c0_84, %c0_85], %212 {strides = array<i32>} : memref<8x16x128xbf16, #tpu.memory_space<vmem>>, vector<1x16x64xbf16>,
    %213 = vector.extract_strided_slice %205 {offsets = [0, 64], sizes = [16, 64], strides = [1, 1]} : vector<16x128xf32> to vector<16x64xf32>
    %214 = arith.truncf %213 : vector<16x64xf32> to vector<16x64xbf16>
    %c5 = arith.constant 5 : index
    %c0_86 = arith.constant 0 : index
    %c64_87 = arith.constant 64 : index
    %215 = vector.load %arg6[%c5, %c0_86, %c64_87] : memref<8x16x128xbf16, #tpu.memory_space<vmem>>, vector<1x16x64xbf16>
    %216 = vector.shape_cast %215 : vector<1x16x64xbf16> to vector<16x64xbf16>
    %217 = vector.shape_cast %214 : vector<16x64xbf16> to vector<1x16x64xbf16>
    tpu.vector_store %arg6[%c5, %c0_86, %c64_87], %217 {strides = array<i32>} : memref<8x16x128xbf16, #tpu.memory_space<vmem>>, vector<1x16x64xbf16>,
    %c48 = arith.constant 48 : index
    %c0_88 = arith.constant 0 : index
    %218 = vector.load %arg9[%c48, %c0_88] : memref<128x512xf32, #tpu.memory_space<vmem>>, vector<16x512xf32>
    %c64_89 = arith.constant 64 : index
    %c0_90 = arith.constant 0 : index
    %219 = vector.load %arg9[%c64_89, %c0_90] : memref<128x512xf32, #tpu.memory_space<vmem>>, vector<16x512xf32>
    %220 = arith.select %25, %218, %219 : vector<16x512xi1>, vector<16x512xf32>
    %221 = arith.truncf %206 : vector<16x128xf32> to vector<16x128xbf16>
    %cst_91 = arith.constant dense<0.000000e+00> : vector<16x512xf32>
    %222 = tpu.matmul %221, %29, %cst_91 {dimension_numbers = #tpu.dot_dimension_numbers<[1], [0], [0], [1], [0, 0, 1, 1], [], []>} : vector<16x128xbf16>, vector<128x512xbf16>, vector<16x512xf32> -> vector<16x512xf32>
    %223 = arith.addf %220, %222 : vector<16x512xf32>
    %224 = vector.extract_strided_slice %223 {offsets = [0, 0], sizes = [16, 128], strides = [1, 1]} : vector<16x512xf32> to vector<16x128xf32>
    %cst_92 = arith.constant 5.000000e-01 : f32
    %225 = vector.broadcast %cst_92 : f32 to vector<16x128xf32>
    %226 = arith.mulf %225, %224 : vector<16x128xf32>
    %227 = math.tanh %226 : vector<16x128xf32>
    %cst_93 = arith.constant 5.000000e-01 : f32
    %228 = vector.broadcast %cst_93 : f32 to vector<16x128xf32>
    %229 = arith.mulf %228, %227 : vector<16x128xf32>
    %cst_94 = arith.constant 5.000000e-01 : f32
    %230 = vector.broadcast %cst_94 : f32 to vector<16x128xf32>
    %231 = arith.addf %229, %230 : vector<16x128xf32>
    %232 = vector.extract_strided_slice %223 {offsets = [0, 128], sizes = [16, 128], strides = [1, 1]} : vector<16x512xf32> to vector<16x128xf32>
    %cst_95 = arith.constant 5.000000e-01 : f32
    %233 = vector.broadcast %cst_95 : f32 to vector<16x128xf32>
    %234 = arith.mulf %233, %232 : vector<16x128xf32>
    %235 = math.tanh %234 : vector<16x128xf32>
    %cst_96 = arith.constant 5.000000e-01 : f32
    %236 = vector.broadcast %cst_96 : f32 to vector<16x128xf32>
    %237 = arith.mulf %236, %235 : vector<16x128xf32>
    %cst_97 = arith.constant 5.000000e-01 : f32
    %238 = vector.broadcast %cst_97 : f32 to vector<16x128xf32>
    %239 = arith.addf %237, %238 : vector<16x128xf32>
    %240 = vector.extract_strided_slice %223 {offsets = [0, 256], sizes = [16, 128], strides = [1, 1]} : vector<16x512xf32> to vector<16x128xf32>
    %241 = math.tanh %240 : vector<16x128xf32>
    %242 = vector.extract_strided_slice %223 {offsets = [0, 384], sizes = [16, 128], strides = [1, 1]} : vector<16x512xf32> to vector<16x128xf32>
    %cst_98 = arith.constant 5.000000e-01 : f32
    %243 = vector.broadcast %cst_98 : f32 to vector<16x128xf32>
    %244 = arith.mulf %243, %242 : vector<16x128xf32>
    %245 = math.tanh %244 : vector<16x128xf32>
    %cst_99 = arith.constant 5.000000e-01 : f32
    %246 = vector.broadcast %cst_99 : f32 to vector<16x128xf32>
    %247 = arith.mulf %246, %245 : vector<16x128xf32>
    %cst_100 = arith.constant 5.000000e-01 : f32
    %248 = vector.broadcast %cst_100 : f32 to vector<16x128xf32>
    %249 = arith.addf %247, %248 : vector<16x128xf32>
    %250 = arith.mulf %239, %207 : vector<16x128xf32>
    %251 = arith.mulf %231, %241 : vector<16x128xf32>
    %252 = arith.addf %250, %251 : vector<16x128xf32>
    %253 = math.tanh %252 : vector<16x128xf32>
    %254 = arith.mulf %249, %253 : vector<16x128xf32>
    %c3 = arith.constant 3 : index
    %c0_101 = arith.constant 0 : index
    %c0_102 = arith.constant 0 : index
    %255 = vector.load %arg0[%c3, %c0_101, %c0_102] : memref<8x16x1xf32, #tpu.memory_space<vmem>>, vector<1x16x1xf32>
    %256 = vector.shape_cast %255 : vector<1x16x1xf32> to vector<16x1xf32>
    %c3_103 = arith.constant 3 : index
    %c0_104 = arith.constant 0 : index
    %c0_105 = arith.constant 0 : index
    %257 = vector.load %arg1[%c3_103, %c0_104, %c0_105] : memref<8x16x1xf32, #tpu.memory_space<vmem>>, vector<1x16x1xf32>
    %258 = vector.shape_cast %257 : vector<1x16x1xf32> to vector<16x1xf32>
    %259 = vector.shape_cast %256 : vector<16x1xf32> to vector<16x1xf32>
    %260 = vector.broadcast %259 : vector<16x1xf32> to vector<16x128xf32>
    %261 = vector.shape_cast %258 : vector<16x1xf32> to vector<16x1xf32>
    %262 = vector.broadcast %261 : vector<16x1xf32> to vector<16x128xf32>
    %263 = arith.select %28, %260, %262 : vector<16x128xi1>, vector<16x128xf32>
    %cst_106 = arith.constant 5.000000e-01 : f32
    %264 = vector.broadcast %cst_106 : f32 to vector<16x128xf32>
    %265 = arith.cmpf ogt, %263, %264 : vector<16x128xf32>
    %cst_107 = arith.constant 0.000000e+00 : f32
    %266 = vector.broadcast %cst_107 : f32 to vector<16x128xf32>
    %267 = arith.select %265, %254, %266 : vector<16x128xi1>, vector<16x128xf32>
    %268 = arith.select %265, %254, %206 : vector<16x128xi1>, vector<16x128xf32>
    %269 = arith.select %265, %252, %207 : vector<16x128xi1>, vector<16x128xf32>
    %270 = vector.extract_strided_slice %267 {offsets = [0, 0], sizes = [16, 64], strides = [1, 1]} : vector<16x128xf32> to vector<16x64xf32>
    %271 = arith.truncf %270 : vector<16x64xf32> to vector<16x64xbf16>
    %c3_108 = arith.constant 3 : index
    %c0_109 = arith.constant 0 : index
    %c0_110 = arith.constant 0 : index
    %272 = vector.load %arg6[%c3_108, %c0_109, %c0_110] : memref<8x16x128xbf16, #tpu.memory_space<vmem>>, vector<1x16x64xbf16>
    %273 = vector.shape_cast %272 : vector<1x16x64xbf16> to vector<16x64xbf16>
    %274 = vector.shape_cast %271 : vector<16x64xbf16> to vector<1x16x64xbf16>
    tpu.vector_store %arg6[%c3_108, %c0_109, %c0_110], %274 {strides = array<i32>} : memref<8x16x128xbf16, #tpu.memory_space<vmem>>, vector<1x16x64xbf16>,
    %275 = vector.extract_strided_slice %267 {offsets = [0, 64], sizes = [16, 64], strides = [1, 1]} : vector<16x128xf32> to vector<16x64xf32>
    %276 = arith.truncf %275 : vector<16x64xf32> to vector<16x64xbf16>
    %c4 = arith.constant 4 : index
    %c0_111 = arith.constant 0 : index
    %c64_112 = arith.constant 64 : index
    %277 = vector.load %arg6[%c4, %c0_111, %c64_112] : memref<8x16x128xbf16, #tpu.memory_space<vmem>>, vector<1x16x64xbf16>
    %278 = vector.shape_cast %277 : vector<1x16x64xbf16> to vector<16x64xbf16>
    %279 = vector.shape_cast %276 : vector<16x64xbf16> to vector<1x16x64xbf16>
    tpu.vector_store %arg6[%c4, %c0_111, %c64_112], %279 {strides = array<i32>} : memref<8x16x128xbf16, #tpu.memory_space<vmem>>, vector<1x16x64xbf16>,
    %c64_113 = arith.constant 64 : index
    %c0_114 = arith.constant 0 : index
    %280 = vector.load %arg9[%c64_113, %c0_114] : memref<128x512xf32, #tpu.memory_space<vmem>>, vector<16x512xf32>
    %c48_115 = arith.constant 48 : index
    %c0_116 = arith.constant 0 : index
    %281 = vector.load %arg9[%c48_115, %c0_116] : memref<128x512xf32, #tpu.memory_space<vmem>>, vector<16x512xf32>
    %282 = arith.select %25, %280, %281 : vector<16x512xi1>, vector<16x512xf32>
    %283 = arith.truncf %268 : vector<16x128xf32> to vector<16x128xbf16>
    %cst_117 = arith.constant dense<0.000000e+00> : vector<16x512xf32>
    %284 = tpu.matmul %283, %29, %cst_117 {dimension_numbers = #tpu.dot_dimension_numbers<[1], [0], [0], [1], [0, 0, 1, 1], [], []>} : vector<16x128xbf16>, vector<128x512xbf16>, vector<16x512xf32> -> vector<16x512xf32>
    %285 = arith.addf %282, %284 : vector<16x512xf32>
    %286 = vector.extract_strided_slice %285 {offsets = [0, 0], sizes = [16, 128], strides = [1, 1]} : vector<16x512xf32> to vector<16x128xf32>
    %cst_118 = arith.constant 5.000000e-01 : f32
    %287 = vector.broadcast %cst_118 : f32 to vector<16x128xf32>
    %288 = arith.mulf %287, %286 : vector<16x128xf32>
    %289 = math.tanh %288 : vector<16x128xf32>
    %cst_119 = arith.constant 5.000000e-01 : f32
    %290 = vector.broadcast %cst_119 : f32 to vector<16x128xf32>
    %291 = arith.mulf %290, %289 : vector<16x128xf32>
    %cst_120 = arith.constant 5.000000e-01 : f32
    %292 = vector.broadcast %cst_120 : f32 to vector<16x128xf32>
    %293 = arith.addf %291, %292 : vector<16x128xf32>
    %294 = vector.extract_strided_slice %285 {offsets = [0, 128], sizes = [16, 128], strides = [1, 1]} : vector<16x512xf32> to vector<16x128xf32>
    %cst_121 = arith.constant 5.000000e-01 : f32
    %295 = vector.broadcast %cst_121 : f32 to vector<16x128xf32>
    %296 = arith.mulf %295, %294 : vector<16x128xf32>
    %297 = math.tanh %296 : vector<16x128xf32>
    %cst_122 = arith.constant 5.000000e-01 : f32
    %298 = vector.broadcast %cst_122 : f32 to vector<16x128xf32>
    %299 = arith.mulf %298, %297 : vector<16x128xf32>
    %cst_123 = arith.constant 5.000000e-01 : f32
    %300 = vector.broadcast %cst_123 : f32 to vector<16x128xf32>
    %301 = arith.addf %299, %300 : vector<16x128xf32>
    %302 = vector.extract_strided_slice %285 {offsets = [0, 256], sizes = [16, 128], strides = [1, 1]} : vector<16x512xf32> to vector<16x128xf32>
    %303 = math.tanh %302 : vector<16x128xf32>
    %304 = vector.extract_strided_slice %285 {offsets = [0, 384], sizes = [16, 128], strides = [1, 1]} : vector<16x512xf32> to vector<16x128xf32>
    %cst_124 = arith.constant 5.000000e-01 : f32
    %305 = vector.broadcast %cst_124 : f32 to vector<16x128xf32>
    %306 = arith.mulf %305, %304 : vector<16x128xf32>
    %307 = math.tanh %306 : vector<16x128xf32>
    %cst_125 = arith.constant 5.000000e-01 : f32
    %308 = vector.broadcast %cst_125 : f32 to vector<16x128xf32>
    %309 = arith.mulf %308, %307 : vector<16x128xf32>
    %cst_126 = arith.constant 5.000000e-01 : f32
    %310 = vector.broadcast %cst_126 : f32 to vector<16x128xf32>
    %311 = arith.addf %309, %310 : vector<16x128xf32>
    %312 = arith.mulf %301, %269 : vector<16x128xf32>
    %313 = arith.mulf %293, %303 : vector<16x128xf32>
    %314 = arith.addf %312, %313 : vector<16x128xf32>
    %315 = math.tanh %314 : vector<16x128xf32>
    %316 = arith.mulf %311, %315 : vector<16x128xf32>
    %c4_127 = arith.constant 4 : index
    %c0_128 = arith.constant 0 : index
    %c0_129 = arith.constant 0 : index
    %317 = vector.load %arg0[%c4_127, %c0_128, %c0_129] : memref<8x16x1xf32, #tpu.memory_space<vmem>>, vector<1x16x1xf32>
    %318 = vector.shape_cast %317 : vector<1x16x1xf32> to vector<16x1xf32>
    %c4_130 = arith.constant 4 : index
    %c0_131 = arith.constant 0 : index
    %c0_132 = arith.constant 0 : index
    %319 = vector.load %arg1[%c4_130, %c0_131, %c0_132] : memref<8x16x1xf32, #tpu.memory_space<vmem>>, vector<1x16x1xf32>
    %320 = vector.shape_cast %319 : vector<1x16x1xf32> to vector<16x1xf32>
    %321 = vector.shape_cast %318 : vector<16x1xf32> to vector<16x1xf32>
    %322 = vector.broadcast %321 : vector<16x1xf32> to vector<16x128xf32>
    %323 = vector.shape_cast %320 : vector<16x1xf32> to vector<16x1xf32>
    %324 = vector.broadcast %323 : vector<16x1xf32> to vector<16x128xf32>
    %325 = arith.select %28, %322, %324 : vector<16x128xi1>, vector<16x128xf32>
    %cst_133 = arith.constant 5.000000e-01 : f32
    %326 = vector.broadcast %cst_133 : f32 to vector<16x128xf32>
    %327 = arith.cmpf ogt, %325, %326 : vector<16x128xf32>
    %cst_134 = arith.constant 0.000000e+00 : f32
    %328 = vector.broadcast %cst_134 : f32 to vector<16x128xf32>
    %329 = arith.select %327, %316, %328 : vector<16x128xi1>, vector<16x128xf32>
    %330 = arith.select %327, %316, %268 : vector<16x128xi1>, vector<16x128xf32>
    %331 = arith.select %327, %314, %269 : vector<16x128xi1>, vector<16x128xf32>
    %332 = vector.extract_strided_slice %329 {offsets = [0, 0], sizes = [16, 64], strides = [1, 1]} : vector<16x128xf32> to vector<16x64xf32>
    %333 = arith.truncf %332 : vector<16x64xf32> to vector<16x64xbf16>
    %c4_135 = arith.constant 4 : index
    %c0_136 = arith.constant 0 : index
    %c0_137 = arith.constant 0 : index
    %334 = vector.load %arg6[%c4_135, %c0_136, %c0_137] : memref<8x16x128xbf16, #tpu.memory_space<vmem>>, vector<1x16x64xbf16>
    %335 = vector.shape_cast %334 : vector<1x16x64xbf16> to vector<16x64xbf16>
    %336 = vector.shape_cast %333 : vector<16x64xbf16> to vector<1x16x64xbf16>
    tpu.vector_store %arg6[%c4_135, %c0_136, %c0_137], %336 {strides = array<i32>} : memref<8x16x128xbf16, #tpu.memory_space<vmem>>, vector<1x16x64xbf16>,
    %337 = vector.extract_strided_slice %329 {offsets = [0, 64], sizes = [16, 64], strides = [1, 1]} : vector<16x128xf32> to vector<16x64xf32>
    %338 = arith.truncf %337 : vector<16x64xf32> to vector<16x64xbf16>
    %c3_138 = arith.constant 3 : index
    %c0_139 = arith.constant 0 : index
    %c64_140 = arith.constant 64 : index
    %339 = vector.load %arg6[%c3_138, %c0_139, %c64_140] : memref<8x16x128xbf16, #tpu.memory_space<vmem>>, vector<1x16x64xbf16>
    %340 = vector.shape_cast %339 : vector<1x16x64xbf16> to vector<16x64xbf16>
    %341 = vector.shape_cast %338 : vector<16x64xbf16> to vector<1x16x64xbf16>
    tpu.vector_store %arg6[%c3_138, %c0_139, %c64_140], %341 {strides = array<i32>} : memref<8x16x128xbf16, #tpu.memory_space<vmem>>, vector<1x16x64xbf16>,
    %c80_141 = arith.constant 80 : index
    %c0_142 = arith.constant 0 : index
    %342 = vector.load %arg9[%c80_141, %c0_142] : memref<128x512xf32, #tpu.memory_space<vmem>>, vector<16x512xf32>
    %c32_143 = arith.constant 32 : index
    %c0_144 = arith.constant 0 : index
    %343 = vector.load %arg9[%c32_143, %c0_144] : memref<128x512xf32, #tpu.memory_space<vmem>>, vector<16x512xf32>
    %344 = arith.select %25, %342, %343 : vector<16x512xi1>, vector<16x512xf32>
    %345 = arith.truncf %330 : vector<16x128xf32> to vector<16x128xbf16>
    %cst_145 = arith.constant dense<0.000000e+00> : vector<16x512xf32>
    %346 = tpu.matmul %345, %29, %cst_145 {dimension_numbers = #tpu.dot_dimension_numbers<[1], [0], [0], [1], [0, 0, 1, 1], [], []>} : vector<16x128xbf16>, vector<128x512xbf16>, vector<16x512xf32> -> vector<16x512xf32>
    %347 = arith.addf %344, %346 : vector<16x512xf32>
    %348 = vector.extract_strided_slice %347 {offsets = [0, 0], sizes = [16, 128], strides = [1, 1]} : vector<16x512xf32> to vector<16x128xf32>
    %cst_146 = arith.constant 5.000000e-01 : f32
    %349 = vector.broadcast %cst_146 : f32 to vector<16x128xf32>
    %350 = arith.mulf %349, %348 : vector<16x128xf32>
    %351 = math.tanh %350 : vector<16x128xf32>
    %cst_147 = arith.constant 5.000000e-01 : f32
    %352 = vector.broadcast %cst_147 : f32 to vector<16x128xf32>
    %353 = arith.mulf %352, %351 : vector<16x128xf32>
    %cst_148 = arith.constant 5.000000e-01 : f32
    %354 = vector.broadcast %cst_148 : f32 to vector<16x128xf32>
    %355 = arith.addf %353, %354 : vector<16x128xf32>
    %356 = vector.extract_strided_slice %347 {offsets = [0, 128], sizes = [16, 128], strides = [1, 1]} : vector<16x512xf32> to vector<16x128xf32>
    %cst_149 = arith.constant 5.000000e-01 : f32
    %357 = vector.broadcast %cst_149 : f32 to vector<16x128xf32>
    %358 = arith.mulf %357, %356 : vector<16x128xf32>
    %359 = math.tanh %358 : vector<16x128xf32>
    %cst_150 = arith.constant 5.000000e-01 : f32
    %360 = vector.broadcast %cst_150 : f32 to vector<16x128xf32>
    %361 = arith.mulf %360, %359 : vector<16x128xf32>
    %cst_151 = arith.constant 5.000000e-01 : f32
    %362 = vector.broadcast %cst_151 : f32 to vector<16x128xf32>
    %363 = arith.addf %361, %362 : vector<16x128xf32>
    %364 = vector.extract_strided_slice %347 {offsets = [0, 256], sizes = [16, 128], strides = [1, 1]} : vector<16x512xf32> to vector<16x128xf32>
    %365 = math.tanh %364 : vector<16x128xf32>
    %366 = vector.extract_strided_slice %347 {offsets = [0, 384], sizes = [16, 128], strides = [1, 1]} : vector<16x512xf32> to vector<16x128xf32>
    %cst_152 = arith.constant 5.000000e-01 : f32
    %367 = vector.broadcast %cst_152 : f32 to vector<16x128xf32>
    %368 = arith.mulf %367, %366 : vector<16x128xf32>
    %369 = math.tanh %368 : vector<16x128xf32>
    %cst_153 = arith.constant 5.000000e-01 : f32
    %370 = vector.broadcast %cst_153 : f32 to vector<16x128xf32>
    %371 = arith.mulf %370, %369 : vector<16x128xf32>
    %cst_154 = arith.constant 5.000000e-01 : f32
    %372 = vector.broadcast %cst_154 : f32 to vector<16x128xf32>
    %373 = arith.addf %371, %372 : vector<16x128xf32>
    %374 = arith.mulf %363, %331 : vector<16x128xf32>
    %375 = arith.mulf %355, %365 : vector<16x128xf32>
    %376 = arith.addf %374, %375 : vector<16x128xf32>
    %377 = math.tanh %376 : vector<16x128xf32>
    %378 = arith.mulf %373, %377 : vector<16x128xf32>
    %c5_155 = arith.constant 5 : index
    %c0_156 = arith.constant 0 : index
    %c0_157 = arith.constant 0 : index
    %379 = vector.load %arg0[%c5_155, %c0_156, %c0_157] : memref<8x16x1xf32, #tpu.memory_space<vmem>>, vector<1x16x1xf32>
    %380 = vector.shape_cast %379 : vector<1x16x1xf32> to vector<16x1xf32>
    %c5_158 = arith.constant 5 : index
    %c0_159 = arith.constant 0 : index
    %c0_160 = arith.constant 0 : index
    %381 = vector.load %arg1[%c5_158, %c0_159, %c0_160] : memref<8x16x1xf32, #tpu.memory_space<vmem>>, vector<1x16x1xf32>
    %382 = vector.shape_cast %381 : vector<1x16x1xf32> to vector<16x1xf32>
    %383 = vector.shape_cast %380 : vector<16x1xf32> to vector<16x1xf32>
    %384 = vector.broadcast %383 : vector<16x1xf32> to vector<16x128xf32>
    %385 = vector.shape_cast %382 : vector<16x1xf32> to vector<16x1xf32>
    %386 = vector.broadcast %385 : vector<16x1xf32> to vector<16x128xf32>
    %387 = arith.select %28, %384, %386 : vector<16x128xi1>, vector<16x128xf32>
    %cst_161 = arith.constant 5.000000e-01 : f32
    %388 = vector.broadcast %cst_161 : f32 to vector<16x128xf32>
    %389 = arith.cmpf ogt, %387, %388 : vector<16x128xf32>
    %cst_162 = arith.constant 0.000000e+00 : f32
    %390 = vector.broadcast %cst_162 : f32 to vector<16x128xf32>
    %391 = arith.select %389, %378, %390 : vector<16x128xi1>, vector<16x128xf32>
    %392 = arith.select %389, %378, %330 : vector<16x128xi1>, vector<16x128xf32>
    %393 = arith.select %389, %376, %331 : vector<16x128xi1>, vector<16x128xf32>
    %394 = vector.extract_strided_slice %391 {offsets = [0, 0], sizes = [16, 64], strides = [1, 1]} : vector<16x128xf32> to vector<16x64xf32>
    %395 = arith.truncf %394 : vector<16x64xf32> to vector<16x64xbf16>
    %c5_163 = arith.constant 5 : index
    %c0_164 = arith.constant 0 : index
    %c0_165 = arith.constant 0 : index
    %396 = vector.load %arg6[%c5_163, %c0_164, %c0_165] : memref<8x16x128xbf16, #tpu.memory_space<vmem>>, vector<1x16x64xbf16>
    %397 = vector.shape_cast %396 : vector<1x16x64xbf16> to vector<16x64xbf16>
    %398 = vector.shape_cast %395 : vector<16x64xbf16> to vector<1x16x64xbf16>
    tpu.vector_store %arg6[%c5_163, %c0_164, %c0_165], %398 {strides = array<i32>} : memref<8x16x128xbf16, #tpu.memory_space<vmem>>, vector<1x16x64xbf16>,
    %399 = vector.extract_strided_slice %391 {offsets = [0, 64], sizes = [16, 64], strides = [1, 1]} : vector<16x128xf32> to vector<16x64xf32>
    %400 = arith.truncf %399 : vector<16x64xf32> to vector<16x64xbf16>
    %c2_166 = arith.constant 2 : index
    %c0_167 = arith.constant 0 : index
    %c64_168 = arith.constant 64 : index
    %401 = vector.load %arg6[%c2_166, %c0_167, %c64_168] : memref<8x16x128xbf16, #tpu.memory_space<vmem>>, vector<1x16x64xbf16>
    %402 = vector.shape_cast %401 : vector<1x16x64xbf16> to vector<16x64xbf16>
    %403 = vector.shape_cast %400 : vector<16x64xbf16> to vector<1x16x64xbf16>
    tpu.vector_store %arg6[%c2_166, %c0_167, %c64_168], %403 {strides = array<i32>} : memref<8x16x128xbf16, #tpu.memory_space<vmem>>, vector<1x16x64xbf16>,
    %c96_169 = arith.constant 96 : index
    %c0_170 = arith.constant 0 : index
    %404 = vector.load %arg9[%c96_169, %c0_170] : memref<128x512xf32, #tpu.memory_space<vmem>>, vector<16x512xf32>
    %c16_171 = arith.constant 16 : index
    %c0_172 = arith.constant 0 : index
    %405 = vector.load %arg9[%c16_171, %c0_172] : memref<128x512xf32, #tpu.memory_space<vmem>>, vector<16x512xf32>
    %406 = arith.select %25, %404, %405 : vector<16x512xi1>, vector<16x512xf32>
    %407 = arith.truncf %392 : vector<16x128xf32> to vector<16x128xbf16>
    %cst_173 = arith.constant dense<0.000000e+00> : vector<16x512xf32>
    %408 = tpu.matmul %407, %29, %cst_173 {dimension_numbers = #tpu.dot_dimension_numbers<[1], [0], [0], [1], [0, 0, 1, 1], [], []>} : vector<16x128xbf16>, vector<128x512xbf16>, vector<16x512xf32> -> vector<16x512xf32>
    %409 = arith.addf %406, %408 : vector<16x512xf32>
    %410 = vector.extract_strided_slice %409 {offsets = [0, 0], sizes = [16, 128], strides = [1, 1]} : vector<16x512xf32> to vector<16x128xf32>
    %cst_174 = arith.constant 5.000000e-01 : f32
    %411 = vector.broadcast %cst_174 : f32 to vector<16x128xf32>
    %412 = arith.mulf %411, %410 : vector<16x128xf32>
    %413 = math.tanh %412 : vector<16x128xf32>
    %cst_175 = arith.constant 5.000000e-01 : f32
    %414 = vector.broadcast %cst_175 : f32 to vector<16x128xf32>
    %415 = arith.mulf %414, %413 : vector<16x128xf32>
    %cst_176 = arith.constant 5.000000e-01 : f32
    %416 = vector.broadcast %cst_176 : f32 to vector<16x128xf32>
    %417 = arith.addf %415, %416 : vector<16x128xf32>
    %418 = vector.extract_strided_slice %409 {offsets = [0, 128], sizes = [16, 128], strides = [1, 1]} : vector<16x512xf32> to vector<16x128xf32>
    %cst_177 = arith.constant 5.000000e-01 : f32
    %419 = vector.broadcast %cst_177 : f32 to vector<16x128xf32>
    %420 = arith.mulf %419, %418 : vector<16x128xf32>
    %421 = math.tanh %420 : vector<16x128xf32>
    %cst_178 = arith.constant 5.000000e-01 : f32
    %422 = vector.broadcast %cst_178 : f32 to vector<16x128xf32>
    %423 = arith.mulf %422, %421 : vector<16x128xf32>
    %cst_179 = arith.constant 5.000000e-01 : f32
    %424 = vector.broadcast %cst_179 : f32 to vector<16x128xf32>
    %425 = arith.addf %423, %424 : vector<16x128xf32>
    %426 = vector.extract_strided_slice %409 {offsets = [0, 256], sizes = [16, 128], strides = [1, 1]} : vector<16x512xf32> to vector<16x128xf32>
    %427 = math.tanh %426 : vector<16x128xf32>
    %428 = vector.extract_strided_slice %409 {offsets = [0, 384], sizes = [16, 128], strides = [1, 1]} : vector<16x512xf32> to vector<16x128xf32>
    %cst_180 = arith.constant 5.000000e-01 : f32
    %429 = vector.broadcast %cst_180 : f32 to vector<16x128xf32>
    %430 = arith.mulf %429, %428 : vector<16x128xf32>
    %431 = math.tanh %430 : vector<16x128xf32>
    %cst_181 = arith.constant 5.000000e-01 : f32
    %432 = vector.broadcast %cst_181 : f32 to vector<16x128xf32>
    %433 = arith.mulf %432, %431 : vector<16x128xf32>
    %cst_182 = arith.constant 5.000000e-01 : f32
    %434 = vector.broadcast %cst_182 : f32 to vector<16x128xf32>
    %435 = arith.addf %433, %434 : vector<16x128xf32>
    %436 = arith.mulf %425, %393 : vector<16x128xf32>
    %437 = arith.mulf %417, %427 : vector<16x128xf32>
    %438 = arith.addf %436, %437 : vector<16x128xf32>
    %439 = math.tanh %438 : vector<16x128xf32>
    %440 = arith.mulf %435, %439 : vector<16x128xf32>
    %c6_183 = arith.constant 6 : index
    %c0_184 = arith.constant 0 : index
    %c0_185 = arith.constant 0 : index
    %441 = vector.load %arg0[%c6_183, %c0_184, %c0_185] : memref<8x16x1xf32, #tpu.memory_space<vmem>>, vector<1x16x1xf32>
    %442 = vector.shape_cast %441 : vector<1x16x1xf32> to vector<16x1xf32>
    %c6_186 = arith.constant 6 : index
    %c0_187 = arith.constant 0 : index
    %c0_188 = arith.constant 0 : index
    %443 = vector.load %arg1[%c6_186, %c0_187, %c0_188] : memref<8x16x1xf32, #tpu.memory_space<vmem>>, vector<1x16x1xf32>
    %444 = vector.shape_cast %443 : vector<1x16x1xf32> to vector<16x1xf32>
    %445 = vector.shape_cast %442 : vector<16x1xf32> to vector<16x1xf32>
    %446 = vector.broadcast %445 : vector<16x1xf32> to vector<16x128xf32>
    %447 = vector.shape_cast %444 : vector<16x1xf32> to vector<16x1xf32>
    %448 = vector.broadcast %447 : vector<16x1xf32> to vector<16x128xf32>
    %449 = arith.select %28, %446, %448 : vector<16x128xi1>, vector<16x128xf32>
    %cst_189 = arith.constant 5.000000e-01 : f32
    %450 = vector.broadcast %cst_189 : f32 to vector<16x128xf32>
    %451 = arith.cmpf ogt, %449, %450 : vector<16x128xf32>
    %cst_190 = arith.constant 0.000000e+00 : f32
    %452 = vector.broadcast %cst_190 : f32 to vector<16x128xf32>
    %453 = arith.select %451, %440, %452 : vector<16x128xi1>, vector<16x128xf32>
    %454 = arith.select %451, %440, %392 : vector<16x128xi1>, vector<16x128xf32>
    %455 = arith.select %451, %438, %393 : vector<16x128xi1>, vector<16x128xf32>
    %456 = vector.extract_strided_slice %453 {offsets = [0, 0], sizes = [16, 64], strides = [1, 1]} : vector<16x128xf32> to vector<16x64xf32>
    %457 = arith.truncf %456 : vector<16x64xf32> to vector<16x64xbf16>
    %c6_191 = arith.constant 6 : index
    %c0_192 = arith.constant 0 : index
    %c0_193 = arith.constant 0 : index
    %458 = vector.load %arg6[%c6_191, %c0_192, %c0_193] : memref<8x16x128xbf16, #tpu.memory_space<vmem>>, vector<1x16x64xbf16>
    %459 = vector.shape_cast %458 : vector<1x16x64xbf16> to vector<16x64xbf16>
    %460 = vector.shape_cast %457 : vector<16x64xbf16> to vector<1x16x64xbf16>
    tpu.vector_store %arg6[%c6_191, %c0_192, %c0_193], %460 {strides = array<i32>} : memref<8x16x128xbf16, #tpu.memory_space<vmem>>, vector<1x16x64xbf16>,
    %461 = vector.extract_strided_slice %453 {offsets = [0, 64], sizes = [16, 64], strides = [1, 1]} : vector<16x128xf32> to vector<16x64xf32>
    %462 = arith.truncf %461 : vector<16x64xf32> to vector<16x64xbf16>
    %c1_194 = arith.constant 1 : index
    %c0_195 = arith.constant 0 : index
    %c64_196 = arith.constant 64 : index
    %463 = vector.load %arg6[%c1_194, %c0_195, %c64_196] : memref<8x16x128xbf16, #tpu.memory_space<vmem>>, vector<1x16x64xbf16>
    %464 = vector.shape_cast %463 : vector<1x16x64xbf16> to vector<16x64xbf16>
    %465 = vector.shape_cast %462 : vector<16x64xbf16> to vector<1x16x64xbf16>
    tpu.vector_store %arg6[%c1_194, %c0_195, %c64_196], %465 {strides = array<i32>} : memref<8x16x128xbf16, #tpu.memory_space<vmem>>, vector<1x16x64xbf16>,
    %c112_197 = arith.constant 112 : index
    %c0_198 = arith.constant 0 : index
    %466 = vector.load %arg9[%c112_197, %c0_198] : memref<128x512xf32, #tpu.memory_space<vmem>>, vector<16x512xf32>
    %c0_199 = arith.constant 0 : index
    %c0_200 = arith.constant 0 : index
    %467 = vector.load %arg9[%c0_199, %c0_200] : memref<128x512xf32, #tpu.memory_space<vmem>>, vector<16x512xf32>
    %468 = arith.select %25, %466, %467 : vector<16x512xi1>, vector<16x512xf32>
    %469 = arith.truncf %454 : vector<16x128xf32> to vector<16x128xbf16>
    %cst_201 = arith.constant dense<0.000000e+00> : vector<16x512xf32>
    %470 = tpu.matmul %469, %29, %cst_201 {dimension_numbers = #tpu.dot_dimension_numbers<[1], [0], [0], [1], [0, 0, 1, 1], [], []>} : vector<16x128xbf16>, vector<128x512xbf16>, vector<16x512xf32> -> vector<16x512xf32>
    %471 = arith.addf %468, %470 : vector<16x512xf32>
    %472 = vector.extract_strided_slice %471 {offsets = [0, 0], sizes = [16, 128], strides = [1, 1]} : vector<16x512xf32> to vector<16x128xf32>
    %cst_202 = arith.constant 5.000000e-01 : f32
    %473 = vector.broadcast %cst_202 : f32 to vector<16x128xf32>
    %474 = arith.mulf %473, %472 : vector<16x128xf32>
    %475 = math.tanh %474 : vector<16x128xf32>
    %cst_203 = arith.constant 5.000000e-01 : f32
    %476 = vector.broadcast %cst_203 : f32 to vector<16x128xf32>
    %477 = arith.mulf %476, %475 : vector<16x128xf32>
    %cst_204 = arith.constant 5.000000e-01 : f32
    %478 = vector.broadcast %cst_204 : f32 to vector<16x128xf32>
    %479 = arith.addf %477, %478 : vector<16x128xf32>
    %480 = vector.extract_strided_slice %471 {offsets = [0, 128], sizes = [16, 128], strides = [1, 1]} : vector<16x512xf32> to vector<16x128xf32>
    %cst_205 = arith.constant 5.000000e-01 : f32
    %481 = vector.broadcast %cst_205 : f32 to vector<16x128xf32>
    %482 = arith.mulf %481, %480 : vector<16x128xf32>
    %483 = math.tanh %482 : vector<16x128xf32>
    %cst_206 = arith.constant 5.000000e-01 : f32
    %484 = vector.broadcast %cst_206 : f32 to vector<16x128xf32>
    %485 = arith.mulf %484, %483 : vector<16x128xf32>
    %cst_207 = arith.constant 5.000000e-01 : f32
    %486 = vector.broadcast %cst_207 : f32 to vector<16x128xf32>
    %487 = arith.addf %485, %486 : vector<16x128xf32>
    %488 = vector.extract_strided_slice %471 {offsets = [0, 256], sizes = [16, 128], strides = [1, 1]} : vector<16x512xf32> to vector<16x128xf32>
    %489 = math.tanh %488 : vector<16x128xf32>
    %490 = vector.extract_strided_slice %471 {offsets = [0, 384], sizes = [16, 128], strides = [1, 1]} : vector<16x512xf32> to vector<16x128xf32>
    %cst_208 = arith.constant 5.000000e-01 : f32
    %491 = vector.broadcast %cst_208 : f32 to vector<16x128xf32>
    %492 = arith.mulf %491, %490 : vector<16x128xf32>
    %493 = math.tanh %492 : vector<16x128xf32>
    %cst_209 = arith.constant 5.000000e-01 : f32
    %494 = vector.broadcast %cst_209 : f32 to vector<16x128xf32>
    %495 = arith.mulf %494, %493 : vector<16x128xf32>
    %cst_210 = arith.constant 5.000000e-01 : f32
    %496 = vector.broadcast %cst_210 : f32 to vector<16x128xf32>
    %497 = arith.addf %495, %496 : vector<16x128xf32>
    %498 = arith.mulf %487, %455 : vector<16x128xf32>
    %499 = arith.mulf %479, %489 : vector<16x128xf32>
    %500 = arith.addf %498, %499 : vector<16x128xf32>
    %501 = math.tanh %500 : vector<16x128xf32>
    %502 = arith.mulf %497, %501 : vector<16x128xf32>
    %c7_211 = arith.constant 7 : index
    %c0_212 = arith.constant 0 : index
    %c0_213 = arith.constant 0 : index
    %503 = vector.load %arg0[%c7_211, %c0_212, %c0_213] : memref<8x16x1xf32, #tpu.memory_space<vmem>>, vector<1x16x1xf32>
    %504 = vector.shape_cast %503 : vector<1x16x1xf32> to vector<16x1xf32>
    %c7_214 = arith.constant 7 : index
    %c0_215 = arith.constant 0 : index
    %c0_216 = arith.constant 0 : index
    %505 = vector.load %arg1[%c7_214, %c0_215, %c0_216] : memref<8x16x1xf32, #tpu.memory_space<vmem>>, vector<1x16x1xf32>
    %506 = vector.shape_cast %505 : vector<1x16x1xf32> to vector<16x1xf32>
    %507 = vector.shape_cast %504 : vector<16x1xf32> to vector<16x1xf32>
    %508 = vector.broadcast %507 : vector<16x1xf32> to vector<16x128xf32>
    %509 = vector.shape_cast %506 : vector<16x1xf32> to vector<16x1xf32>
    %510 = vector.broadcast %509 : vector<16x1xf32> to vector<16x128xf32>
    %511 = arith.select %28, %508, %510 : vector<16x128xi1>, vector<16x128xf32>
    %cst_217 = arith.constant 5.000000e-01 : f32
    %512 = vector.broadcast %cst_217 : f32 to vector<16x128xf32>
    %513 = arith.cmpf ogt, %511, %512 : vector<16x128xf32>
    %cst_218 = arith.constant 0.000000e+00 : f32
    %514 = vector.broadcast %cst_218 : f32 to vector<16x128xf32>
    %515 = arith.select %513, %502, %514 : vector<16x128xi1>, vector<16x128xf32>
    %516 = arith.select %513, %502, %454 : vector<16x128xi1>, vector<16x128xf32>
    %517 = arith.select %513, %500, %455 : vector<16x128xi1>, vector<16x128xf32>
    %518 = vector.extract_strided_slice %515 {offsets = [0, 0], sizes = [16, 64], strides = [1, 1]} : vector<16x128xf32> to vector<16x64xf32>
    %519 = arith.truncf %518 : vector<16x64xf32> to vector<16x64xbf16>
    %c7_219 = arith.constant 7 : index
    %c0_220 = arith.constant 0 : index
    %c0_221 = arith.constant 0 : index
    %520 = vector.load %arg6[%c7_219, %c0_220, %c0_221] : memref<8x16x128xbf16, #tpu.memory_space<vmem>>, vector<1x16x64xbf16>
    %521 = vector.shape_cast %520 : vector<1x16x64xbf16> to vector<16x64xbf16>
    %522 = vector.shape_cast %519 : vector<16x64xbf16> to vector<1x16x64xbf16>
    tpu.vector_store %arg6[%c7_219, %c0_220, %c0_221], %522 {strides = array<i32>} : memref<8x16x128xbf16, #tpu.memory_space<vmem>>, vector<1x16x64xbf16>,
    %523 = vector.extract_strided_slice %515 {offsets = [0, 64], sizes = [16, 64], strides = [1, 1]} : vector<16x128xf32> to vector<16x64xf32>
    %524 = arith.truncf %523 : vector<16x64xf32> to vector<16x64xbf16>
    %c0_222 = arith.constant 0 : index
    %c0_223 = arith.constant 0 : index
    %c64_224 = arith.constant 64 : index
    %525 = vector.load %arg6[%c0_222, %c0_223, %c64_224] : memref<8x16x128xbf16, #tpu.memory_space<vmem>>, vector<1x16x64xbf16>
    %526 = vector.shape_cast %525 : vector<1x16x64xbf16> to vector<16x64xbf16>
    %527 = vector.shape_cast %524 : vector<16x64xbf16> to vector<1x16x64xbf16>
    tpu.vector_store %arg6[%c0_222, %c0_223, %c64_224], %527 {strides = array<i32>} : memref<8x16x128xbf16, #tpu.memory_space<vmem>>, vector<1x16x64xbf16>,
    %528 = vector.extract_strided_slice %516 {offsets = [0, 0], sizes = [16, 64], strides = [1, 1]} : vector<16x128xf32> to vector<16x64xf32>
    %c0_225 = arith.constant 0 : index
    %c0_226 = arith.constant 0 : index
    %c0_227 = arith.constant 0 : index
    %529 = vector.load %arg7[%c0_225, %c0_226, %c0_227] : memref<2x16x64xf32, #tpu.memory_space<vmem>>, vector<1x16x64xf32>
    %530 = vector.shape_cast %529 : vector<1x16x64xf32> to vector<16x64xf32>
    %531 = vector.shape_cast %528 : vector<16x64xf32> to vector<1x16x64xf32>
    tpu.vector_store %arg7[%c0_225, %c0_226, %c0_227], %531 {strides = array<i32>} : memref<2x16x64xf32, #tpu.memory_space<vmem>>, vector<1x16x64xf32>,
    %532 = vector.extract_strided_slice %516 {offsets = [0, 64], sizes = [16, 64], strides = [1, 1]} : vector<16x128xf32> to vector<16x64xf32>
    %c1_228 = arith.constant 1 : index
    %c0_229 = arith.constant 0 : index
    %c0_230 = arith.constant 0 : index
    %533 = vector.load %arg7[%c1_228, %c0_229, %c0_230] : memref<2x16x64xf32, #tpu.memory_space<vmem>>, vector<1x16x64xf32>
    %534 = vector.shape_cast %533 : vector<1x16x64xf32> to vector<16x64xf32>
    %535 = vector.shape_cast %532 : vector<16x64xf32> to vector<1x16x64xf32>
    tpu.vector_store %arg7[%c1_228, %c0_229, %c0_230], %535 {strides = array<i32>} : memref<2x16x64xf32, #tpu.memory_space<vmem>>, vector<1x16x64xf32>,
    %536 = vector.extract_strided_slice %517 {offsets = [0, 0], sizes = [16, 64], strides = [1, 1]} : vector<16x128xf32> to vector<16x64xf32>
    %c0_231 = arith.constant 0 : index
    %c0_232 = arith.constant 0 : index
    %c0_233 = arith.constant 0 : index
    %537 = vector.load %arg8[%c0_231, %c0_232, %c0_233] : memref<2x16x64xf32, #tpu.memory_space<vmem>>, vector<1x16x64xf32>
    %538 = vector.shape_cast %537 : vector<1x16x64xf32> to vector<16x64xf32>
    %539 = vector.shape_cast %536 : vector<16x64xf32> to vector<1x16x64xf32>
    tpu.vector_store %arg8[%c0_231, %c0_232, %c0_233], %539 {strides = array<i32>} : memref<2x16x64xf32, #tpu.memory_space<vmem>>, vector<1x16x64xf32>,
    %540 = vector.extract_strided_slice %517 {offsets = [0, 64], sizes = [16, 64], strides = [1, 1]} : vector<16x128xf32> to vector<16x64xf32>
    %c1_234 = arith.constant 1 : index
    %c0_235 = arith.constant 0 : index
    %c0_236 = arith.constant 0 : index
    %541 = vector.load %arg8[%c1_234, %c0_235, %c0_236] : memref<2x16x64xf32, #tpu.memory_space<vmem>>, vector<1x16x64xf32>
    %542 = vector.shape_cast %541 : vector<1x16x64xf32> to vector<16x64xf32>
    %543 = vector.shape_cast %540 : vector<16x64xf32> to vector<1x16x64xf32>
    tpu.vector_store %arg8[%c1_234, %c0_235, %c0_236], %543 {strides = array<i32>} : memref<2x16x64xf32, #tpu.memory_space<vmem>>, vector<1x16x64xf32>,
    return
  }
}

</mosaic_0001>

<bundles_post_ra>
// kernel: reverse
= control target key start
LH: loop header
LB: loop body
LE: loop exit
PB: predicated region body
PF: predicated region fallthrough
CT: control target
= control target key end

     0   :  { %s95_s0 = inlined_call_operand.vmem [shape: f32[8,16], index: 0, kind: input, shape index: {}]   ;;  %s96_s1 = inlined_call_operand.vmem [shape: f32[8,16], index: 1, kind: output, shape index: {}]  }
   0x1   :  { %v30_v0 = vld [vmem:[%s95_s0] sm:$0xff] }
   0x2   :  { %31 = vst [vmem:[#allocation0] sm:$0xff] %v30_v0 }
   0x9   :  { %v36_v1 = vld [vmem:[#allocation0 + $0x7] ss:$-1 sm:$0xff] }
   0xa   :  { %67 = vst [vmem:[%s96_s1] sm:$0xff] %v36_v1 }

// kernel: encoder_forward.1
= control target key start
LH: loop header
LB: loop body
LE: loop exit
PB: predicated region body
PF: predicated region fallthrough
CT: control target
= control target key end

     0   :  { %vm141_vm0 = vcmask 261120   ;;  %vm834_vm6 = vcmask 519168   ;;  %vm838_vm7 = vcmask 1043968   ;;  %s4434_s3 = inlined_call_operand.vmem [shape: bf16[32,512], index: 3, kind: input, shape index: {}]   ;;  %s4435_s2 = inlined_call_operand.vmem [shape: bf16[128,32], index: 2, kind: input, shape index: {}]   ;;  %s4436_s4 = inlined_call_operand.vmem [shape: bf16[128,512], index: 4, kind: input, shape index: {}]   ;;  %s4437_s1 = inlined_call_operand.vmem [shape: f32[8,16,1], index: 1, kind: input, shape index: {}]   ;;  %s4438_s0 = inlined_call_operand.vmem [shape: f32[8,16,1], index: 0, kind: input, shape index: {}]   ;;  %s4439_s5 = inlined_call_operand.vmem [shape: f32[1,512], index: 5, kind: input, shape index: {}]   ;;  %s4440_s6 = inlined_call_operand.vmem [shape: bf16[8,16,128], index: 6, kind: output, shape index: {0}]   ;;  %s4441_s8 = inlined_call_operand.vmem [shape: f32[2,16,64], index: 8, kind: output, shape index: {2}]   ;;  %s4442_s7 = inlined_call_operand.vmem [shape: f32[2,16,64], index: 7, kind: output, shape index: {1}]  }
   0x1   :  { %v2105_v0 = vld [vmem:[%s4434_s3 + $0x20] sm:$0xf]  ;;  %v2365_v1 = vld [vmem:[%s4434_s3 + $0x2c] sm:$0xf0]  ;;  %v2363_v2 = vld [vmem:[%s4434_s3 + $0x24] sm:$0xf] }
   0x2   :  { %v2106_v3 = vor.u32 %v2365_v1, %v2105_v0  ;;  %v2107_v4 = vld [vmem:[%s4434_s3 + $0x30] sm:$0xf0]  ;;  %v2113_v5 = vld [vmem:[%s4434_s3 + $0x28] sm:$0xf]  ;;  %v2366_v6 = vld [vmem:[%s4434_s3 + $0x34] sm:$0xf0] }
   0x3   :  { %v2110_v7 = vor.u32 %v2363_v2, %v2107_v4  ;;  %v2114_v8 = vor.u32 %v2366_v6, %v2113_v5  ;;  %v2364_v9 = vld [vmem:[%s4434_s3 + $0x2c] sm:$0xf]  ;;  %v2115_v10 = vld [vmem:[%s4434_s3 + $0x38] sm:$0xf0]  ;;  %v2089_v11 = vld [vmem:[%s4434_s3] sm:$0xf] }
   0x4   :  { %172 = vmatpush.bf16.msra.mxu0 %v2106_v3  ;;  %v2118_v12 = vor.u32 %v2364_v9, %v2115_v10  ;;  %v2361_v13 = vld [vmem:[%s4434_s3 + $0xc] sm:$0xf0]  ;;  %v2359_v14 = vld [vmem:[%s4434_s3 + $0x4] sm:$0xf]  ;;  %v2091_v15 = vld [vmem:[%s4434_s3 + $0x10] sm:$0xf0] }
   0x5   :  { %221 = vmatpush.bf16.msra.mxu1 %v2110_v7  ;;  %270 = vmatpush.bf16.msra.mxu2 %v2114_v8  ;;  %v2090_v16 = vor.u32 %v2361_v13, %v2089_v11  ;;  %v2094_v17 = vor.u32 %v2359_v14, %v2091_v15  ;;  %v2097_v18 = vld [vmem:[%s4434_s3 + $0x8] sm:$0xf]  ;;  %v2362_v19 = vld [vmem:[%s4434_s3 + $0x14] sm:$0xf0]  ;;  %v2360_v20 = vld [vmem:[%s4434_s3 + $0xc] sm:$0xf] }
   0x6   :  { %319 = vmatpush.bf16.msra.mxu3 %v2118_v12  ;;  %v2098_v21 = vor.u32 %v2362_v19, %v2097_v18  ;;  %v2099_v22 = vld [vmem:[%s4434_s3 + $0x18] sm:$0xf0]  ;;  %v2351_v23 = vld [vmem:[%s4435_s2] sm:$0xff]  ;;  %v2397_v26 = vld [vmem:[%s4436_s4 + $0xec] sm:$0xf0] }
   0x7   :  { %v2265_v24 = vld [vmem:[%s4436_s4 + $0xe0] sm:$0xf]  ;;  %v2102_v25 = vor.u32 %v2360_v20, %v2099_v22  ;;  %v2395_v27 = vld [vmem:[%s4436_s4 + $0xe4] sm:$0xf]  ;;  %v2267_v28 = vld [vmem:[%s4436_s4 + $0xf0] sm:$0xf0] }
   0x8   :  { %173 = vmatpush.bf16.msra.mxu0 %v2090_v16  ;;  %v2674_v29 = vor.u32 %v2397_v26, %v2265_v24  ;;  %v2676_v30 = vor.u32 %v2395_v27, %v2267_v28  ;;  %v2273_v31 = vld [vmem:[%s4436_s4 + $0xe8] sm:$0xf]  ;;  %v2398_v32 = vld [vmem:[%s4436_s4 + $0xf4] sm:$0xf0]  ;;  %v2396_v33 = vld [vmem:[%s4436_s4 + $0xec] sm:$0xf] }
   0x9   :  { %222 = vmatpush.bf16.msra.mxu1 %v2094_v17  ;;  %271 = vmatpush.bf16.msra.mxu2 %v2098_v21  ;;  %v2687_v34 = vor.u32 %v2398_v32, %v2273_v31  ;;  %v2275_v35 = vld [vmem:[%s4436_s4 + $0xf8] sm:$0xf0]  ;;  %v2249_v36 = vld [vmem:[%s4436_s4 + $0xc0] sm:$0xf]  ;;  %v2393_v38 = vld [vmem:[%s4436_s4 + $0xcc] sm:$0xf0] }
   0xa   :  { %320 = vmatpush.bf16.msra.mxu3 %v2102_v25  ;;  %v2696_v37 = vor.u32 %v2396_v33, %v2275_v35  ;;  %v2391_v39 = vld [vmem:[%s4436_s4 + $0xc4] sm:$0xf]  ;;  %v2251_v40 = vld [vmem:[%s4436_s4 + $0xd0] sm:$0xf0]  ;;  %v2709_v41 = vor.u32 %v2393_v38, %v2249_v36  ;;  %v2257_v43 = vld [vmem:[%s4436_s4 + $0xc8] sm:$0xf] }
   0xb   :  { %2119 = vmatmul.msk.bf16.vlgmr.msra.gmra.mxu0 %vm141_vm0, %v2351_v23  ;;  %v2711_v42 = vor.u32 %v2391_v39, %v2251_v40  ;;  %v2394_v44 = vld [vmem:[%s4436_s4 + $0xd4] sm:$0xf0]  ;;  %v2392_v45 = vld [vmem:[%s4436_s4 + $0xcc] sm:$0xf]  ;;  %v2259_v46 = vld [vmem:[%s4436_s4 + $0xd8] sm:$0xf0] }
   0xc   :  { %700 = vmatpush.bf16.msrb.mxu0 %v2674_v29  ;;  %2127 = vmatmul.msk.bf16.vlgmr.msra.gmra.mxu1 %vm141_vm0, %v2351_v23  ;;  %v2729_v47 = vor.u32 %v2394_v44, %v2257_v43  ;;  %v2233_v48 = vld [vmem:[%s4436_s4 + $0xa0] sm:$0xf]  ;;  %v2389_v49 = vld [vmem:[%s4436_s4 + $0xac] sm:$0xf0]  ;;  %v2387_v50 = vld [vmem:[%s4436_s4 + $0xa4] sm:$0xf]  ;;  %v2742_v51 = vor.u32 %v2392_v45, %v2259_v46 }
   0xd   :  { %714 = vmatpush.bf16.msrb.mxu1 %v2676_v30  ;;  %2135 = vmatmul.msk.bf16.vlgmr.msra.gmra.mxu2 %vm141_vm0, %v2351_v23  ;;  %v2744_v52 = vor.u32 %v2389_v49, %v2233_v48  ;;  %v2235_v53 = vld [vmem:[%s4436_s4 + $0xb0] sm:$0xf0]  ;;  %v2241_v54 = vld [vmem:[%s4436_s4 + $0xa8] sm:$0xf]  ;;  %v2390_v55 = vld [vmem:[%s4436_s4 + $0xb4] sm:$0xf0] }
   0xe   :  { %2143 = vmatmul.msk.bf16.vlgmr.msra.gmra.mxu3 %vm141_vm0, %v2351_v23  ;;  %728 = vmatpush.bf16.msrb.mxu2 %v2687_v34  ;;  %v2756_v56 = vor.u32 %v2387_v50, %v2235_v53  ;;  %v2388_v57 = vld [vmem:[%s4436_s4 + $0xac] sm:$0xf]  ;;  %v2243_v58 = vld [vmem:[%s4436_s4 + $0xb8] sm:$0xf0]  ;;  %v2765_v59 = vor.u32 %v2390_v55, %v2241_v54  ;;  %v2217_v62 = vld [vmem:[%s4436_s4 + $0x80] sm:$0xf] }
   0xf   :  { %742 = vmatpush.bf16.msrb.mxu3 %v2696_v37  ;;  %v2769_v60 = vor.u32 %v2388_v57, %v2243_v58  ;;  %v2352_v61 = vld [vmem:[%s4435_s2 + $0x8] sm:$0xff]  ;;  %v2385_v63 = vld [vmem:[%s4436_s4 + $0x8c] sm:$0xf0]  ;;  %v2383_v0 = vld [vmem:[%s4436_s4 + $0x84] sm:$0xf]  ;;  %v2564_v39 = vmov 0  }
  0x10   :  { %701 = vmatpush.bf16.msrb.mxu0 %v2709_v41  ;;  %v2790_v1 = vor.u32 %v2385_v63, %v2217_v62  ;;  %v2219_v2 = vld [vmem:[%s4436_s4 + $0x90] sm:$0xf0]  ;;  %v2225_v3 = vld [vmem:[%s4436_s4 + $0x88] sm:$0xf]  ;;  %v2386_v4 = vld [vmem:[%s4436_s4 + $0x94] sm:$0xf0]  ;;  %2402 = vset.pattern.permute.xlu1 %v2564_v39 }
  0x11   :  { %715 = vmatpush.bf16.msrb.mxu1 %v2711_v42  ;;  %v2801_v5 = vor.u32 %v2383_v0, %v2219_v2  ;;  %v2803_v6 = vor.u32 %v2386_v4, %v2225_v3  ;;  %v2384_v7 = vld [vmem:[%s4436_s4 + $0x8c] sm:$0xf]  ;;  %v2227_v8 = vld [vmem:[%s4436_s4 + $0x98] sm:$0xf0]  ;;  %v2353_v10 = vld [vmem:[%s4435_s2 + $0x10] sm:$0xff]  ;;  %2401 = vset.pattern.permute.xlu0 %v2564_v39 }
  0x12   :  { %729 = vmatpush.bf16.msrb.mxu2 %v2729_v47  ;;  %v2812_v9 = vor.u32 %v2384_v7, %v2227_v8  ;;  %v2201_v11 = vld [vmem:[%s4436_s4 + $0x60] sm:$0xf]  ;;  %v2381_v12 = vld [vmem:[%s4436_s4 + $0x6c] sm:$0xf0]  ;;  %v2379_v13 = vld [vmem:[%s4436_s4 + $0x64] sm:$0xf]  ;;  %2403 = vset.pattern.permute.xlu2 %v2564_v39 }
  0x13   :  { %743 = vmatpush.bf16.msrb.mxu3 %v2742_v51  ;;  %v2833_v14 = vor.u32 %v2381_v12, %v2201_v11  ;;  %v2203_v15 = vld [vmem:[%s4436_s4 + $0x70] sm:$0xf0]  ;;  %v2209_v16 = vld [vmem:[%s4436_s4 + $0x68] sm:$0xf]  ;;  %v2382_v17 = vld [vmem:[%s4436_s4 + $0x74] sm:$0xf0] }
  0x14   :  { %702 = vmatpush.bf16.msrb.mxu0 %v2744_v52  ;;  %4557 = vst [vmem:[#allocation3_spill] sm:$0xff] %v2812_v9  ;;  %v2844_v18 = vor.u32 %v2379_v13, %v2203_v15  ;;  %v2846_v19 = vor.u32 %v2382_v17, %v2209_v16  ;;  %v2380_v20 = vld [vmem:[%s4436_s4 + $0x6c] sm:$0xf]  ;;  %v2211_v21 = vld [vmem:[%s4436_s4 + $0x78] sm:$0xf0]  ;;  %v802_v43 = vld [vmem:[%s4437_s1] sm:$0xff] }
  0x15   :  { %716 = vmatpush.bf16.msrb.mxu1 %v2756_v56  ;;  %4558 = vst [vmem:[#allocation4_spill] sm:$0xff] %v2833_v14  ;;  %v2855_v22 = vor.u32 %v2380_v20, %v2211_v21  ;;  %v2354_v23 = vld [vmem:[%s4435_s2 + $0x18] sm:$0xff]  ;;  %v2185_v24 = vld [vmem:[%s4436_s4 + $0x40] sm:$0xf]  ;;  %v2377_v25 = vld [vmem:[%s4436_s4 + $0x4c] sm:$0xf0]  ;;  %816 = vperm.xlu1 %2402, %v802_v43  }
  0x16   :  { %730 = vmatpush.bf16.msrb.mxu2 %v2765_v59  ;;  %4559 = vst [vmem:[#allocation5_spill] sm:$0xff] %v2844_v18  ;;  %v2375_v26 = vld [vmem:[%s4436_s4 + $0x44] sm:$0xf]  ;;  %v2876_v27 = vor.u32 %v2377_v25, %v2185_v24  ;;  %v2187_v28 = vld [vmem:[%s4436_s4 + $0x50] sm:$0xf0]  ;;  %v803_v46 = vld [vmem:[%s4437_s1 + $0x8] sm:$0xff] }
  0x17   :  { %744 = vmatpush.bf16.msrb.mxu3 %v2769_v60  ;;  %4560 = vst [vmem:[#allocation6_spill] sm:$0xff] %v2846_v19  ;;  %v2193_v31 = vld [vmem:[%s4436_s4 + $0x48] sm:$0xf]  ;;  %v2378_v32 = vld [vmem:[%s4436_s4 + $0x54] sm:$0xf0]  ;;  %v2887_v33 = vor.u32 %v2375_v26, %v2187_v28  ;;  %v800_v44 = vld [vmem:[%s4438_s0] sm:$0xff] }
  0x18   :  { %703 = vmatpush.bf16.msrb.mxu0 %v2790_v1  ;;  %4561 = vst [vmem:[#allocation7_spill] sm:$0xff] %v2855_v22  ;;  %v2889_v35 = vor.u32 %v2378_v32, %v2193_v31  ;;  %v2376_v36 = vld [vmem:[%s4436_s4 + $0x4c] sm:$0xf]  ;;  %v2195_v38 = vld [vmem:[%s4436_s4 + $0x58] sm:$0xf0]  ;;  %806 = vperm.xlu0 %2401, %v800_v44   ;;  %v2355_v45 = vld [vmem:[%s4435_s2 + $0x20] sm:$0xff] }
  0x19   :  { %717 = vmatpush.bf16.msrb.mxu1 %v2801_v5  ;;  %4562 = vst [vmem:[#allocation8_spill] sm:$0xff] %v2876_v27  ;;  %v2899_v40 = vor.u32 %v2376_v36, %v2195_v38  ;;  %v801_v48 = vld [vmem:[%s4438_s0 + $0x8] sm:$0xff]  ;;  %v2169_v49 = vld [vmem:[%s4436_s4 + $0x20] sm:$0xf]  ;;  %v2373_v50 = vld [vmem:[%s4436_s4 + $0x2c] sm:$0xf0] }
  0x1a   :  { %731 = vmatpush.bf16.msrb.mxu2 %v2803_v6  ;;  %4563 = vst [vmem:[#allocation9_spill] sm:$0xff] %v2887_v33  ;;  %v2371_v53 = vld [vmem:[%s4436_s4 + $0x24] sm:$0xf]  ;;  %v2934_v54 = vor.u32 %v2373_v50, %v2169_v49  ;;  %v2171_v55 = vld [vmem:[%s4436_s4 + $0x30] sm:$0xf0]  ;;  %v2296_v3 = vld [vmem:[%s4437_s1 + $0x18] sm:$0xff] }
  0x1b   :  { %2120 = vmatmul.msk.bf16.gmra.mxu0 %vm141_vm0, %v2352_v61  ;;  %745 = vmatpush.bf16.msrb.mxu3 %v2812_v9  ;;  %4564 = vst [vmem:[#allocation10_spill] sm:$0xff] %v2889_v35  ;;  %v2177_v57 = vld [vmem:[%s4436_s4 + $0x28] sm:$0xf]  ;;  %v2374_v58 = vld [vmem:[%s4436_s4 + $0x34] sm:$0xf0]  ;;  %v2295_v4 = vld [vmem:[%s4437_s1 + $0x10] sm:$0xff] }
  0x1c   :  { %2128 = vmatmul.msk.bf16.gmra.mxu1 %vm141_vm0, %v2352_v61  ;;  %704 = vmatpush.bf16.msrb.mxu0 %v2833_v14  ;;  %4565 = vst [vmem:[#allocation11_spill] sm:$0xff] %v2899_v40  ;;  %v2947_v62 = vor.u32 %v2374_v58, %v2177_v57  ;;  %v2372_v63 = vld [vmem:[%s4436_s4 + $0x2c] sm:$0xf]  ;;  %v2179_v0 = vld [vmem:[%s4436_s4 + $0x38] sm:$0xf0]  ;;  %v2303_v8 = vld [vmem:[%s4437_s1 + $0x20] sm:$0xff] }
  0x1d   :  { %2136 = vmatmul.msk.bf16.gmra.mxu2 %vm141_vm0, %v2352_v61  ;;  %718 = vmatpush.bf16.msrb.mxu1 %v2844_v18  ;;  %4566 = vst [vmem:[#allocation12_spill] sm:$0xff] %v2934_v54  ;;  %v2956_v2 = vor.u32 %v2372_v63, %v2179_v0  ;;  %v2356_v7 = vld [vmem:[%s4435_s2 + $0x28] sm:$0xff]  ;;  %v2153_v11 = vld [vmem:[%s4436_s4] sm:$0xf]  ;;  %v2369_v12 = vld [vmem:[%s4436_s4 + $0xc] sm:$0xf0] }
  0x1e   :  { %2144 = vmatmul.msk.bf16.gmra.mxu3 %vm141_vm0, %v2352_v61  ;;  %732 = vmatpush.bf16.msrb.mxu2 %v2846_v19  ;;  %v2945_v61 = vor.u32 %v2371_v53, %v2171_v55  ;;  %4568 = vst [vmem:[#allocation14_spill] sm:$0xff] %v2947_v62  ;;  %v2367_v13 = vld [vmem:[%s4436_s4 + $0x4] sm:$0xf]  ;;  %v2989_v15 = vor.u32 %v2369_v12, %v2153_v11  ;;  %v2155_v16 = vld [vmem:[%s4436_s4 + $0x10] sm:$0xf0]  ;;  %v2310_v28 = vld [vmem:[%s4438_s0 + $0x38] sm:$0xff] }
  0x1f   :  { %746 = vmatpush.bf16.msrb.mxu3 %v2855_v22  ;;  %821 = vperm.xlu1 %2402, %v803_v46   ;;  %4569 = vst [vmem:[#allocation15_spill] sm:$0xff] %v2956_v2  ;;  %v2161_v17 = vld [vmem:[%s4436_s4 + $0x8] sm:$0xf]  ;;  %v2370_v20 = vld [vmem:[%s4436_s4 + $0x14] sm:$0xf0]  ;;  %v3000_v21 = vor.u32 %v2367_v13, %v2155_v16  ;;  %v2293_v31 = vld [vmem:[%s4438_s0 + $0x10] sm:$0xff] }
  0x20   :  { %705 = vmatpush.bf16.msrb.mxu0 %v2876_v27  ;;  %811 = vperm.xlu0 %2401, %v801_v48   ;;  %4567 = vst [vmem:[#allocation13_spill] sm:$0xff] %v2945_v61  ;;  %v2368_v24 = vld [vmem:[%s4436_s4 + $0xc] sm:$0xf]  ;;  %v2163_v25 = vld [vmem:[%s4436_s4 + $0x18] sm:$0xf0]  ;;  %v2309_v32 = vld [vmem:[%s4438_s0 + $0x30] sm:$0xff] }
  0x21   :  { %719 = vmatpush.bf16.msrb.mxu1 %v2887_v33  ;;  %4570 = vst [vmem:[#allocation16_spill] sm:$0xff] %v2989_v15  ;;  %v3011_v26 = vor.u32 %v2368_v24, %v2163_v25  ;;  %974 = vperm.xlu2 %2403, %v2293_v31   ;;  %v2357_v36 = vld [vmem:[%s4435_s2 + $0x30] sm:$0xff]  ;;  %v2317_v38 = vld [vmem:[%s4438_s0 + $0x40] sm:$0xff]  ;;  %v2294_v43 = vld [vmem:[%s4438_s0 + $0x18] sm:$0xff] }
  0x22   :  { %733 = vmatpush.bf16.msrb.mxu2 %v2889_v35  ;;  %4571 = vst [vmem:[#allocation17_spill] sm:$0xff] %v3000_v21  ;;  %v2312_v44 = vld [vmem:[%s4437_s1 + $0x38] sm:$0xff]  ;;  %v2301_v46 = vld [vmem:[%s4438_s0 + $0x20] sm:$0xff]  ;;  %v2327_v50 = vld [vmem:[%s4437_s1 + $0x50] sm:$0xff] }
  0x23   :  { %747 = vmatpush.bf16.msrb.mxu3 %v2899_v40  ;;  %4573 = vst [vmem:[#allocation19_spill] sm:$0xff] %v3011_v26  ;;  %v2319_v48 = vld [vmem:[%s4437_s1 + $0x40] sm:$0xff]  ;;  %v2358_v49 = vld [vmem:[%s4435_s2 + $0x38] sm:$0xff]  ;;  %v2304_v53 = vld [vmem:[%s4437_s1 + $0x28] sm:$0xff] }
  0x24   :  { %706 = vmatpush.bf16.msrb.mxu0 %v2934_v54  ;;  %v2326_v55 = vld [vmem:[%s4438_s0 + $0x58] sm:$0xff]  ;;  %v2334_v57 = vld [vmem:[%s4438_s0 + $0x68] sm:$0xff]  ;;  %v2311_v58 = vld [vmem:[%s4437_s1 + $0x30] sm:$0xff] }
  0x25   :  { %720 = vmatpush.bf16.msrb.mxu1 %v2945_v61  ;;  %v2333_v63 = vld [vmem:[%s4438_s0 + $0x60] sm:$0xff]  ;;  %v2325_v16 = vld [vmem:[%s4438_s0 + $0x50] sm:$0xff]  ;;  %v2328_v31 = vld [vmem:[%s4437_s1 + $0x58] sm:$0xff] }
  0x26   :  { %734 = vmatpush.bf16.msrb.mxu2 %v2947_v62 }
  0x27   :  { %748 = vmatpush.bf16.msrb.mxu3 %v2956_v2  ;;  %989 = vperm.xlu1 %2402, %v2296_v3  }
  0x28   :  { %984 = vperm.xlu0 %2401, %v2295_v4   ;;  %707 = vmatpush.bf16.msrb.mxu0 %v2989_v15  ;;  %v2341_v4 = vld [vmem:[%s4438_s0 + $0x70] sm:$0xff] }
  0x29   :  { %721 = vmatpush.bf16.msrb.mxu1 %v3000_v21  ;;  %979 = vperm.xlu2 %2403, %v2294_v43  }
  0x2b   :  { %2121 = vmatmul.msk.bf16.gmra.mxu0 %vm141_vm0, %v2353_v10  ;;  %749 = vmatpush.bf16.msrb.mxu3 %v3011_v26 }
  0x2c   :  { %2129 = vmatmul.msk.bf16.gmra.mxu1 %vm141_vm0, %v2353_v10  ;;  %866 = vmatpush.bf16.msra.mxu0 %v2674_v29 }
  0x2d   :  { %2137 = vmatmul.msk.bf16.gmra.mxu2 %vm141_vm0, %v2353_v10  ;;  %880 = vmatpush.bf16.msra.mxu1 %v2676_v30 }
  0x2e   :  { %2145 = vmatmul.msk.bf16.gmra.mxu3 %vm141_vm0, %v2353_v10  ;;  %v2302_v10 = vld [vmem:[%s4438_s0 + $0x28] sm:$0xff] }
  0x2f   :  { %1153 = vperm.xlu1 %2402, %v2303_v8   ;;  %908 = vmatpush.bf16.msra.mxu3 %v2696_v37  ;;  %v2336_v8 = vld [vmem:[%s4437_s1 + $0x68] sm:$0xff] }
  0x30   :  { %1148 = vperm.xlu0 %2401, %v2302_v10   ;;  %867 = vmatpush.bf16.msra.mxu0 %v2709_v41 }
  0x31   :  { %881 = vmatpush.bf16.msra.mxu1 %v2711_v42  ;;  %1143 = vperm.xlu2 %2403, %v2301_v46  }
  0x33   :  { %909 = vmatpush.bf16.msra.mxu3 %v2742_v51 }
  0x34   :  { %868 = vmatpush.bf16.msra.mxu0 %v2744_v52 }
  0x35   :  { %882 = vmatpush.bf16.msra.mxu1 %v2756_v56 }
  0x37   :  { %1317 = vperm.xlu1 %2402, %v2310_v28   ;;  %910 = vmatpush.bf16.msra.mxu3 %v2769_v60 }
  0x38   :  { %1312 = vperm.xlu0 %2401, %v2309_v32   ;;  %869 = vmatpush.bf16.msra.mxu0 %v2790_v1 }
  0x39   :  { %883 = vmatpush.bf16.msra.mxu1 %v2801_v5  ;;  %1158 = vperm.xlu2 %2403, %v2304_v53  }
  0x3b   :  { %2122 = vmatmul.msk.bf16.gmra.mxu0 %vm141_vm0, %v2354_v23  ;;  %911 = vmatpush.bf16.msra.mxu3 %v2812_v9 }
  0x3c   :  { %2130 = vmatmul.msk.bf16.gmra.mxu1 %vm141_vm0, %v2354_v23  ;;  %870 = vmatpush.bf16.msra.mxu0 %v2833_v14 }
  0x3d   :  { %2138 = vmatmul.msk.bf16.gmra.mxu2 %vm141_vm0, %v2354_v23  ;;  %884 = vmatpush.bf16.msra.mxu1 %v2844_v18 }
  0x3e   :  { %2146 = vmatmul.msk.bf16.gmra.mxu3 %vm141_vm0, %v2354_v23  ;;  %v3002_v23 = vor.u32 %v2370_v20, %v2161_v17  ;;  %v2343_v17 = vld [vmem:[%s4437_s1 + $0x70] sm:$0xff] }
  0x3f   :  { %1481 = vperm.xlu1 %2402, %v2317_v38   ;;  %912 = vmatpush.bf16.msra.mxu3 %v2855_v22 }
  0x40   :  { %4572 = vst [vmem:[#allocation18_spill] sm:$0xff] %v3002_v23  ;;  %735 = vmatpush.bf16.msrb.mxu2 %v3002_v23  ;;  %1327 = vperm.xlu0 %2401, %v2312_v44   ;;  %v2335_v44 = vld [vmem:[%s4437_s1 + $0x60] sm:$0xff] }
  0x41   :  { %871 = vmatpush.bf16.msra.mxu0 %v2876_v27  ;;  %885 = vmatpush.bf16.msra.mxu1 %v2887_v33 }
  0x42   :  { %1322 = vperm.xlu2 %2403, %v2311_v58  }
  0x43   :  { %913 = vmatpush.bf16.msra.mxu3 %v2899_v40 }
  0x44   :  { %894 = vmatpush.bf16.msra.mxu2 %v2687_v34 }
  0x45   :  { %872 = vmatpush.bf16.msra.mxu0 %v2934_v54  ;;  %886 = vmatpush.bf16.msra.mxu1 %v2945_v61 }
  0x47   :  { %914 = vmatpush.bf16.msra.mxu3 %v2956_v2 }
  0x48   :  { %895 = vmatpush.bf16.msra.mxu2 %v2729_v47  ;;  %1491 = vperm.xlu0 %2401, %v2319_v48  }
  0x49   :  { %873 = vmatpush.bf16.msra.mxu0 %v2989_v15  ;;  %887 = vmatpush.bf16.msra.mxu1 %v3000_v21 }
  0x4b   :  { %2123 = vmatmul.msk.bf16.gmra.mxu0 %vm141_vm0, %v2355_v45  ;;  %915 = vmatpush.bf16.msra.mxu3 %v3011_v26 }
  0x4c   :  { %2131 = vmatmul.msk.bf16.gmra.mxu1 %vm141_vm0, %v2355_v45  ;;  %896 = vmatpush.bf16.msra.mxu2 %v2765_v59 }
  0x4d   :  { %2139 = vmatmul.msk.bf16.gmra.mxu2 %vm141_vm0, %v2355_v45 }
  0x4e   :  { %2147 = vmatmul.msk.bf16.gmra.mxu3 %vm141_vm0, %v2355_v45  ;;  %v2320_v45 = vld [vmem:[%s4437_s1 + $0x48] sm:$0xff] }
  0x4f   :  { %1496 = vperm.xlu1 %2402, %v2320_v45  }
  0x50   :  { %897 = vmatpush.bf16.msra.mxu2 %v2803_v6  ;;  %1653 = vperm.xlu0 %2401, %v2326_v55  }
  0x54   :  { %898 = vmatpush.bf16.msra.mxu2 %v2846_v19 }
  0x57   :  { %1658 = vperm.xlu1 %2402, %v2327_v50   ;;  %v2342_v50 = vld [vmem:[%s4438_s0 + $0x78] sm:$0xff] }
  0x58   :  { %899 = vmatpush.bf16.msra.mxu2 %v2889_v35  ;;  %1815 = vperm.xlu0 %2401, %v2333_v63  }
  0x5b   :  { %2124 = vmatmul.msk.bf16.gmra.mxu0 %vm141_vm0, %v2356_v7 }
  0x5c   :  { %2132 = vmatmul.msk.bf16.gmra.mxu1 %vm141_vm0, %v2356_v7  ;;  %900 = vmatpush.bf16.msra.mxu2 %v2947_v62 }
  0x5d   :  { %2140 = vmatmul.msk.bf16.gmra.mxu2 %vm141_vm0, %v2356_v7 }
  0x5e   :  { %2148 = vmatmul.msk.bf16.gmra.mxu3 %vm141_vm0, %v2356_v7  ;;  %v2318_v7 = vld [vmem:[%s4438_s0 + $0x48] sm:$0xff] }
  0x5f   :  { %1820 = vperm.xlu1 %2402, %v2334_v57   ;;  %1486 = vperm.xlu2 %2403, %v2318_v7  }
  0x60   :  { %901 = vmatpush.bf16.msra.mxu2 %v3002_v23  ;;  %1830 = vperm.xlu0 %2401, %v2336_v8  }
  0x67   :  { %1982 = vperm.xlu1 %2402, %v2341_v4   ;;  %1648 = vperm.xlu2 %2403, %v2325_v16  }
  0x68   :  { %1992 = vperm.xlu0 %2401, %v2343_v17  }
  0x6b   :  { %2125 = vmatmul.msk.bf16.gmra.mxu0 %vm141_vm0, %v2357_v36 }
  0x6c   :  { %2133 = vmatmul.msk.bf16.gmra.mxu1 %vm141_vm0, %v2357_v36 }
  0x6d   :  { %2141 = vmatmul.msk.bf16.gmra.mxu2 %vm141_vm0, %v2357_v36 }
  0x6e   :  { %2149 = vmatmul.msk.bf16.gmra.mxu3 %vm141_vm0, %v2357_v36 }
  0x6f   :  { %1663 = vperm.xlu2 %2403, %v2328_v31  }
  0x77   :  { %1825 = vperm.xlu2 %2403, %v2335_v44  }
  0x7b   :  { %2126 = vmatmul.msk.bf16.gmra.mxu0 %vm141_vm0, %v2358_v49 }
  0x7c   :  { %2134 = vmatmul.msk.bf16.gmra.mxu1 %vm141_vm0, %v2358_v49 }
  0x7d   :  { %2142 = vmatmul.msk.bf16.gmra.mxu2 %vm141_vm0, %v2358_v49 }
  0x7e   :  { %2150 = vmatmul.msk.bf16.gmra.mxu3 %vm141_vm0, %v2358_v49 }
  0x7f   :  { %1987 = vperm.xlu2 %2403, %v2342_v50  }
  0x88   :  { %v3106_v0 = vpop.f32.mrf.mxu0 }
  0x89   :  { %v3109_v3 = vpop.f32.mrf.mxu1 }
  0x8b   :  { %708 = vmatmul.bf16.vlgmr.msrb.gmra.mxu0 %v2564_v39 }
  0x8c   :  { %722 = vmatmul.bf16.vlgmr.msrb.gmra.mxu1 %v2564_v39  ;;  %1035 = vmatpush.bf16.msrb.mxu0 %v2674_v29 }
  0x8d   :  { %736 = vmatmul.bf16.vlgmr.msrb.gmra.mxu2 %v2564_v39  ;;  %1049 = vmatpush.bf16.msrb.mxu1 %v2676_v30 }
  0x8e   :  { %750 = vmatmul.bf16.vlgmr.msrb.gmra.mxu3 %v2564_v39  ;;  %1063 = vmatpush.bf16.msrb.mxu2 %v2687_v34  ;;  %v2344_v39 = vld [vmem:[%s4437_s1 + $0x78] sm:$0xff] }
  0x8f   :  { %1077 = vmatpush.bf16.msrb.mxu3 %v2696_v37  ;;  %1997 = vperm.xlu1 %2402, %v2344_v39   ;;  %v426_v39 = vlaneseq }
  0x90   :  { %v3125_v10 = vpop.f32.mrf.mxu2  ;;  %v3131_v12 = vpop.f32.mrf.mxu0  ;;  %1036 = vmatpush.bf16.msrb.mxu0 %v2709_v41 }
  0x91   :  { %v3129_v11 = vpop.f32.mrf.mxu3  ;;  %v3134_v13 = vpop.f32.mrf.mxu1  ;;  %1050 = vmatpush.bf16.msrb.mxu1 %v2711_v42  ;;  %v3218_v16 = vand.u32 127, %v426_v39 }
  0x92   :  { %1064 = vmatpush.bf16.msrb.mxu2 %v2729_v47 }
  0x93   :  { %1078 = vmatpush.bf16.msrb.mxu3 %v2742_v51  ;;  %vm479_vm1 = vcmp.lt.s32.totalorder %v3218_v16, 64 }
  0x94   :  { %1037 = vmatpush.bf16.msrb.mxu0 %v2744_v52 }
  0x95   :  { %1051 = vmatpush.bf16.msrb.mxu1 %v2756_v56 }
  0x96   :  { %1065 = vmatpush.bf16.msrb.mxu2 %v2765_v59 }
  0x97   :  { %1079 = vmatpush.bf16.msrb.mxu3 %v2769_v60 }
  0x98   :  { %v3150_v20 = vpop.f32.mrf.mxu2  ;;  %v3155_v25 = vpop.f32.mrf.mxu0  ;;  %1038 = vmatpush.bf16.msrb.mxu0 %v2790_v1 }
  0x99   :  { %v3153_v24 = vpop.f32.mrf.mxu3  ;;  %v3159_v28 = vpop.f32.mrf.mxu1  ;;  %1052 = vmatpush.bf16.msrb.mxu1 %v2801_v5 }
  0x9a   :  { %1066 = vmatpush.bf16.msrb.mxu2 %v2803_v6 }
  0x9b   :  { %1080 = vmatpush.bf16.msrb.mxu3 %v2812_v9  ;;  %v4581_v9 = vmov 0 }
  0x9c   :  { %1039 = vmatpush.bf16.msrb.mxu0 %v2833_v14 }
  0x9d   :  { %1053 = vmatpush.bf16.msrb.mxu1 %v2844_v18 }
  0x9e   :  { %1067 = vmatpush.bf16.msrb.mxu2 %v2846_v19 }
  0x9f   :  { %1081 = vmatpush.bf16.msrb.mxu3 %v2855_v22 }
  0xa0   :  { %v3169_v32 = vpop.f32.mrf.mxu2  ;;  %v3174_v38 = vpop.f32.mrf.mxu0  ;;  %1040 = vmatpush.bf16.msrb.mxu0 %v2876_v27 }
  0xa1   :  { %v3172_v36 = vpop.f32.mrf.mxu3  ;;  %v3178_v43 = vpop.f32.mrf.mxu1  ;;  %1054 = vmatpush.bf16.msrb.mxu1 %v2887_v33 }
  0xa2   :  { %1068 = vmatpush.bf16.msrb.mxu2 %v2889_v35 }
  0xa3   :  { %1082 = vmatpush.bf16.msrb.mxu3 %v2899_v40  ;;  %v430_v40 = vadd.s32 384, %v3218_v16 }
  0xa4   :  { %1041 = vmatpush.bf16.msrb.mxu0 %v2934_v54 }
  0xa5   :  { %1055 = vmatpush.bf16.msrb.mxu1 %v2945_v61 }
  0xa6   :  { %1069 = vmatpush.bf16.msrb.mxu2 %v2947_v62  ;;  %v429_v62 = vadd.s32 256, %v3218_v16 }
  0xa7   :  { %1083 = vmatpush.bf16.msrb.mxu3 %v2956_v2 }
  0xa8   :  { %v3188_v45 = vpop.f32.mrf.mxu2  ;;  %v3193_v48 = vpop.f32.mrf.mxu0  ;;  %1042 = vmatpush.bf16.msrb.mxu0 %v2989_v15  ;;  %v449_v18 = vand.u32 127, %v429_v62 }
  0xa9   :  { %v3191_v46 = vpop.f32.mrf.mxu3  ;;  %v3197_v49 = vpop.f32.mrf.mxu1  ;;  %1056 = vmatpush.bf16.msrb.mxu1 %v3000_v21 }
  0xaa   :  { %1070 = vmatpush.bf16.msrb.mxu2 %v3002_v23  ;;  %v51_v23 = vld [vmem:[%s4439_s5] sm:$0xf]  ;;  %vm3263_vm3 = vcmp.lt.s32.totalorder %v449_v18, 64  ;;  %s2565_s5 = smov 64  }
  0xab   :  { %1084 = vmatpush.bf16.msrb.mxu3 %v3011_v26  ;;  %v428_v26 = vadd.s32 128, %v3218_v16  ;;  %v3224_v15 = vperm.slane %v51_v23, 0  ;;  %v3227_v61 = vperm.slane %v51_v23, 1  ;;  %v3259_v62 = vperm.slane %v51_v23, 2 }
  0xac   :  { %v4582_v9 = vsel %vm3263_vm3, 4294967295, %v4581_v9 }
  0xad   :  { %v442_v21 = vand.u32 127, %v428_v26  ;;  %v4574_v26 = vmov 0  ;;  %4583 = vst [vmem:[#allocation25_spill] sm:$0xff] %v4582_v9 }
  0xaf   :  { %vm3233_vm2 = vcmp.lt.s32.totalorder %v442_v21, 64 }
  0xb0   :  { %v3206_v53 = vpop.f32.mrf.mxu2  ;;  %v3210_v57 = vpop.f32.mrf.mxu0  ;;  %v4575_v26 = vsel %vm3233_vm2, 4294967295, %v4574_v26 }
  0xb1   :  { %v3208_v55 = vpop.f32.mrf.mxu3  ;;  %v3212_v58 = vpop.f32.mrf.mxu1  ;;  %4576 = vst [vmem:[#allocation20_spill] sm:$0xff] %v4575_v26 }
  0xb8   :  { %v3214_v63 = vpop.f32.mrf.mxu2  ;;  %v190_v7 = vpop.f32.mrf.mxu0 }
  0xb9   :  { %v3216_v4 = vpop.f32.mrf.mxu3  ;;  %v239_v8 = vpop.f32.mrf.mxu1  ;;  %v191_v35 = vadd.f32 %v190_v7, %v3224_v15 }
  0xba   :  { %v3238_v22 = vadd.f32 %v239_v8, %v3227_v61  ;;  %v3261_v8 = vperm.slane %v51_v23, 3 }
  0xbc   :  { %4577 = vst [vmem:[#allocation21_spill] sm:$0xff] %v3238_v22 }
  0xc0   :  { %v288_v17 = vpop.f32.mrf.mxu2  ;;  %v192_v44 = vpop.f32.mrf.mxu0 }
  0xc1   :  { %v337_v31 = vpop.f32.mrf.mxu3  ;;  %v241_v50 = vpop.f32.mrf.mxu1  ;;  %v3281_v18 = vadd.f32 %v192_v44, %v3224_v15 }
  0xc2   :  { %v3278_v23 = vadd.f32 %v337_v31, %v3261_v8 }
  0xc3   :  { %4589 = vst [vmem:[#allocation29_spill] sm:$0xff] %v3281_v18 }
  0xc4   :  { %4588 = vst [vmem:[#allocation28_spill] sm:$0xff] %v3278_v23 }
  0xc8   :  { %v290_v2 = vpop.f32.mrf.mxu2  ;;  %v195_v54 = vpop.f32.mrf.mxu0 }
  0xc9   :  { %v339_v39 = vpop.f32.mrf.mxu3  ;;  %v196_v33 = vadd.f32 %v195_v54, %v3224_v15  ;;  %v244_v27 = vpop.f32.mrf.mxu1  ;;  %v456_v54 = vand.u32 127, %v430_v40  ;;  %v3326_v31 = vadd.f32 %v290_v2, %v3259_v62  ;;  %v3342_v2 = vadd.f32 %v3197_v49, %v3227_v61 }
  0xca   :  { %v3241_v19 = vadd.f32 %v244_v27, %v3227_v61 }
  0xcb   :  { %v3245_v14 = vsel %vm479_vm1, %v191_v35, %v196_v33  ;;  %v3249_v7 = vsel %vm479_vm1, %v196_v33, %v191_v35  ;;  %v3268_v33 = vadd.f32 %v288_v17, %v3259_v62  ;;  %vm3273_vm4 = vcmp.lt.s32.totalorder %v456_v54, 64  ;;  %4595 = vst [vmem:[#allocation35_spill] sm:$0xff] %v3326_v31 }
  0xcc   :  { %4578 = vst [vmem:[#allocation22_spill] sm:$0xff] %v3241_v19  ;;  %v3290_v19 = vadd.f32 %v241_v50, %v3227_v61 }
  0xcd   :  { %4579 = vst [vmem:[#allocation23_spill] sm:$0xff] %v3245_v14 }
  0xce   :  { %4580 = vst [vmem:[#allocation24_spill] sm:$0xff] %v3249_v7 }
  0xcf   :  { %4584 = vst [vmem:[#allocation26_spill] sm:$0xff] %v3268_v33  ;;  %v3495_v33 = vadd.f32 %v3169_v32, %v3259_v62 }
  0xd0   :  { %v293_v14 = vpop.f32.mrf.mxu2  ;;  %v197_v21 = vpop.f32.mrf.mxu0  ;;  %4592 = vst [vmem:[#allocation32_spill] sm:$0xff] %v3290_v19  ;;  %v181_v19 = vadd.f32 %v3155_v25, %v3224_v15 }
  0xd1   :  { %v3271_v35 = vadd.f32 %v293_v14, %v3259_v62  ;;  %v342_v40 = vpop.f32.mrf.mxu3  ;;  %v3287_v17 = vadd.f32 %v197_v21, %v3224_v15  ;;  %v246_v14 = vpop.f32.mrf.mxu1  ;;  %4599 = vst [vmem:[#allocation39_spill] sm:$0xff] %v3342_v2 }
  0xd2   :  { %v3284_v27 = vadd.f32 %v342_v40, %v3261_v8  ;;  %v3293_v54 = vadd.f32 %v246_v14, %v3227_v61  ;;  %4619 = vst [vmem:[#allocation59_spill] sm:$0xff] %v3495_v33 }
  0xd3   :  { %4585 = vst [vmem:[#allocation27_spill] sm:$0xff] %v3271_v35  ;;  %v3315_v40 = vsel %vm479_vm1, %v3287_v17, %v3281_v18 }
  0xd4   :  { %4590 = vst [vmem:[#allocation30_spill] sm:$0xff] %v3284_v27 }
  0xd5   :  { %4591 = vst [vmem:[#allocation31_spill] sm:$0xff] %v3287_v17  ;;  %v3334_v17 = vadd.f32 %v339_v39, %v3261_v8  ;;  %v3392_v39 = vadd.f32 %v3210_v57, %v3224_v15 }
  0xd6   :  { %4593 = vst [vmem:[#allocation33_spill] sm:$0xff] %v3293_v54 }
  0xd7   :  { %4594 = vst [vmem:[#allocation34_spill] sm:$0xff] %v3315_v40  ;;  %v186_v40 = vadd.f32 %v3193_v48, %v3224_v15 }
  0xd8   :  { %v295_v21 = vpop.f32.mrf.mxu2  ;;  %v200_v18 = vpop.f32.mrf.mxu0  ;;  %4597 = vst [vmem:[#allocation37_spill] sm:$0xff] %v3334_v17 }
  0xd9   :  { %v3329_v50 = vadd.f32 %v295_v21, %v3259_v62  ;;  %v344_v27 = vpop.f32.mrf.mxu3  ;;  %v201_v44 = vadd.f32 %v200_v18, %v3224_v15  ;;  %v249_v54 = vpop.f32.mrf.mxu1  ;;  %4606 = vst [vmem:[#allocation46_spill] sm:$0xff] %v3392_v39 }
  0xda   :  { %v3337_v14 = vadd.f32 %v344_v27, %v3261_v8  ;;  %v3345_v21 = vadd.f32 %v249_v54, %v3227_v61 }
  0xdb   :  { %4596 = vst [vmem:[#allocation36_spill] sm:$0xff] %v3329_v50  ;;  %v3357_v27 = vsel %vm479_vm1, %v186_v40, %v201_v44  ;;  %v3369_v54 = vsel %vm479_vm1, %v201_v44, %v186_v40  ;;  %v3381_v50 = vadd.f32 %v3206_v53, %v3259_v62 }
  0xdc   :  { %4598 = vst [vmem:[#allocation38_spill] sm:$0xff] %v3337_v14 }
  0xdd   :  { %4600 = vst [vmem:[#allocation40_spill] sm:$0xff] %v3345_v21 }
  0xde   :  { %4601 = vst [vmem:[#allocation41_spill] sm:$0xff] %v3357_v27 }
  0xdf   :  { %4602 = vst [vmem:[#allocation42_spill] sm:$0xff] %v3369_v54  ;;  %v3388_v54 = vadd.f32 %v3208_v55, %v3261_v8 }
  0xe0   :  { %v298_v49 = vpop.f32.mrf.mxu2  ;;  %4603 = vst [vmem:[#allocation43_spill] sm:$0xff] %v3381_v50  ;;  %v202_v40 = vpop.f32.mrf.mxu0 }
  0xe1   :  { %v3384_v18 = vadd.f32 %v298_v49, %v3259_v62  ;;  %v347_v44 = vpop.f32.mrf.mxu3  ;;  %4605 = vst [vmem:[#allocation45_spill] sm:$0xff] %v3388_v54  ;;  %v3398_v14 = vadd.f32 %v202_v40, %v3224_v15  ;;  %v251_v53 = vpop.f32.mrf.mxu1  ;;  %v3402_v49 = vadd.f32 %v3212_v58, %v3227_v61  ;;  %v3439_v58 = vadd.f32 %v3214_v63, %v3259_v62 }
  0xe2   :  { %v3395_v48 = vadd.f32 %v347_v44, %v3261_v8  ;;  %v3405_v17 = vadd.f32 %v251_v53, %v3227_v61  ;;  %v3456_v63 = vadd.f32 %v3159_v28, %v3227_v61 }
  0xe3   :  { %4604 = vst [vmem:[#allocation44_spill] sm:$0xff] %v3384_v18  ;;  %v3431_v53 = vsel %vm479_vm1, %v3398_v14, %v3392_v39 }
  0xe4   :  { %4607 = vst [vmem:[#allocation47_spill] sm:$0xff] %v3395_v48 }
  0xe5   :  { %4608 = vst [vmem:[#allocation48_spill] sm:$0xff] %v3398_v14 }
  0xe6   :  { %4609 = vst [vmem:[#allocation49_spill] sm:$0xff] %v3402_v49 }
  0xe7   :  { %4610 = vst [vmem:[#allocation50_spill] sm:$0xff] %v3405_v17 }
  0xe8   :  { %4611 = vst [vmem:[#allocation51_spill] sm:$0xff] %v3431_v53  ;;  %v300_v44 = vpop.f32.mrf.mxu2  ;;  %v205_v31 = vpop.f32.mrf.mxu0  ;;  %v3448_v53 = vadd.f32 %v3216_v4, %v3261_v8 }
  0xe9   :  { %4612 = vst [vmem:[#allocation52_spill] sm:$0xff] %v3439_v58  ;;  %v3442_v55 = vadd.f32 %v300_v44, %v3259_v62  ;;  %v349_v40 = vpop.f32.mrf.mxu3  ;;  %v206_v57 = vadd.f32 %v205_v31, %v3224_v15  ;;  %v254_v35 = vpop.f32.mrf.mxu1 }
  0xea   :  { %4614 = vst [vmem:[#allocation54_spill] sm:$0xff] %v3448_v53  ;;  %v3451_v23 = vadd.f32 %v349_v40, %v3261_v8  ;;  %v3459_v44 = vadd.f32 %v254_v35, %v3227_v61  ;;  %v3502_v40 = vadd.f32 %v3172_v36, %v3261_v8 }
  0xeb   :  { %4613 = vst [vmem:[#allocation53_spill] sm:$0xff] %v3442_v55  ;;  %v3471_v31 = vsel %vm479_vm1, %v181_v19, %v206_v57  ;;  %v3487_v4 = vsel %vm479_vm1, %v206_v57, %v181_v19  ;;  %v3506_v19 = vadd.f32 %v3174_v38, %v3224_v15  ;;  %v176_v55 = vadd.f32 %v3106_v0, %v3224_v15 }
  0xec   :  { %4615 = vst [vmem:[#allocation55_spill] sm:$0xff] %v3451_v23  ;;  %v3601_v0 = vadd.f32 %v3125_v10, %v3259_v62  ;;  %v3618_v10 = vadd.f32 %v3134_v13, %v3227_v61  ;;  %v4661_v50 = vsel %vm3233_vm2, %v3456_v63, %v3459_v44 }
  0xed   :  { %4616 = vst [vmem:[#allocation56_spill] sm:$0xff] %v3456_v63 }
  0xee   :  { %4617 = vst [vmem:[#allocation57_spill] sm:$0xff] %v3459_v44 }
  0xef   :  { %4618 = vst [vmem:[#allocation58_spill] sm:$0xff] %v3487_v4 }
  0xf0   :  { %v303_v28 = vpop.f32.mrf.mxu2  ;;  %v207_v23 = vpop.f32.mrf.mxu0  ;;  %4621 = vst [vmem:[#allocation61_spill] sm:$0xff] %v3502_v40 }
  0xf1   :  { %v3498_v35 = vadd.f32 %v303_v28, %v3259_v62  ;;  %v352_v22 = vpop.f32.mrf.mxu3  ;;  %v3512_v25 = vadd.f32 %v207_v23, %v3224_v15  ;;  %v256_v32 = vpop.f32.mrf.mxu1  ;;  %v3516_v28 = vadd.f32 %v3178_v43, %v3227_v61  ;;  %v3553_v43 = vadd.f32 %v3188_v45, %v3259_v62  ;;  %4633 = vst [vmem:[#allocation73_spill] sm:$0xff] %v3601_v0 }
  0xf2   :  { %v3509_v57 = vadd.f32 %v352_v22, %v3261_v8  ;;  %v3519_v4 = vadd.f32 %v256_v32, %v3227_v61  ;;  %v3562_v32 = vadd.f32 %v3191_v46, %v3261_v8  ;;  %v3570_v45 = vadd.f32 %v3109_v3, %v3227_v61  ;;  %4637 = vst [vmem:[#allocation77_spill] sm:$0xff] %v3618_v10 }
  0xf3   :  { %4620 = vst [vmem:[#allocation60_spill] sm:$0xff] %v3498_v35  ;;  %v3541_v23 = vsel %vm479_vm1, %v3512_v25, %v3506_v19  ;;  %v3608_v3 = vadd.f32 %v3129_v11, %v3261_v8 }
  0xf4   :  { %4622 = vst [vmem:[#allocation62_spill] sm:$0xff] %v3509_v57 }
  0xf5   :  { %4623 = vst [vmem:[#allocation63_spill] sm:$0xff] %v3516_v28 }
  0xf6   :  { %4624 = vst [vmem:[#allocation64_spill] sm:$0xff] %v3519_v4 }
  0xf7   :  { %4625 = vst [vmem:[#allocation65_spill] sm:$0xff] %v3541_v23 }
  0xf8   :  { %v305_v38 = vpop.f32.mrf.mxu2  ;;  %4626 = vst [vmem:[#allocation66_spill] sm:$0xff] %v3553_v43  ;;  %v210_v23 = vpop.f32.mrf.mxu0 }
  0xf9   :  { %v3556_v36 = vadd.f32 %v305_v38, %v3259_v62  ;;  %v354_v53 = vpop.f32.mrf.mxu3  ;;  %4628 = vst [vmem:[#allocation68_spill] sm:$0xff] %v3562_v32  ;;  %v211_v22 = vadd.f32 %v210_v23, %v3224_v15  ;;  %v259_v17 = vpop.f32.mrf.mxu1 }
  0xfa   :  { %v3565_v58 = vadd.f32 %v354_v53, %v3261_v8  ;;  %4630 = vst [vmem:[#allocation70_spill] sm:$0xff] %v3570_v45  ;;  %v3573_v38 = vadd.f32 %v259_v17, %v3227_v61 }
  0xfb   :  { %4627 = vst [vmem:[#allocation67_spill] sm:$0xff] %v3556_v36  ;;  %v3593_v17 = vsel %vm479_vm1, %v211_v22, %v176_v55 }
  0xfc   :  { %4629 = vst [vmem:[#allocation69_spill] sm:$0xff] %v3565_v58 }
  0xfd   :  { %4631 = vst [vmem:[#allocation71_spill] sm:$0xff] %v3573_v38 }
  0xfe   :  { %4632 = vst [vmem:[#allocation72_spill] sm:$0xff] %v3593_v17  ;;  %v178_v17 = vadd.f32 %v3131_v12, %v3224_v15  ;;  %v532_v12 = vsel %vm479_vm1, %v176_v55, %v211_v22 }
  0xff   :  { %4635 = vst [vmem:[#allocation75_spill] sm:$0xff] %v3608_v3 }
 0x100   :  { %v308_v46 = vpop.f32.mrf.mxu2  ;;  %v212_v39 = vpop.f32.mrf.mxu0 }
 0x101   :  { %v3604_v53 = vadd.f32 %v308_v46, %v3259_v62  ;;  %v357_v49 = vpop.f32.mrf.mxu3  ;;  %v213_v23 = vadd.f32 %v212_v39, %v3224_v15  ;;  %v261_v48 = vpop.f32.mrf.mxu1 }
 0x102   :  { %v3613_v14 = vadd.f32 %v357_v49, %v3261_v8  ;;  %v3621_v46 = vadd.f32 %v261_v48, %v3227_v61  ;;  %v3641_v48 = vadd.f32 %v3150_v20, %v3259_v62  ;;  %v533_v20 = vsel %vm3233_vm2, %v3570_v45, %v3573_v38 }
 0x103   :  { %4634 = vst [vmem:[#allocation74_spill] sm:$0xff] %v3604_v53  ;;  %v3633_v15 = vsel %vm479_vm1, %v213_v23, %v178_v17 }
 0x104   :  { %4636 = vst [vmem:[#allocation76_spill] sm:$0xff] %v3613_v14 }
 0x105   :  { %4638 = vst [vmem:[#allocation78_spill] sm:$0xff] %v3621_v46 }
 0x106   :  { %4639 = vst [vmem:[#allocation79_spill] sm:$0xff] %v3633_v15  ;;  %v3650_v15 = vadd.f32 %v3153_v24, %v3261_v8 }
 0x107   :  { %4640 = vst [vmem:[#allocation80_spill] sm:$0xff] %v3641_v48 }
 0x108   :  { %v310_v13 = vpop.f32.mrf.mxu2  ;;  %v709_v11 = vpop.f32.mrf.mxu0  ;;  %4642 = vst [vmem:[#allocation82_spill] sm:$0xff] %v3650_v15 }
 0x109   :  { %v3644_v39 = vadd.f32 %v310_v13, %v3259_v62  ;;  %v359_v49 = vpop.f32.mrf.mxu3  ;;  %v756_v61 = vadd.f32 %v709_v11, %v532_v12  ;;  %v723_v62 = vpop.f32.mrf.mxu1  ;;  %v534_v11 = vsel %vm3263_vm3, %v3601_v0, %v3604_v53 }
 0x10a   :  { %v3653_v54 = vadd.f32 %v359_v49, %v3261_v8  ;;  %v757_v13 = vadd.f32 %v723_v62, %v533_v20  ;;  %v536_v62 = vsel %vm479_vm1, %v178_v17, %v213_v23 }
 0x10b   :  { %4641 = vst [vmem:[#allocation81_spill] sm:$0xff] %v3644_v39  ;;  %v764_v22 = vmul.f32 0.5, %v756_v61  ;;  %v535_v61 = vsel %vm3273_vm4, %v3608_v3, %v3613_v14 }
 0x10c   :  { %4643 = vst [vmem:[#allocation83_spill] sm:$0xff] %v3653_v54  ;;  %v772_v8 = vmul.f32 0.5, %v757_v13 }
 0x10d   :  { %2404 = vtanh.f32 %v764_v22 }
 0x10e   :  { %2406 = vtanh.f32 %v772_v8  ;;  %v537_v8 = vsel %vm3233_vm2, %v3618_v10, %v3621_v46 }
 0x110   :  { %v737_v12 = vpop.f32.mrf.mxu2  ;;  %v711_v24 = vpop.f32.mrf.mxu0 }
 0x111   :  { %v758_v49 = vadd.f32 %v737_v12, %v534_v11  ;;  %v751_v20 = vpop.f32.mrf.mxu3  ;;  %v760_v22 = vadd.f32 %v711_v24, %v536_v62  ;;  %v725_v55 = vpop.f32.mrf.mxu1  ;;  %v538_v24 = vsel %vm3263_vm3, %v3641_v48, %v3644_v39  ;;  %v4659_v48 = vld [vmem:[#allocation18_spill] sm:$0xff]  ;;  %v4660_v39 = vld [vmem:[#allocation19_spill] sm:$0xff] }
 0x112   :  { %v759_v13 = vadd.f32 %v751_v20, %v535_v61  ;;  %v761_v11 = vadd.f32 %v725_v55, %v537_v8  ;;  %v539_v20 = vsel %vm3273_vm4, %v3650_v15, %v3653_v54  ;;  %v817_v15 = vpop.permute.xlu1 %816  ;;  %v807_v54 = vpop.permute.xlu0 %806 }
 0x113   :  { %2408 = vtanh.f32 %v758_v49  ;;  %v2405_v12 = vpop.eup %2404  ;;  %v765_v53 = vmul.f32 0.5, %v760_v22 }
 0x114   :  { %v782_v0 = vmul.f32 0.5, %v759_v13  ;;  %v2407_v45 = vpop.eup %2406  ;;  %v768_v3 = vmul.f32 0.5, %v2405_v12  ;;  %v773_v14 = vmul.f32 0.5, %v761_v11 }
 0x115   :  { %v776_v38 = vmul.f32 0.5, %v2407_v45 }
 0x116   :  { %2410 = vtanh.f32 %v782_v0  ;;  %v770_v17 = vadd.f32 0.5, %v768_v3 }
 0x117   :  { %2412 = vtanh.f32 %v765_v53  ;;  %v778_v23 = vadd.f32 0.5, %v776_v38 }
 0x118   :  { %2414 = vtanh.f32 %v773_v14  ;;  %v739_v61 = vpop.f32.mrf.mxu2 }
 0x119   :  { %v2409_v49 = vpop.eup %2408  ;;  %v762_v55 = vadd.f32 %v739_v61, %v538_v24  ;;  %v753_v62 = vpop.f32.mrf.mxu3  ;;  %v790_v45 = vmul.f32 0.0, %v778_v23 }
 0x11a   :  { %v792_v0 = vmul.f32 %v2409_v49, %v770_v17  ;;  %v763_v3 = vadd.f32 %v753_v62, %v539_v20  ;;  %v3694_v49 = vsel %vm479_vm1, %v807_v54, %v817_v15 }
 0x11b   :  { %2416 = vtanh.f32 %v762_v55  ;;  %vm826_vm5 = vcmp.gt.f32.partialorder %v3694_v49, 0.5 }
 0x11c   :  { %v2411_v38 = vpop.eup %2410  ;;  %v3689_v14 = vadd.f32 %v792_v0, %v790_v45  ;;  %v783_v53 = vmul.f32 0.5, %v763_v3 }
 0x11d   :  { %v2413_v13 = vpop.eup %2412  ;;  %v786_v11 = vmul.f32 0.5, %v2411_v38 }
 0x11e   :  { %v2415_v22 = vpop.eup %2414  ;;  %2418 = vtanh.f32 %v3689_v14  ;;  %v769_v8 = vmul.f32 0.5, %v2413_v13  ;;  %v812_v13 = vpop.permute.xlu0 %811 }
 0x11f   :  { %v777_v12 = vmul.f32 0.5, %v2415_v22  ;;  %2420 = vtanh.f32 %v783_v53  ;;  %v788_v55 = vadd.f32 0.5, %v786_v11  ;;  %v822_v53 = vpop.permute.xlu1 %821 }
 0x120   :  { %v771_v24 = vadd.f32 0.5, %v769_v8  ;;  %v3716_v22 = vsel %vm479_vm1, %v812_v13, %v822_v53  ;;  %v4652_v53 = vld [vmem:[#allocation11_spill] sm:$0xff]  ;;  %v4653_v13 = vld [vmem:[#allocation12_spill] sm:$0xff] }
 0x121   :  { %v2417_v61 = vpop.eup %2416  ;;  %v779_v23 = vadd.f32 0.5, %v777_v12  ;;  %vm827_vm8 = vcmp.gt.f32.partialorder %v3716_v22, 0.5 }
 0x122   :  { %v793_v17 = vmul.f32 %v2417_v61, %v771_v24  ;;  %vm2281_vm9 = vmpackc.low %vm827_vm8, %vm826_vm5 }
 0x123   :  { %v791_v20 = vmul.f32 0.0, %v779_v23 }
 0x124   :  { %v2419_v62 = vpop.eup %2418 }
 0x125   :  { %v2421_v45 = vpop.eup %2420  ;;  %v798_v0 = vmul.f32 %v2419_v62, %v788_v55  ;;  %v3696_v3 = vadd.f32 %v793_v17, %v791_v20  ;;  %v4644_v17 = vld [vmem:[#allocation3_spill] sm:$0xff]  ;;  %v4645_v55 = vld [vmem:[#allocation4_spill] sm:$0xff]  ;;  %v4646_v20 = vld [vmem:[#allocation5_spill] sm:$0xff] }
 0x126   :  { %v787_v15 = vmul.f32 0.5, %v2421_v45  ;;  %v4647_v62 = vld [vmem:[#allocation6_spill] sm:$0xff]  ;;  %v4648_v45 = vld [vmem:[#allocation7_spill] sm:$0xff]  ;;  %v985_v44 = vpop.permute.xlu0 %984 }
 0x127   :  { %v3701_v38 = vsel %vm826_vm5, %v798_v0, 0.0  ;;  %2422 = vtanh.f32 %v3696_v3 }
 0x128   :  { %v832_v54 = vpack.c.bf16 %v3701_v38, %v3701_v38  ;;  %v789_v8 = vadd.f32 0.5, %v787_v15  ;;  %v4651_v15 = vld [vmem:[#allocation10_spill] sm:$0xff] }
 0x12a   :  { %835 = vst.msk [vmem:[%s4440_s6] sm:$0xf] %vm834_vm6, %v832_v54 }
 0x12b   :  { %2279 = vst.msk [vmem:[%s4440_s6 + $0x38] sm:$0xf] %vm838_vm7, %v832_v54  ;;  %v4650_v54 = vld [vmem:[#allocation9_spill] sm:$0xff] }
 0x12d   :  { %v2423_v11 = vpop.eup %2422 }
 0x12e   :  { %v799_v12 = vmul.f32 %v2423_v11, %v789_v8  ;;  %v4654_v8 = vld [vmem:[#allocation13_spill] sm:$0xff]  ;;  %v4655_v11 = vld [vmem:[#allocation14_spill] sm:$0xff] }
 0x130   :  { %v3721_v24 = vsel %vm827_vm8, %v799_v12, 0.0  ;;  %v2282_v61 = vpack.c.bf16 %v799_v12, %v798_v0  ;;  %v4649_v0 = vld [vmem:[#allocation8_spill] sm:$0xff]  ;;  %v4656_v12 = vld [vmem:[#allocation15_spill] sm:$0xff] }
 0x131   :  { %v833_v23 = vpack.c.bf16 %v3721_v24, %v3721_v24 }
 0x132   :  { %2283 = vmatmul.msk.bf16.vlgmr.msra.gmra.mxu0 %vm2281_vm9, %v2282_v61  ;;  %2286 = vmatmul.msk.bf16.vlgmr.msra.gmra.mxu1 %vm2281_vm9, %v2282_v61 }
 0x133   :  { %836 = vst.msk [vmem:[%s4440_s6 + $0x4] sm:$0xf] %vm834_vm6, %v833_v23  ;;  %2289 = vmatmul.msk.bf16.vlgmr.msra.gmra.mxu2 %vm2281_vm9, %v2282_v61  ;;  %2292 = vmatmul.msk.bf16.vlgmr.msra.gmra.mxu3 %vm2281_vm9, %v2282_v61  ;;  %v4657_v61 = vld [vmem:[#allocation16_spill] sm:$0xff] }
 0x134   :  { %2280 = vst.msk [vmem:[%s4440_s6 + $0x3c] sm:$0xf] %vm838_vm7, %v833_v23  ;;  %1204 = vmatpush.bf16.msra.mxu0 %v2674_v29  ;;  %1218 = vmatpush.bf16.msra.mxu1 %v2676_v30  ;;  %v4658_v23 = vld [vmem:[#allocation17_spill] sm:$0xff] }
 0x135   :  { %1232 = vmatpush.bf16.msra.mxu2 %v2687_v34  ;;  %1246 = vmatpush.bf16.msra.mxu3 %v2696_v37 }
 0x138   :  { %1205 = vmatpush.bf16.msra.mxu0 %v2709_v41  ;;  %1219 = vmatpush.bf16.msra.mxu1 %v2711_v42 }
 0x139   :  { %1233 = vmatpush.bf16.msra.mxu2 %v2729_v47  ;;  %1247 = vmatpush.bf16.msra.mxu3 %v2742_v51 }
 0x13c   :  { %1206 = vmatpush.bf16.msra.mxu0 %v2744_v52  ;;  %1220 = vmatpush.bf16.msra.mxu1 %v2756_v56 }
 0x13d   :  { %1234 = vmatpush.bf16.msra.mxu2 %v2765_v59  ;;  %1248 = vmatpush.bf16.msra.mxu3 %v2769_v60 }
 0x140   :  { %1207 = vmatpush.bf16.msra.mxu0 %v2790_v1  ;;  %1221 = vmatpush.bf16.msra.mxu1 %v2801_v5 }
 0x141   :  { %1235 = vmatpush.bf16.msra.mxu2 %v2803_v6  ;;  %1249 = vmatpush.bf16.msra.mxu3 %v4644_v17 }
 0x144   :  { %1208 = vmatpush.bf16.msra.mxu0 %v4645_v55  ;;  %1222 = vmatpush.bf16.msra.mxu1 %v4646_v20 }
 0x145   :  { %1236 = vmatpush.bf16.msra.mxu2 %v4647_v62  ;;  %1250 = vmatpush.bf16.msra.mxu3 %v4648_v45 }
 0x148   :  { %1209 = vmatpush.bf16.msra.mxu0 %v4649_v0  ;;  %1223 = vmatpush.bf16.msra.mxu1 %v4650_v54 }
 0x149   :  { %1237 = vmatpush.bf16.msra.mxu2 %v4651_v15  ;;  %1251 = vmatpush.bf16.msra.mxu3 %v4652_v53 }
 0x14c   :  { %1210 = vmatpush.bf16.msra.mxu0 %v4653_v13  ;;  %1224 = vmatpush.bf16.msra.mxu1 %v4654_v8 }
 0x14d   :  { %1238 = vmatpush.bf16.msra.mxu2 %v4655_v11  ;;  %1252 = vmatpush.bf16.msra.mxu3 %v4656_v12 }
 0x150   :  { %1211 = vmatpush.bf16.msra.mxu0 %v4657_v61  ;;  %1225 = vmatpush.bf16.msra.mxu1 %v4658_v23 }
 0x151   :  { %1239 = vmatpush.bf16.msra.mxu2 %v4659_v48  ;;  %1253 = vmatpush.bf16.msra.mxu3 %v4660_v39  ;;  %v4662_v39 = vsel %vm3263_vm3, %v3495_v33, %v3498_v35 }
 0x1af   :  { %v875_v10 = vpop.f32.mrf.mxu0  ;;  %v889_v46 = vpop.f32.mrf.mxu1 }
 0x1b0   :  { %v922_v18 = vadd.f32 %v875_v10, %v3471_v31  ;;  %v923_v21 = vadd.f32 %v889_v46, %v4661_v50  ;;  %v4663_v31 = vsel %vm3273_vm4, %v3502_v40, %v3509_v57  ;;  %v861_v50 = vsel %vm479_vm1, %v3506_v19, %v3512_v25  ;;  %v975_v25 = vpop.permute.xlu2 %974 }
 0x1b2   :  { %v930_v2 = vmul.f32 0.5, %v922_v18  ;;  %v938_v27 = vmul.f32 0.5, %v923_v21  ;;  %v4664_v18 = vsel %vm3233_vm2, %v3516_v28, %v3519_v4 }
 0x1b4   :  { %2424 = vtanh.f32 %v930_v2 }
 0x1b5   :  { %2426 = vtanh.f32 %v938_v27 }
 0x1b6   :  { %v903_v61 = vpop.f32.mrf.mxu2  ;;  %v917_v23 = vpop.f32.mrf.mxu3 }
 0x1b7   :  { %v924_v48 = vadd.f32 %v903_v61, %v4662_v39  ;;  %v925_v10 = vadd.f32 %v917_v23, %v4663_v31  ;;  %v877_v2 = vpop.f32.mrf.mxu0  ;;  %v891_v21 = vpop.f32.mrf.mxu1 }
 0x1b8   :  { %v926_v27 = vadd.f32 %v877_v2, %v861_v50  ;;  %v927_v46 = vadd.f32 %v891_v21, %v4664_v18 }
 0x1b9   :  { %2428 = vtanh.f32 %v924_v48  ;;  %v948_v39 = vmul.f32 0.5, %v925_v10  ;;  %v830_v48 = vsel %vm826_vm5, %v3689_v14, 0.0  ;;  %v4665_v10 = vsel %vm3263_vm3, %v3553_v43, %v3556_v36 }
 0x1ba   :  { %v2425_v61 = vpop.eup %2424  ;;  %v931_v33 = vmul.f32 0.5, %v926_v27  ;;  %v939_v40 = vmul.f32 0.5, %v927_v46 }
 0x1bb   :  { %v2427_v23 = vpop.eup %2426  ;;  %v934_v31 = vmul.f32 0.5, %v2425_v61  ;;  %2430 = vtanh.f32 %v948_v39 }
 0x1bc   :  { %v942_v57 = vmul.f32 0.5, %v2427_v23  ;;  %2432 = vtanh.f32 %v931_v33  ;;  %v4666_v33 = vsel %vm3273_vm4, %v3562_v32, %v3565_v58  ;;  %v4681_v32 = vld [vmem:[#allocation48_spill] sm:$0xff]  ;;  %v4684_v58 = vld [vmem:[#allocation50_spill] sm:$0xff] }
 0x1bd   :  { %v936_v19 = vadd.f32 0.5, %v934_v31  ;;  %2434 = vtanh.f32 %v939_v40 }
 0x1be   :  { %v944_v50 = vadd.f32 0.5, %v942_v57  ;;  %v905_v2 = vpop.f32.mrf.mxu2  ;;  %v919_v35 = vpop.f32.mrf.mxu3  ;;  %v992_v57 = vsel %vm479_vm1, %v975_v25, %v985_v44 }
 0x1bf   :  { %v2429_v63 = vpop.eup %2428  ;;  %v928_v21 = vadd.f32 %v905_v2, %v4665_v10  ;;  %v929_v40 = vadd.f32 %v919_v35, %v4666_v33  ;;  %vm994_vm10 = vcmp.gt.f32.partialorder %v992_v57, 0.5  ;;  %v990_v25 = vpop.permute.xlu1 %989  ;;  %v4669_v57 = vld [vmem:[#allocation18_spill] sm:$0xff] }
 0x1c0   :  { %v956_v27 = vmul.f32 %v944_v50, %v830_v48  ;;  %v958_v18 = vmul.f32 %v2429_v63, %v936_v19  ;;  %v980_v63 = vpop.permute.xlu2 %979  ;;  %v831_v19 = vsel %vm827_vm8, %v3696_v3, 0.0 }
 0x1c1   :  { %v2431_v46 = vpop.eup %2430  ;;  %2436 = vtanh.f32 %v928_v21  ;;  %v949_v14 = vmul.f32 0.5, %v929_v40  ;;  %v993_v50 = vsel %vm479_vm1, %v980_v63, %v990_v25  ;;  %v4670_v63 = vld [vmem:[#allocation19_spill] sm:$0xff] }
 0x1c2   :  { %v2433_v49 = vpop.eup %2432  ;;  %v960_v39 = vadd.f32 %v958_v18, %v956_v27  ;;  %v952_v35 = vmul.f32 0.5, %v2431_v46  ;;  %vm995_vm11 = vcmp.gt.f32.partialorder %v993_v50, 0.5 }
 0x1c3   :  { %v2435_v61 = vpop.eup %2434  ;;  %v935_v23 = vmul.f32 0.5, %v2433_v49  ;;  %2438 = vtanh.f32 %v949_v14 }
 0x1c4   :  { %2440 = vtanh.f32 %v960_v39  ;;  %v943_v31 = vmul.f32 0.5, %v2435_v61  ;;  %v3810_v2 = vsel %vm994_vm10, %v960_v39, %v830_v48  ;;  %v954_v18 = vadd.f32 0.5, %v952_v35 }
 0x1c5   :  { %v937_v10 = vadd.f32 0.5, %v935_v23 }
 0x1c6   :  { %v945_v33 = vadd.f32 0.5, %v943_v31 }
 0x1c7   :  { %v2437_v44 = vpop.eup %2436 }
 0x1c8   :  { %v957_v21 = vmul.f32 %v945_v33, %v831_v19  ;;  %v959_v40 = vmul.f32 %v2437_v44, %v937_v10 }
 0x1c9   :  { %v2439_v27 = vpop.eup %2438 }
 0x1ca   :  { %v2441_v14 = vpop.eup %2440  ;;  %v961_v48 = vadd.f32 %v959_v40, %v957_v21  ;;  %v953_v61 = vmul.f32 0.5, %v2439_v27  ;;  %v4671_v21 = vld [vmem:[#allocation41_spill] sm:$0xff]  ;;  %v4672_v27 = vld [vmem:[#allocation39_spill] sm:$0xff] }
 0x1cb   :  { %v964_v46 = vmul.f32 %v2441_v14, %v954_v18  ;;  %v4673_v18 = vld [vmem:[#allocation40_spill] sm:$0xff] }
 0x1cc   :  { %2442 = vtanh.f32 %v961_v48  ;;  %v3817_v49 = vsel %vm995_vm11, %v961_v48, %v831_v19  ;;  %v955_v3 = vadd.f32 0.5, %v953_v61  ;;  %v4674_v14 = vsel %vm3233_vm2, %v4672_v27, %v4673_v18 }
 0x1cd   :  { %v996_v39 = vsel %vm994_vm10, %v964_v46, 0.0  ;;  %v3830_v10 = vsel %vm994_vm10, %v964_v46, %v3701_v38  ;;  %v4667_v38 = vld [vmem:[#allocation16_spill] sm:$0xff] }
 0x1ce   :  { %v1002_v23 = vpack.c.bf16 %v996_v39, %v996_v39 }
 0x1d0   :  { %2297 = vst.msk [vmem:[%s4440_s6 + $0x8] sm:$0xf] %vm834_vm6, %v1002_v23 }
 0x1d1   :  { %2299 = vst.msk [vmem:[%s4440_s6 + $0x30] sm:$0xf] %vm838_vm7, %v1002_v23 }
 0x1d2   :  { %v2443_v22 = vpop.eup %2442 }
 0x1d3   :  { %v965_v31 = vmul.f32 %v2443_v22, %v955_v3  ;;  %v4675_v3 = vld [vmem:[#allocation43_spill] sm:$0xff]  ;;  %v4676_v22 = vld [vmem:[#allocation44_spill] sm:$0xff] }
 0x1d5   :  { %v997_v35 = vsel %vm995_vm11, %v965_v31, 0.0  ;;  %v3833_v33 = vsel %vm995_vm11, %v965_v31, %v3721_v24  ;;  %v4668_v24 = vld [vmem:[#allocation17_spill] sm:$0xff]  ;;  %v4677_v31 = vsel %vm3263_vm3, %v4675_v3, %v4676_v22  ;;  %v1154_v22 = vpop.permute.xlu1 %1153 }
 0x1d6   :  { %v1003_v44 = vpack.c.bf16 %v997_v35, %v997_v35  ;;  %v1034_v25 = vpack.c.bf16 %v3833_v33, %v3830_v10 }
 0x1d8   :  { %2298 = vst.msk [vmem:[%s4440_s6 + $0xc] sm:$0xf] %vm834_vm6, %v1003_v44  ;;  %1043 = vmatmul.bf16.vlgmr.msrb.gmra.mxu0 %v1034_v25  ;;  %1057 = vmatmul.bf16.vlgmr.msrb.gmra.mxu1 %v1034_v25 }
 0x1d9   :  { %2300 = vst.msk [vmem:[%s4440_s6 + $0x34] sm:$0xf] %vm838_vm7, %v1003_v44  ;;  %1071 = vmatmul.bf16.vlgmr.msrb.gmra.mxu2 %v1034_v25  ;;  %1085 = vmatmul.bf16.vlgmr.msrb.gmra.mxu3 %v1034_v25  ;;  %v4678_v44 = vld [vmem:[#allocation45_spill] sm:$0xff]  ;;  %v4679_v25 = vld [vmem:[#allocation47_spill] sm:$0xff] }
 0x1da   :  { %1373 = vmatpush.bf16.msrb.mxu0 %v2674_v29  ;;  %1387 = vmatpush.bf16.msrb.mxu1 %v2676_v30 }
 0x1db   :  { %1401 = vmatpush.bf16.msrb.mxu2 %v2687_v34  ;;  %1415 = vmatpush.bf16.msrb.mxu3 %v2696_v37 }
 0x1de   :  { %1374 = vmatpush.bf16.msrb.mxu0 %v2709_v41  ;;  %1388 = vmatpush.bf16.msrb.mxu1 %v2711_v42 }
 0x1df   :  { %1402 = vmatpush.bf16.msrb.mxu2 %v2729_v47  ;;  %1416 = vmatpush.bf16.msrb.mxu3 %v2742_v51 }
 0x1e2   :  { %1375 = vmatpush.bf16.msrb.mxu0 %v2744_v52  ;;  %1389 = vmatpush.bf16.msrb.mxu1 %v2756_v56 }
 0x1e3   :  { %1403 = vmatpush.bf16.msrb.mxu2 %v2765_v59  ;;  %1417 = vmatpush.bf16.msrb.mxu3 %v2769_v60 }
 0x1e6   :  { %1376 = vmatpush.bf16.msrb.mxu0 %v2790_v1  ;;  %1390 = vmatpush.bf16.msrb.mxu1 %v2801_v5 }
 0x1e7   :  { %1404 = vmatpush.bf16.msrb.mxu2 %v2803_v6  ;;  %1418 = vmatpush.bf16.msrb.mxu3 %v4644_v17 }
 0x1ea   :  { %1377 = vmatpush.bf16.msrb.mxu0 %v4645_v55  ;;  %1391 = vmatpush.bf16.msrb.mxu1 %v4646_v20 }
 0x1eb   :  { %1405 = vmatpush.bf16.msrb.mxu2 %v4647_v62  ;;  %1419 = vmatpush.bf16.msrb.mxu3 %v4648_v45 }
 0x1ee   :  { %1378 = vmatpush.bf16.msrb.mxu0 %v4649_v0  ;;  %1392 = vmatpush.bf16.msrb.mxu1 %v4650_v54 }
 0x1ef   :  { %1406 = vmatpush.bf16.msrb.mxu2 %v4651_v15  ;;  %1420 = vmatpush.bf16.msrb.mxu3 %v4652_v53 }
 0x1f2   :  { %1379 = vmatpush.bf16.msrb.mxu0 %v4653_v13  ;;  %1393 = vmatpush.bf16.msrb.mxu1 %v4654_v8 }
 0x1f3   :  { %1407 = vmatpush.bf16.msrb.mxu2 %v4655_v11  ;;  %1421 = vmatpush.bf16.msrb.mxu3 %v4656_v12 }
 0x1f6   :  { %1380 = vmatpush.bf16.msrb.mxu0 %v4667_v38  ;;  %1394 = vmatpush.bf16.msrb.mxu1 %v4668_v24 }
 0x1f7   :  { %1408 = vmatpush.bf16.msrb.mxu2 %v4669_v57  ;;  %1422 = vmatpush.bf16.msrb.mxu3 %v4670_v63 }
 0x255   :  { %v1044_v19 = vpop.f32.mrf.mxu0  ;;  %v1058_v50 = vpop.f32.mrf.mxu1 }
 0x256   :  { %v1091_v40 = vadd.f32 %v1044_v19, %v4671_v21  ;;  %v1092_v48 = vadd.f32 %v1058_v50, %v4674_v14  ;;  %v4680_v19 = vsel %vm3273_vm4, %v4678_v44, %v4679_v25  ;;  %v4682_v50 = vld [vmem:[#allocation46_spill] sm:$0xff] }
 0x258   :  { %v1099_v46 = vmul.f32 0.5, %v1091_v40  ;;  %v1107_v39 = vmul.f32 0.5, %v1092_v48  ;;  %v1030_v40 = vsel %vm479_vm1, %v4682_v50, %v4681_v32  ;;  %v1144_v32 = vpop.permute.xlu2 %1143 }
 0x25a   :  { %2444 = vtanh.f32 %v1099_v46 }
 0x25b   :  { %2446 = vtanh.f32 %v1107_v39  ;;  %v4683_v39 = vld [vmem:[#allocation49_spill] sm:$0xff] }
 0x25c   :  { %v1072_v61 = vpop.f32.mrf.mxu2  ;;  %v1086_v23 = vpop.f32.mrf.mxu3  ;;  %v4685_v43 = vsel %vm3233_vm2, %v4683_v39, %v4684_v58 }
 0x25d   :  { %v1093_v35 = vadd.f32 %v1072_v61, %v4677_v31  ;;  %v1094_v21 = vadd.f32 %v1086_v23, %v4680_v19  ;;  %v1046_v14 = vpop.f32.mrf.mxu0  ;;  %v1060_v48 = vpop.f32.mrf.mxu1 }
 0x25e   :  { %v1095_v46 = vadd.f32 %v1046_v14, %v1030_v40  ;;  %v1096_v61 = vadd.f32 %v1060_v48, %v4685_v43  ;;  %v4686_v43 = vld [vmem:[#allocation52_spill] sm:$0xff] }
 0x25f   :  { %2448 = vtanh.f32 %v1093_v35  ;;  %v1117_v31 = vmul.f32 0.5, %v1094_v21  ;;  %v4687_v35 = vld [vmem:[#allocation53_spill] sm:$0xff] }
 0x260   :  { %v2445_v36 = vpop.eup %2444  ;;  %v1100_v28 = vmul.f32 0.5, %v1095_v46  ;;  %v1108_v4 = vmul.f32 0.5, %v1096_v61  ;;  %v4688_v21 = vsel %vm3263_vm3, %v4686_v43, %v4687_v35  ;;  %v4690_v46 = vld [vmem:[#allocation55_spill] sm:$0xff] }
 0x261   :  { %v2447_v23 = vpop.eup %2446  ;;  %v1103_v19 = vmul.f32 0.5, %v2445_v36  ;;  %2450 = vtanh.f32 %v1117_v31  ;;  %v4689_v36 = vld [vmem:[#allocation54_spill] sm:$0xff] }
 0x262   :  { %v1111_v44 = vmul.f32 0.5, %v2447_v23  ;;  %2452 = vtanh.f32 %v1100_v28  ;;  %v4691_v61 = vsel %vm3273_vm4, %v4689_v36, %v4690_v46 }
 0x263   :  { %v1105_v50 = vadd.f32 0.5, %v1103_v19  ;;  %2454 = vtanh.f32 %v1108_v4  ;;  %v1161_v4 = vsel %vm479_vm1, %v1144_v32, %v1154_v22 }
 0x264   :  { %v1113_v40 = vadd.f32 0.5, %v1111_v44  ;;  %v1074_v14 = vpop.f32.mrf.mxu2  ;;  %v1088_v25 = vpop.f32.mrf.mxu3  ;;  %vm1163_vm12 = vcmp.gt.f32.partialorder %v1161_v4, 0.5 }
 0x265   :  { %v2449_v3 = vpop.eup %2448  ;;  %v1097_v48 = vadd.f32 %v1074_v14, %v4688_v21  ;;  %v1098_v28 = vadd.f32 %v1088_v25, %v4691_v61 }
 0x266   :  { %v1125_v44 = vmul.f32 %v1113_v40, %v3810_v2  ;;  %v1127_v31 = vmul.f32 %v2449_v3, %v1105_v50  ;;  %v1149_v3 = vpop.permute.xlu0 %1148  ;;  %v1159_v50 = vpop.permute.xlu2 %1158 }
 0x267   :  { %v2451_v23 = vpop.eup %2450  ;;  %2456 = vtanh.f32 %v1097_v48  ;;  %v1118_v19 = vmul.f32 0.5, %v1098_v28  ;;  %v1162_v48 = vsel %vm479_vm1, %v1149_v3, %v1159_v50 }
 0x268   :  { %v2453_v39 = vpop.eup %2452  ;;  %v1129_v58 = vadd.f32 %v1127_v31, %v1125_v44  ;;  %v1121_v61 = vmul.f32 0.5, %v2451_v23  ;;  %vm1164_vm13 = vcmp.gt.f32.partialorder %v1162_v48, 0.5  ;;  %v4693_v48 = vld [vmem:[#allocation21_spill] sm:$0xff] }
 0x269   :  { %v2455_v27 = vpop.eup %2454  ;;  %v1104_v14 = vmul.f32 0.5, %v2453_v39  ;;  %2458 = vtanh.f32 %v1118_v19 }
 0x26a   :  { %2460 = vtanh.f32 %v1129_v58  ;;  %v1112_v21 = vmul.f32 0.5, %v2455_v27  ;;  %v3917_v25 = vsel %vm1163_vm12, %v1129_v58, %v3810_v2  ;;  %v1123_v31 = vadd.f32 0.5, %v1121_v61 }
 0x26b   :  { %v1106_v22 = vadd.f32 0.5, %v1104_v14 }
 0x26c   :  { %v1114_v32 = vadd.f32 0.5, %v1112_v21 }
 0x26d   :  { %v2457_v40 = vpop.eup %2456 }
 0x26e   :  { %v1126_v28 = vmul.f32 %v1114_v32, %v3817_v49  ;;  %v1128_v44 = vmul.f32 %v2457_v40, %v1106_v22 }
 0x26f   :  { %v2459_v39 = vpop.eup %2458 }
 0x270   :  { %v2461_v19 = vpop.eup %2460  ;;  %v1130_v27 = vadd.f32 %v1128_v44, %v1126_v28  ;;  %v1122_v23 = vmul.f32 0.5, %v2459_v39  ;;  %v4694_v28 = vld [vmem:[#allocation22_spill] sm:$0xff] }
 0x271   :  { %v1133_v36 = vmul.f32 %v2461_v19, %v1123_v31  ;;  %v4695_v44 = vsel %vm3233_vm2, %v4693_v48, %v4694_v28 }
 0x272   :  { %2462 = vtanh.f32 %v1130_v27  ;;  %v3923_v58 = vsel %vm1164_vm13, %v1130_v27, %v3817_v49  ;;  %v1124_v21 = vadd.f32 0.5, %v1122_v23  ;;  %v4696_v23 = vld [vmem:[#allocation26_spill] sm:$0xff] }
 0x273   :  { %v1165_v2 = vsel %vm1163_vm12, %v1133_v36, 0.0  ;;  %v3936_v49 = vsel %vm1163_vm12, %v1133_v36, %v3830_v10  ;;  %v4692_v36 = vld [vmem:[#allocation23_spill] sm:$0xff] }
 0x274   :  { %v1171_v14 = vpack.c.bf16 %v1165_v2, %v1165_v2 }
 0x276   :  { %2305 = vst.msk [vmem:[%s4440_s6 + $0x10] sm:$0xf] %vm834_vm6, %v1171_v14 }
 0x277   :  { %2307 = vst.msk [vmem:[%s4440_s6 + $0x28] sm:$0xf] %vm838_vm7, %v1171_v14  ;;  %v4697_v14 = vld [vmem:[#allocation27_spill] sm:$0xff] }
 0x278   :  { %v2463_v61 = vpop.eup %2462 }
 0x279   :  { %v1134_v22 = vmul.f32 %v2463_v61, %v1124_v21  ;;  %v4698_v21 = vsel %vm3263_vm3, %v4696_v23, %v4697_v14  ;;  %v1323_v14 = vpop.permute.xlu2 %1322 }
 0x27b   :  { %v1166_v32 = vsel %vm1164_vm13, %v1134_v22, 0.0  ;;  %v3939_v40 = vsel %vm1164_vm13, %v1134_v22, %v3833_v33  ;;  %v4699_v22 = vld [vmem:[#allocation28_spill] sm:$0xff] }
 0x27c   :  { %v1172_v3 = vpack.c.bf16 %v1166_v32, %v1166_v32  ;;  %v1203_v50 = vpack.c.bf16 %v3939_v40, %v3936_v49  ;;  %v4700_v32 = vld [vmem:[#allocation30_spill] sm:$0xff] }
 0x27e   :  { %2306 = vst.msk [vmem:[%s4440_s6 + $0x14] sm:$0xf] %vm834_vm6, %v1172_v3  ;;  %1212 = vmatmul.bf16.vlgmr.msra.gmra.mxu0 %v1203_v50  ;;  %1226 = vmatmul.bf16.vlgmr.msra.gmra.mxu1 %v1203_v50 }
 0x27f   :  { %2308 = vst.msk [vmem:[%s4440_s6 + $0x2c] sm:$0xf] %vm838_vm7, %v1172_v3  ;;  %1240 = vmatmul.bf16.vlgmr.msra.gmra.mxu2 %v1203_v50  ;;  %1254 = vmatmul.bf16.vlgmr.msra.gmra.mxu3 %v1203_v50  ;;  %v4701_v3 = vsel %vm3273_vm4, %v4699_v22, %v4700_v32 }
 0x280   :  { %1540 = vmatpush.bf16.msra.mxu0 %v2674_v29  ;;  %1554 = vmatpush.bf16.msra.mxu1 %v2676_v30 }
 0x281   :  { %1568 = vmatpush.bf16.msra.mxu2 %v2687_v34  ;;  %1582 = vmatpush.bf16.msra.mxu3 %v2696_v37 }
 0x284   :  { %1541 = vmatpush.bf16.msra.mxu0 %v2709_v41  ;;  %1555 = vmatpush.bf16.msra.mxu1 %v2711_v42 }
 0x285   :  { %1569 = vmatpush.bf16.msra.mxu2 %v2729_v47  ;;  %1583 = vmatpush.bf16.msra.mxu3 %v2742_v51 }
 0x288   :  { %1542 = vmatpush.bf16.msra.mxu0 %v2744_v52  ;;  %1556 = vmatpush.bf16.msra.mxu1 %v2756_v56 }
 0x289   :  { %1570 = vmatpush.bf16.msra.mxu2 %v2765_v59  ;;  %1584 = vmatpush.bf16.msra.mxu3 %v2769_v60 }
 0x28c   :  { %1543 = vmatpush.bf16.msra.mxu0 %v2790_v1  ;;  %1557 = vmatpush.bf16.msra.mxu1 %v2801_v5 }
 0x28d   :  { %1571 = vmatpush.bf16.msra.mxu2 %v2803_v6  ;;  %1585 = vmatpush.bf16.msra.mxu3 %v4644_v17 }
 0x290   :  { %1544 = vmatpush.bf16.msra.mxu0 %v4645_v55  ;;  %1558 = vmatpush.bf16.msra.mxu1 %v4646_v20 }
 0x291   :  { %1572 = vmatpush.bf16.msra.mxu2 %v4647_v62  ;;  %1586 = vmatpush.bf16.msra.mxu3 %v4648_v45 }
 0x294   :  { %1545 = vmatpush.bf16.msra.mxu0 %v4649_v0  ;;  %1559 = vmatpush.bf16.msra.mxu1 %v4650_v54 }
 0x295   :  { %1573 = vmatpush.bf16.msra.mxu2 %v4651_v15  ;;  %1587 = vmatpush.bf16.msra.mxu3 %v4652_v53 }
 0x298   :  { %1546 = vmatpush.bf16.msra.mxu0 %v4653_v13  ;;  %1560 = vmatpush.bf16.msra.mxu1 %v4654_v8 }
 0x299   :  { %1574 = vmatpush.bf16.msra.mxu2 %v4655_v11  ;;  %1588 = vmatpush.bf16.msra.mxu3 %v4656_v12 }
 0x29c   :  { %1547 = vmatpush.bf16.msra.mxu0 %v4667_v38  ;;  %1561 = vmatpush.bf16.msra.mxu1 %v4668_v24 }
 0x29d   :  { %1575 = vmatpush.bf16.msra.mxu2 %v4669_v57  ;;  %1589 = vmatpush.bf16.msra.mxu3 %v4670_v63 }
 0x2fb   :  { %v1213_v10 = vpop.f32.mrf.mxu0  ;;  %v1227_v33 = vpop.f32.mrf.mxu1 }
 0x2fc   :  { %v1260_v4 = vadd.f32 %v1213_v10, %v4692_v36  ;;  %v1261_v39 = vadd.f32 %v1227_v33, %v4695_v44  ;;  %v4702_v10 = vld [vmem:[#allocation31_spill] sm:$0xff]  ;;  %v4703_v33 = vld [vmem:[#allocation29_spill] sm:$0xff] }
 0x2fd   :  { %v1199_v36 = vsel %vm479_vm1, %v4703_v33, %v4702_v10  ;;  %v1313_v10 = vpop.permute.xlu0 %1312 }
 0x2fe   :  { %v1268_v31 = vmul.f32 0.5, %v1260_v4  ;;  %v1276_v19 = vmul.f32 0.5, %v1261_v39 }
 0x300   :  { %2464 = vtanh.f32 %v1268_v31  ;;  %v4704_v31 = vld [vmem:[#allocation32_spill] sm:$0xff] }
 0x301   :  { %2466 = vtanh.f32 %v1276_v19  ;;  %v4705_v19 = vld [vmem:[#allocation33_spill] sm:$0xff] }
 0x302   :  { %v1241_v27 = vpop.f32.mrf.mxu2  ;;  %v1255_v2 = vpop.f32.mrf.mxu3  ;;  %v4706_v46 = vsel %vm3233_vm2, %v4704_v31, %v4705_v19 }
 0x303   :  { %v1262_v61 = vadd.f32 %v1241_v27, %v4698_v21  ;;  %v1263_v50 = vadd.f32 %v1255_v2, %v4701_v3  ;;  %v1215_v4 = vpop.f32.mrf.mxu0  ;;  %v1229_v44 = vpop.f32.mrf.mxu1 }
 0x304   :  { %v1264_v39 = vadd.f32 %v1215_v4, %v1199_v36  ;;  %v1265_v27 = vadd.f32 %v1229_v44, %v4706_v46  ;;  %v4707_v46 = vld [vmem:[#allocation35_spill] sm:$0xff] }
 0x305   :  { %2468 = vtanh.f32 %v1262_v61  ;;  %v1286_v21 = vmul.f32 0.5, %v1263_v50  ;;  %v4708_v61 = vld [vmem:[#allocation36_spill] sm:$0xff] }
 0x306   :  { %v2465_v43 = vpop.eup %2464  ;;  %v1269_v35 = vmul.f32 0.5, %v1264_v39  ;;  %v1277_v18 = vmul.f32 0.5, %v1265_v27  ;;  %v4709_v50 = vsel %vm3263_vm3, %v4707_v46, %v4708_v61  ;;  %v4711_v39 = vld [vmem:[#allocation38_spill] sm:$0xff] }
 0x307   :  { %v2467_v2 = vpop.eup %2466  ;;  %v1272_v3 = vmul.f32 0.5, %v2465_v43  ;;  %2470 = vtanh.f32 %v1286_v21  ;;  %v4710_v43 = vld [vmem:[#allocation37_spill] sm:$0xff] }
 0x308   :  { %v1280_v22 = vmul.f32 0.5, %v2467_v2  ;;  %2472 = vtanh.f32 %v1269_v35  ;;  %v4712_v27 = vsel %vm3273_vm4, %v4710_v43, %v4711_v39 }
 0x309   :  { %v1274_v33 = vadd.f32 0.5, %v1272_v3  ;;  %2474 = vtanh.f32 %v1277_v18  ;;  %v1330_v18 = vsel %vm479_vm1, %v1313_v10, %v1323_v14 }
 0x30a   :  { %v1282_v36 = vadd.f32 0.5, %v1280_v22  ;;  %v1243_v4 = vpop.f32.mrf.mxu2  ;;  %v1257_v32 = vpop.f32.mrf.mxu3  ;;  %vm1332_vm14 = vcmp.gt.f32.partialorder %v1330_v18, 0.5 }
 0x30b   :  { %v2469_v23 = vpop.eup %2468  ;;  %v1266_v44 = vadd.f32 %v1243_v4, %v4709_v50  ;;  %v1267_v35 = vadd.f32 %v1257_v32, %v4712_v27 }
 0x30c   :  { %v1294_v22 = vmul.f32 %v1282_v36, %v3917_v25  ;;  %v1296_v21 = vmul.f32 %v2469_v23, %v1274_v33  ;;  %v1318_v23 = vpop.permute.xlu1 %1317  ;;  %v1328_v33 = vpop.permute.xlu0 %1327 }
 0x30d   :  { %v2471_v2 = vpop.eup %2470  ;;  %2476 = vtanh.f32 %v1266_v44  ;;  %v1287_v3 = vmul.f32 0.5, %v1267_v35  ;;  %v1331_v44 = vsel %vm479_vm1, %v1318_v23, %v1328_v33 }
 0x30e   :  { %v2473_v31 = vpop.eup %2472  ;;  %v1298_v19 = vadd.f32 %v1296_v21, %v1294_v22  ;;  %v1290_v27 = vmul.f32 0.5, %v2471_v2  ;;  %vm1333_vm15 = vcmp.gt.f32.partialorder %v1331_v44, 0.5  ;;  %v4714_v44 = vsel %vm3233_vm2, %v4694_v28, %v4693_v48 }
 0x30f   :  { %v2475_v9 = vpop.eup %2474  ;;  %v1273_v4 = vmul.f32 0.5, %v2473_v31  ;;  %2478 = vtanh.f32 %v1287_v3 }
 0x310   :  { %2480 = vtanh.f32 %v1298_v19  ;;  %v1281_v50 = vmul.f32 0.5, %v2475_v9  ;;  %v4023_v32 = vsel %vm1332_vm14, %v1298_v19, %v3917_v25  ;;  %v1292_v21 = vadd.f32 0.5, %v1290_v27 }
 0x311   :  { %v1275_v14 = vadd.f32 0.5, %v1273_v4 }
 0x312   :  { %v1283_v10 = vadd.f32 0.5, %v1281_v50 }
 0x313   :  { %v2477_v36 = vpop.eup %2476 }
 0x314   :  { %v1295_v35 = vmul.f32 %v1283_v10, %v3923_v58  ;;  %v1297_v22 = vmul.f32 %v2477_v36, %v1275_v14  ;;  %v1492_v26 = vpop.permute.xlu0 %1491 }
 0x315   :  { %v2479_v31 = vpop.eup %2478 }
 0x316   :  { %v2481_v3 = vpop.eup %2480  ;;  %v1299_v9 = vadd.f32 %v1297_v22, %v1295_v35  ;;  %v1291_v2 = vmul.f32 0.5, %v2479_v31 }
 0x317   :  { %v1302_v43 = vmul.f32 %v2481_v3, %v1292_v21 }
 0x318   :  { %2482 = vtanh.f32 %v1299_v9  ;;  %v4029_v25 = vsel %vm1333_vm15, %v1299_v9, %v3923_v58  ;;  %v1293_v50 = vadd.f32 0.5, %v1291_v2  ;;  %v4717_v2 = vld [vmem:[#allocation26_spill] sm:$0xff] }
 0x319   :  { %v1334_v19 = vsel %vm1332_vm14, %v1302_v43, 0.0  ;;  %v4042_v58 = vsel %vm1332_vm14, %v1302_v43, %v3936_v49  ;;  %v4713_v43 = vld [vmem:[#allocation24_spill] sm:$0xff] }
 0x31a   :  { %v1340_v4 = vpack.c.bf16 %v1334_v19, %v1334_v19  ;;  %v4716_v19 = vld [vmem:[#allocation27_spill] sm:$0xff] }
 0x31c   :  { %2313 = vst.msk [vmem:[%s4440_s6 + $0x18] sm:$0xf] %vm834_vm6, %v1340_v4 }
 0x31d   :  { %2315 = vst.msk [vmem:[%s4440_s6 + $0x20] sm:$0xf] %vm838_vm7, %v1340_v4  ;;  %v4718_v4 = vsel %vm3263_vm3, %v4716_v19, %v4717_v2 }
 0x31e   :  { %v2483_v27 = vpop.eup %2482 }
 0x31f   :  { %v1303_v14 = vmul.f32 %v2483_v27, %v1293_v50  ;;  %v4719_v27 = vld [vmem:[#allocation30_spill] sm:$0xff] }
 0x321   :  { %v1335_v10 = vsel %vm1333_vm15, %v1303_v14, 0.0  ;;  %v4045_v36 = vsel %vm1333_vm15, %v1303_v14, %v3939_v40  ;;  %v4720_v14 = vld [vmem:[#allocation28_spill] sm:$0xff] }
 0x322   :  { %v1341_v23 = vpack.c.bf16 %v1335_v10, %v1335_v10  ;;  %v1372_v33 = vpack.c.bf16 %v4045_v36, %v4042_v58  ;;  %v4721_v10 = vsel %vm3273_vm4, %v4719_v27, %v4720_v14 }
 0x324   :  { %2314 = vst.msk [vmem:[%s4440_s6 + $0x1c] sm:$0xf] %vm834_vm6, %v1341_v23  ;;  %1381 = vmatmul.bf16.vlgmr.msrb.gmra.mxu0 %v1372_v33  ;;  %1395 = vmatmul.bf16.vlgmr.msrb.gmra.mxu1 %v1372_v33 }
 0x325   :  { %2316 = vst.msk [vmem:[%s4440_s6 + $0x24] sm:$0xf] %vm838_vm7, %v1341_v23  ;;  %1409 = vmatmul.bf16.vlgmr.msrb.gmra.mxu2 %v1372_v33  ;;  %1423 = vmatmul.bf16.vlgmr.msrb.gmra.mxu3 %v1372_v33  ;;  %v4722_v33 = vld [vmem:[#allocation34_spill] sm:$0xff] }
 0x326   :  { %1707 = vmatpush.bf16.msrb.mxu0 %v2674_v29  ;;  %1721 = vmatpush.bf16.msrb.mxu1 %v2676_v30 }
 0x327   :  { %1735 = vmatpush.bf16.msrb.mxu2 %v2687_v34  ;;  %1749 = vmatpush.bf16.msrb.mxu3 %v2696_v37 }
 0x32a   :  { %1708 = vmatpush.bf16.msrb.mxu0 %v2709_v41  ;;  %1722 = vmatpush.bf16.msrb.mxu1 %v2711_v42 }
 0x32b   :  { %1736 = vmatpush.bf16.msrb.mxu2 %v2729_v47  ;;  %1750 = vmatpush.bf16.msrb.mxu3 %v2742_v51 }
 0x32e   :  { %1709 = vmatpush.bf16.msrb.mxu0 %v2744_v52  ;;  %1723 = vmatpush.bf16.msrb.mxu1 %v2756_v56 }
 0x32f   :  { %1737 = vmatpush.bf16.msrb.mxu2 %v2765_v59  ;;  %1751 = vmatpush.bf16.msrb.mxu3 %v2769_v60 }
 0x332   :  { %1710 = vmatpush.bf16.msrb.mxu0 %v2790_v1  ;;  %1724 = vmatpush.bf16.msrb.mxu1 %v2801_v5 }
 0x333   :  { %1738 = vmatpush.bf16.msrb.mxu2 %v2803_v6  ;;  %1752 = vmatpush.bf16.msrb.mxu3 %v4644_v17 }
 0x336   :  { %1711 = vmatpush.bf16.msrb.mxu0 %v4645_v55  ;;  %1725 = vmatpush.bf16.msrb.mxu1 %v4646_v20 }
 0x337   :  { %1739 = vmatpush.bf16.msrb.mxu2 %v4647_v62  ;;  %1753 = vmatpush.bf16.msrb.mxu3 %v4648_v45 }
 0x33a   :  { %1712 = vmatpush.bf16.msrb.mxu0 %v4649_v0  ;;  %1726 = vmatpush.bf16.msrb.mxu1 %v4650_v54 }
 0x33b   :  { %1740 = vmatpush.bf16.msrb.mxu2 %v4651_v15  ;;  %1754 = vmatpush.bf16.msrb.mxu3 %v4652_v53 }
 0x33e   :  { %1713 = vmatpush.bf16.msrb.mxu0 %v4653_v13  ;;  %1727 = vmatpush.bf16.msrb.mxu1 %v4654_v8 }
 0x33f   :  { %1741 = vmatpush.bf16.msrb.mxu2 %v4655_v11  ;;  %1755 = vmatpush.bf16.msrb.mxu3 %v4656_v12 }
 0x342   :  { %1714 = vmatpush.bf16.msrb.mxu0 %v4667_v38  ;;  %1728 = vmatpush.bf16.msrb.mxu1 %v4668_v24 }
 0x343   :  { %1742 = vmatpush.bf16.msrb.mxu2 %v4669_v57  ;;  %1756 = vmatpush.bf16.msrb.mxu3 %v4670_v63 }
 0x3a1   :  { %v1382_v49 = vpop.f32.mrf.mxu0  ;;  %v1396_v40 = vpop.f32.mrf.mxu1 }
 0x3a2   :  { %v1429_v18 = vadd.f32 %v1382_v49, %v4713_v43  ;;  %v1430_v35 = vadd.f32 %v1396_v40, %v4714_v44  ;;  %v4723_v40 = vld [vmem:[#allocation33_spill] sm:$0xff]  ;;  %v4724_v43 = vld [vmem:[#allocation32_spill] sm:$0xff] }
 0x3a4   :  { %v1437_v22 = vmul.f32 0.5, %v1429_v18  ;;  %v1445_v31 = vmul.f32 0.5, %v1430_v35  ;;  %v4725_v18 = vsel %vm3233_vm2, %v4723_v40, %v4724_v43 }
 0x3a6   :  { %2484 = vtanh.f32 %v1437_v22 }
 0x3a7   :  { %2486 = vtanh.f32 %v1445_v31 }
 0x3a8   :  { %v1410_v21 = vpop.f32.mrf.mxu2  ;;  %v1424_v3 = vpop.f32.mrf.mxu3 }
 0x3a9   :  { %v1431_v50 = vadd.f32 %v1410_v21, %v4718_v4  ;;  %v1432_v23 = vadd.f32 %v1424_v3, %v4721_v10  ;;  %v1384_v48 = vpop.f32.mrf.mxu0  ;;  %v1398_v28 = vpop.f32.mrf.mxu1 }
 0x3aa   :  { %v1433_v49 = vadd.f32 %v1384_v48, %v4722_v33  ;;  %v1434_v44 = vadd.f32 %v1398_v28, %v4725_v18  ;;  %v1482_v3 = vpop.permute.xlu1 %1481  ;;  %v4727_v28 = vld [vmem:[#allocation37_spill] sm:$0xff] }
 0x3ab   :  { %2488 = vtanh.f32 %v1431_v50  ;;  %v1455_v35 = vmul.f32 0.5, %v1432_v23  ;;  %v4726_v50 = vsel %vm3263_vm3, %v4708_v61, %v4707_v46  ;;  %v1499_v43 = vsel %vm479_vm1, %v1482_v3, %v1492_v26 }
 0x3ac   :  { %v2485_v22 = vpop.eup %2484  ;;  %v1438_v31 = vmul.f32 0.5, %v1433_v49  ;;  %v1446_v21 = vmul.f32 0.5, %v1434_v44  ;;  %v4728_v49 = vsel %vm3273_vm4, %v4711_v39, %v4727_v28  ;;  %vm1501_vm0 = vcmp.gt.f32.partialorder %v1499_v43, 0.5 }
 0x3ad   :  { %v2487_v19 = vpop.eup %2486  ;;  %v1441_v2 = vmul.f32 0.5, %v2485_v22  ;;  %2490 = vtanh.f32 %v1455_v35 }
 0x3ae   :  { %v1449_v4 = vmul.f32 0.5, %v2487_v19  ;;  %2492 = vtanh.f32 %v1438_v31 }
 0x3af   :  { %v1443_v27 = vadd.f32 0.5, %v1441_v2  ;;  %2494 = vtanh.f32 %v1446_v21 }
 0x3b0   :  { %v1451_v14 = vadd.f32 0.5, %v1449_v4  ;;  %v1412_v10 = vpop.f32.mrf.mxu2  ;;  %v1426_v48 = vpop.f32.mrf.mxu3 }
 0x3b1   :  { %v2489_v33 = vpop.eup %2488  ;;  %v1435_v23 = vadd.f32 %v1412_v10, %v4726_v50  ;;  %v1436_v40 = vadd.f32 %v1426_v48, %v4728_v49 }
 0x3b2   :  { %v1463_v18 = vmul.f32 %v1451_v14, %v4023_v32  ;;  %v1465_v44 = vmul.f32 %v2489_v33, %v1443_v27  ;;  %v1497_v27 = vpop.permute.xlu1 %1496  ;;  %v1487_v14 = vpop.permute.xlu2 %1486 }
 0x3b3   :  { %v2491_v35 = vpop.eup %2490  ;;  %2496 = vtanh.f32 %v1435_v23  ;;  %v1456_v22 = vmul.f32 0.5, %v1436_v40  ;;  %v1500_v10 = vsel %vm479_vm1, %v1487_v14, %v1497_v27 }
 0x3b4   :  { %v2493_v31 = vpop.eup %2492  ;;  %v1467_v21 = vadd.f32 %v1465_v44, %v1463_v18  ;;  %v1459_v2 = vmul.f32 0.5, %v2491_v35  ;;  %vm1502_vm5 = vcmp.gt.f32.partialorder %v1500_v10, 0.5 }
 0x3b5   :  { %v2495_v19 = vpop.eup %2494  ;;  %v1442_v46 = vmul.f32 0.5, %v2493_v31  ;;  %2498 = vtanh.f32 %v1456_v22 }
 0x3b6   :  { %2500 = vtanh.f32 %v1467_v21  ;;  %v1450_v61 = vmul.f32 0.5, %v2495_v19  ;;  %v4126_v39 = vsel %vm1501_vm0, %v1467_v21, %v4023_v32  ;;  %v1461_v23 = vadd.f32 0.5, %v1459_v2 }
 0x3b7   :  { %v1444_v26 = vadd.f32 0.5, %v1442_v46 }
 0x3b8   :  { %v1452_v4 = vadd.f32 0.5, %v1450_v61 }
 0x3b9   :  { %v2497_v3 = vpop.eup %2496 }
 0x3ba   :  { %v1464_v48 = vmul.f32 %v1452_v4, %v4029_v25  ;;  %v1466_v33 = vmul.f32 %v2497_v3, %v1444_v26  ;;  %v1649_v4 = vpop.permute.xlu2 %1648 }
 0x3bb   :  { %v2499_v50 = vpop.eup %2498 }
 0x3bc   :  { %v2501_v28 = vpop.eup %2500  ;;  %v1468_v49 = vadd.f32 %v1466_v33, %v1464_v48  ;;  %v1460_v44 = vmul.f32 0.5, %v2499_v50  ;;  %v1659_v33 = vpop.permute.xlu1 %1658  ;;  %v4744_v50 = vld [vmem:[#allocation53_spill] sm:$0xff] }
 0x3bd   :  { %v1471_v40 = vmul.f32 %v2501_v28, %v1461_v23  ;;  %v4745_v23 = vld [vmem:[#allocation52_spill] sm:$0xff] }
 0x3be   :  { %2502 = vtanh.f32 %v1468_v49  ;;  %v4132_v32 = vsel %vm1502_vm5, %v1468_v49, %v4029_v25  ;;  %v1462_v22 = vadd.f32 0.5, %v1460_v44  ;;  %v4746_v28 = vsel %vm3263_vm3, %v4744_v50, %v4745_v23  ;;  %v4757_v23 = vld [vmem:[#allocation62_spill] sm:$0xff] }
 0x3bf   :  { %v1503_v18 = vsel %vm1501_vm0, %v1471_v40, 0.0  ;;  %v4145_v25 = vsel %vm1501_vm0, %v1471_v40, %v4042_v58  ;;  %v4747_v40 = vld [vmem:[#allocation55_spill] sm:$0xff] }
 0x3c0   :  { %v1509_v35 = vpack.c.bf16 %v1503_v18, %v1503_v18  ;;  %v4748_v18 = vld [vmem:[#allocation54_spill] sm:$0xff] }
 0x3c1   :  { %v4749_v44 = vsel %vm3273_vm4, %v4747_v40, %v4748_v18 }
 0x3c2   :  { %2321 = vst.msk [vmem:[%s4440_s6 + $0x20] sm:$0xf] %vm834_vm6, %v1509_v35 }
 0x3c3   :  { %2323 = vst.msk [vmem:[%s4440_s6 + $0x18] sm:$0xf] %vm838_vm7, %v1509_v35 }
 0x3c4   :  { %v2503_v31 = vpop.eup %2502 }
 0x3c5   :  { %v1472_v21 = vmul.f32 %v2503_v31, %v1462_v22  ;;  %v1666_v22 = vsel %vm479_vm1, %v1649_v4, %v1659_v33 }
 0x3c6   :  { %vm1668_vm8 = vcmp.gt.f32.partialorder %v1666_v22, 0.5 }
 0x3c7   :  { %v1504_v19 = vsel %vm1502_vm5, %v1472_v21, 0.0  ;;  %v4148_v46 = vsel %vm1502_vm5, %v1472_v21, %v4045_v36 }
 0x3c8   :  { %v1510_v61 = vpack.c.bf16 %v1504_v19, %v1504_v19  ;;  %v1539_v2 = vpack.c.bf16 %v4148_v46, %v4145_v25 }
 0x3ca   :  { %2322 = vst.msk [vmem:[%s4440_s6 + $0x24] sm:$0xf] %vm834_vm6, %v1510_v61  ;;  %1548 = vmatmul.bf16.vlgmr.msra.gmra.mxu0 %v1539_v2  ;;  %1562 = vmatmul.bf16.vlgmr.msra.gmra.mxu1 %v1539_v2 }
 0x3cb   :  { %2324 = vst.msk [vmem:[%s4440_s6 + $0x1c] sm:$0xf] %vm838_vm7, %v1510_v61  ;;  %1576 = vmatmul.bf16.vlgmr.msra.gmra.mxu2 %v1539_v2  ;;  %1590 = vmatmul.bf16.vlgmr.msra.gmra.mxu3 %v1539_v2 }
 0x3cc   :  { %1874 = vmatpush.bf16.msra.mxu0 %v2674_v29  ;;  %1888 = vmatpush.bf16.msra.mxu1 %v2676_v30 }
 0x3cd   :  { %1902 = vmatpush.bf16.msra.mxu2 %v2687_v34  ;;  %1916 = vmatpush.bf16.msra.mxu3 %v2696_v37  ;;  %v4729_v34 = vld [vmem:[#allocation42_spill] sm:$0xff] }
 0x3d0   :  { %1875 = vmatpush.bf16.msra.mxu0 %v2709_v41  ;;  %1889 = vmatpush.bf16.msra.mxu1 %v2711_v42  ;;  %v4731_v42 = vld [vmem:[#allocation40_spill] sm:$0xff] }
 0x3d1   :  { %1903 = vmatpush.bf16.msra.mxu2 %v2729_v47  ;;  %1917 = vmatpush.bf16.msra.mxu3 %v2742_v51  ;;  %v4732_v47 = vld [vmem:[#allocation39_spill] sm:$0xff] }
 0x3d2   :  { %v4733_v51 = vsel %vm3233_vm2, %v4731_v42, %v4732_v47 }
 0x3d4   :  { %1876 = vmatpush.bf16.msra.mxu0 %v2744_v52  ;;  %1890 = vmatpush.bf16.msra.mxu1 %v2756_v56 }
 0x3d5   :  { %1904 = vmatpush.bf16.msra.mxu2 %v2765_v59  ;;  %1918 = vmatpush.bf16.msra.mxu3 %v2769_v60 }
 0x3d8   :  { %1877 = vmatpush.bf16.msra.mxu0 %v2790_v1  ;;  %1891 = vmatpush.bf16.msra.mxu1 %v2801_v5  ;;  %v4734_v5 = vld [vmem:[#allocation44_spill] sm:$0xff] }
 0x3d9   :  { %1905 = vmatpush.bf16.msra.mxu2 %v2803_v6  ;;  %1919 = vmatpush.bf16.msra.mxu3 %v4644_v17  ;;  %v4735_v6 = vld [vmem:[#allocation43_spill] sm:$0xff] }
 0x3da   :  { %v4736_v17 = vsel %vm3263_vm3, %v4734_v5, %v4735_v6 }
 0x3dc   :  { %1878 = vmatpush.bf16.msra.mxu0 %v4645_v55  ;;  %1892 = vmatpush.bf16.msra.mxu1 %v4646_v20  ;;  %v4737_v20 = vld [vmem:[#allocation47_spill] sm:$0xff] }
 0x3dd   :  { %1906 = vmatpush.bf16.msra.mxu2 %v4647_v62  ;;  %1920 = vmatpush.bf16.msra.mxu3 %v4648_v45  ;;  %v4738_v62 = vld [vmem:[#allocation45_spill] sm:$0xff] }
 0x3de   :  { %v4739_v45 = vsel %vm3273_vm4, %v4737_v20, %v4738_v62 }
 0x3e0   :  { %1879 = vmatpush.bf16.msra.mxu0 %v4649_v0  ;;  %1893 = vmatpush.bf16.msra.mxu1 %v4650_v54 }
 0x3e1   :  { %1907 = vmatpush.bf16.msra.mxu2 %v4651_v15  ;;  %1921 = vmatpush.bf16.msra.mxu3 %v4652_v53  ;;  %v4740_v53 = vld [vmem:[#allocation51_spill] sm:$0xff] }
 0x3e4   :  { %1880 = vmatpush.bf16.msra.mxu0 %v4653_v13  ;;  %1894 = vmatpush.bf16.msra.mxu1 %v4654_v8  ;;  %v4741_v8 = vld [vmem:[#allocation50_spill] sm:$0xff] }
 0x3e5   :  { %1908 = vmatpush.bf16.msra.mxu2 %v4655_v11  ;;  %1922 = vmatpush.bf16.msra.mxu3 %v4656_v12  ;;  %v4742_v11 = vld [vmem:[#allocation49_spill] sm:$0xff] }
 0x3e6   :  { %v4743_v12 = vsel %vm3233_vm2, %v4741_v8, %v4742_v11 }
 0x3e8   :  { %1881 = vmatpush.bf16.msra.mxu0 %v4667_v38  ;;  %1895 = vmatpush.bf16.msra.mxu1 %v4668_v24 }
 0x3e9   :  { %1909 = vmatpush.bf16.msra.mxu2 %v4669_v57  ;;  %1923 = vmatpush.bf16.msra.mxu3 %v4670_v63 }
 0x447   :  { %v1549_v29 = vpop.f32.mrf.mxu0  ;;  %v1563_v30 = vpop.f32.mrf.mxu1 }
 0x448   :  { %v1596_v37 = vadd.f32 %v1549_v29, %v4729_v34  ;;  %v1597_v52 = vadd.f32 %v1563_v30, %v4733_v51 }
 0x44a   :  { %v1604_v56 = vmul.f32 0.5, %v1596_v37  ;;  %v1612_v59 = vmul.f32 0.5, %v1597_v52 }
 0x44c   :  { %2504 = vtanh.f32 %v1604_v56 }
 0x44d   :  { %2506 = vtanh.f32 %v1612_v59  ;;  %v1654_v59 = vpop.permute.xlu0 %1653 }
 0x44e   :  { %v1577_v60 = vpop.f32.mrf.mxu2  ;;  %v1591_v1 = vpop.f32.mrf.mxu3 }
 0x44f   :  { %v1598_v55 = vadd.f32 %v1577_v60, %v4736_v17  ;;  %v1599_v0 = vadd.f32 %v1591_v1, %v4739_v45  ;;  %v1551_v54 = vpop.f32.mrf.mxu0  ;;  %v1565_v15 = vpop.f32.mrf.mxu1 }
 0x450   :  { %v1600_v13 = vadd.f32 %v1551_v54, %v4740_v53  ;;  %v1601_v38 = vadd.f32 %v1565_v15, %v4743_v12  ;;  %v1664_v60 = vpop.permute.xlu2 %1663 }
 0x451   :  { %2508 = vtanh.f32 %v1598_v55  ;;  %v1622_v24 = vmul.f32 0.5, %v1599_v0  ;;  %v1667_v1 = vsel %vm479_vm1, %v1654_v59, %v1664_v60 }
 0x452   :  { %v2505_v57 = vpop.eup %2504  ;;  %v1605_v63 = vmul.f32 0.5, %v1600_v13  ;;  %v1613_v58 = vmul.f32 0.5, %v1601_v38  ;;  %vm1669_vm9 = vcmp.gt.f32.partialorder %v1667_v1, 0.5 }
 0x453   :  { %v2507_v36 = vpop.eup %2506  ;;  %v1608_v43 = vmul.f32 0.5, %v2505_v57  ;;  %2510 = vtanh.f32 %v1622_v24  ;;  %v4750_v57 = vld [vmem:[#allocation58_spill] sm:$0xff] }
 0x454   :  { %v1616_v26 = vmul.f32 0.5, %v2507_v36  ;;  %2512 = vtanh.f32 %v1605_v63  ;;  %v4752_v36 = vld [vmem:[#allocation56_spill] sm:$0xff] }
 0x455   :  { %v1610_v3 = vadd.f32 0.5, %v1608_v43  ;;  %2514 = vtanh.f32 %v1613_v58  ;;  %v4751_v58 = vld [vmem:[#allocation57_spill] sm:$0xff] }
 0x456   :  { %v1618_v27 = vadd.f32 0.5, %v1616_v26  ;;  %v1579_v14 = vpop.f32.mrf.mxu2  ;;  %v1593_v10 = vpop.f32.mrf.mxu3  ;;  %v4753_v43 = vsel %vm3233_vm2, %v4751_v58, %v4752_v36 }
 0x457   :  { %v2509_v48 = vpop.eup %2508  ;;  %v1602_v49 = vadd.f32 %v1579_v14, %v4746_v28  ;;  %v1603_v35 = vadd.f32 %v1593_v10, %v4749_v44  ;;  %v4754_v10 = vld [vmem:[#allocation60_spill] sm:$0xff]  ;;  %v4758_v28 = vld [vmem:[#allocation61_spill] sm:$0xff] }
 0x458   :  { %v1630_v31 = vmul.f32 %v1618_v27, %v4126_v39  ;;  %v1632_v21 = vmul.f32 %v2509_v48, %v1610_v3  ;;  %v4755_v48 = vld [vmem:[#allocation59_spill] sm:$0xff] }
 0x459   :  { %v2511_v19 = vpop.eup %2510  ;;  %2516 = vtanh.f32 %v1602_v49  ;;  %v1623_v61 = vmul.f32 0.5, %v1603_v35  ;;  %v4756_v33 = vsel %vm3263_vm3, %v4754_v10, %v4755_v48  ;;  %v4759_v49 = vsel %vm3273_vm4, %v4757_v23, %v4758_v28  ;;  %v4760_v35 = vld [vmem:[#allocation65_spill] sm:$0xff] }
 0x45a   :  { %v2513_v2 = vpop.eup %2512  ;;  %v1634_v29 = vadd.f32 %v1632_v21, %v1630_v31  ;;  %v1626_v47 = vmul.f32 0.5, %v2511_v19  ;;  %v4761_v31 = vld [vmem:[#allocation64_spill] sm:$0xff]  ;;  %v4762_v21 = vld [vmem:[#allocation63_spill] sm:$0xff] }
 0x45b   :  { %v2515_v30 = vpop.eup %2514  ;;  %v1609_v34 = vmul.f32 0.5, %v2513_v2  ;;  %2518 = vtanh.f32 %v1623_v61  ;;  %v4763_v19 = vsel %vm3233_vm2, %v4761_v31, %v4762_v21 }
 0x45c   :  { %2520 = vtanh.f32 %v1634_v29  ;;  %v1617_v37 = vmul.f32 0.5, %v2515_v30  ;;  %v4229_v42 = vsel %vm1668_vm8, %v1634_v29, %v4126_v39  ;;  %v1628_v55 = vadd.f32 0.5, %v1626_v47 }
 0x45d   :  { %v1611_v51 = vadd.f32 0.5, %v1609_v34 }
 0x45e   :  { %v1619_v52 = vadd.f32 0.5, %v1617_v37 }
 0x45f   :  { %v2517_v56 = vpop.eup %2516 }
 0x460   :  { %v1631_v5 = vmul.f32 %v1619_v52, %v4132_v32  ;;  %v1633_v6 = vmul.f32 %v2517_v56, %v1611_v51  ;;  %v1816_v52 = vpop.permute.xlu0 %1815 }
 0x461   :  { %v2519_v17 = vpop.eup %2518 }
 0x462   :  { %v2521_v20 = vpop.eup %2520  ;;  %v1635_v62 = vadd.f32 %v1633_v6, %v1631_v5  ;;  %v1627_v54 = vmul.f32 0.5, %v2519_v17  ;;  %v1826_v6 = vpop.permute.xlu2 %1825  ;;  %v4764_v17 = vld [vmem:[#allocation67_spill] sm:$0xff] }
 0x463   :  { %v1638_v45 = vmul.f32 %v2521_v20, %v1628_v55  ;;  %v4765_v55 = vld [vmem:[#allocation66_spill] sm:$0xff] }
 0x464   :  { %2522 = vtanh.f32 %v1635_v62  ;;  %v4235_v39 = vsel %vm1669_vm9, %v1635_v62, %v4132_v32  ;;  %v1629_v53 = vadd.f32 0.5, %v1627_v54  ;;  %v4766_v20 = vsel %vm3263_vm3, %v4764_v17, %v4765_v55  ;;  %v4777_v55 = vld [vmem:[#allocation76_spill] sm:$0xff] }
 0x465   :  { %v1670_v0 = vsel %vm1668_vm8, %v1638_v45, 0.0  ;;  %v4248_v32 = vsel %vm1668_vm8, %v1638_v45, %v4145_v25  ;;  %v4767_v45 = vld [vmem:[#allocation69_spill] sm:$0xff] }
 0x466   :  { %v1676_v15 = vpack.c.bf16 %v1670_v0, %v1670_v0  ;;  %v4768_v0 = vld [vmem:[#allocation68_spill] sm:$0xff] }
 0x467   :  { %v4769_v54 = vsel %vm3273_vm4, %v4767_v45, %v4768_v0 }
 0x468   :  { %2329 = vst.msk [vmem:[%s4440_s6 + $0x28] sm:$0xf] %vm834_vm6, %v1676_v15 }
 0x469   :  { %2331 = vst.msk [vmem:[%s4440_s6 + $0x10] sm:$0xf] %vm838_vm7, %v1676_v15 }
 0x46a   :  { %v2523_v13 = vpop.eup %2522 }
 0x46b   :  { %v1639_v8 = vmul.f32 %v2523_v13, %v1629_v53  ;;  %v1833_v53 = vsel %vm479_vm1, %v1816_v52, %v1826_v6 }
 0x46c   :  { %vm1835_vm10 = vcmp.gt.f32.partialorder %v1833_v53, 0.5 }
 0x46d   :  { %v1671_v11 = vsel %vm1669_vm9, %v1639_v8, 0.0  ;;  %v4251_v12 = vsel %vm1669_vm9, %v1639_v8, %v4148_v46 }
 0x46e   :  { %v1677_v38 = vpack.c.bf16 %v1671_v11, %v1671_v11  ;;  %v1706_v24 = vpack.c.bf16 %v4251_v12, %v4248_v32 }
 0x470   :  { %2330 = vst.msk [vmem:[%s4440_s6 + $0x2c] sm:$0xf] %vm834_vm6, %v1677_v38  ;;  %1715 = vmatmul.bf16.vlgmr.msrb.gmra.mxu0 %v1706_v24  ;;  %1729 = vmatmul.bf16.vlgmr.msrb.gmra.mxu1 %v1706_v24 }
 0x471   :  { %2332 = vst.msk [vmem:[%s4440_s6 + $0x14] sm:$0xf] %vm838_vm7, %v1677_v38  ;;  %1743 = vmatmul.bf16.vlgmr.msrb.gmra.mxu2 %v1706_v24  ;;  %1757 = vmatmul.bf16.vlgmr.msrb.gmra.mxu3 %v1706_v24 }
 0x4ed   :  { %v1716_v25 = vpop.f32.mrf.mxu0  ;;  %v1730_v46 = vpop.f32.mrf.mxu1 }
 0x4ee   :  { %v1763_v63 = vadd.f32 %v1716_v25, %v4750_v57  ;;  %v1764_v26 = vadd.f32 %v1730_v46, %v4753_v43 }
 0x4f0   :  { %v1771_v4 = vmul.f32 0.5, %v1763_v63  ;;  %v1779_v3 = vmul.f32 0.5, %v1764_v26 }
 0x4f2   :  { %2524 = vtanh.f32 %v1771_v4 }
 0x4f3   :  { %2526 = vtanh.f32 %v1779_v3  ;;  %v1821_v3 = vpop.permute.xlu1 %1820 }
 0x4f4   :  { %v1744_v27 = vpop.f32.mrf.mxu2  ;;  %v1758_v14 = vpop.f32.mrf.mxu3 }
 0x4f5   :  { %v1765_v50 = vadd.f32 %v1744_v27, %v4756_v33  ;;  %v1766_v40 = vadd.f32 %v1758_v14, %v4759_v49  ;;  %v1718_v18 = vpop.f32.mrf.mxu0  ;;  %v1732_v44 = vpop.f32.mrf.mxu1 }
 0x4f6   :  { %v1767_v22 = vadd.f32 %v1718_v18, %v4760_v35  ;;  %v1768_v61 = vadd.f32 %v1732_v44, %v4763_v19  ;;  %v1831_v27 = vpop.permute.xlu0 %1830 }
 0x4f7   :  { %2528 = vtanh.f32 %v1765_v50  ;;  %v1789_v2 = vmul.f32 0.5, %v1766_v40  ;;  %v1834_v14 = vsel %vm479_vm1, %v1821_v3, %v1831_v27 }
 0x4f8   :  { %v2525_v29 = vpop.eup %2524  ;;  %v1772_v30 = vmul.f32 0.5, %v1767_v22  ;;  %v1780_v34 = vmul.f32 0.5, %v1768_v61  ;;  %vm1836_vm11 = vcmp.gt.f32.partialorder %v1834_v14, 0.5 }
 0x4f9   :  { %v2527_v37 = vpop.eup %2526  ;;  %v1775_v47 = vmul.f32 0.5, %v2525_v29  ;;  %2530 = vtanh.f32 %v1789_v2  ;;  %v4770_v29 = vld [vmem:[#allocation72_spill] sm:$0xff] }
 0x4fa   :  { %v1783_v51 = vmul.f32 0.5, %v2527_v37  ;;  %2532 = vtanh.f32 %v1772_v30  ;;  %v4772_v37 = vld [vmem:[#allocation70_spill] sm:$0xff] }
 0x4fb   :  { %v1777_v56 = vadd.f32 0.5, %v1775_v47  ;;  %2534 = vtanh.f32 %v1780_v34  ;;  %v4771_v34 = vld [vmem:[#allocation71_spill] sm:$0xff] }
 0x4fc   :  { %v1785_v59 = vadd.f32 0.5, %v1783_v51  ;;  %v1746_v60 = vpop.f32.mrf.mxu2  ;;  %v1760_v1 = vpop.f32.mrf.mxu3  ;;  %v4773_v47 = vsel %vm3233_vm2, %v4771_v34, %v4772_v37 }
 0x4fd   :  { %v2529_v5 = vpop.eup %2528  ;;  %v1769_v62 = vadd.f32 %v1746_v60, %v4766_v20  ;;  %v1770_v15 = vadd.f32 %v1760_v1, %v4769_v54  ;;  %v4774_v1 = vld [vmem:[#allocation74_spill] sm:$0xff]  ;;  %v4778_v20 = vld [vmem:[#allocation75_spill] sm:$0xff] }
 0x4fe   :  { %v1797_v13 = vmul.f32 %v1785_v59, %v4229_v42  ;;  %v1799_v8 = vmul.f32 %v2529_v5, %v1777_v56  ;;  %v4775_v5 = vld [vmem:[#allocation73_spill] sm:$0xff] }
 0x4ff   :  { %v2531_v11 = vpop.eup %2530  ;;  %2536 = vtanh.f32 %v1769_v62  ;;  %v1790_v38 = vmul.f32 0.5, %v1770_v15  ;;  %v4776_v6 = vsel %vm3263_vm3, %v4774_v1, %v4775_v5  ;;  %v4779_v62 = vsel %vm3273_vm4, %v4777_v55, %v4778_v20  ;;  %v4780_v15 = vld [vmem:[#allocation79_spill] sm:$0xff] }
 0x500   :  { %v2533_v24 = vpop.eup %2532  ;;  %v1801_v25 = vadd.f32 %v1799_v8, %v1797_v13  ;;  %v1793_v36 = vmul.f32 0.5, %v2531_v11  ;;  %v4781_v13 = vld [vmem:[#allocation78_spill] sm:$0xff]  ;;  %v4782_v8 = vld [vmem:[#allocation77_spill] sm:$0xff] }
 0x501   :  { %v2535_v46 = vpop.eup %2534  ;;  %v1776_v57 = vmul.f32 0.5, %v2533_v24  ;;  %2538 = vtanh.f32 %v1790_v38  ;;  %v4783_v11 = vsel %vm3233_vm2, %v4781_v13, %v4782_v8  ;;  %vm2016_vm2 = vcmask 523264  }
 0x502   :  { %2540 = vtanh.f32 %v1801_v25  ;;  %v1784_v63 = vmul.f32 0.5, %v2535_v46  ;;  %v4300_v58 = vsel %vm1835_vm10, %v1801_v25, %v4229_v42  ;;  %v1795_v50 = vadd.f32 0.5, %v1793_v36  ;;  %v1983_v36 = vpop.permute.xlu1 %1982 }
 0x503   :  { %v1778_v43 = vadd.f32 0.5, %v1776_v57 }
 0x504   :  { %v1786_v26 = vadd.f32 0.5, %v1784_v63 }
 0x505   :  { %v2537_v4 = vpop.eup %2536 }
 0x506   :  { %v1798_v10 = vmul.f32 %v1786_v26, %v4235_v39  ;;  %v1800_v48 = vmul.f32 %v2537_v4, %v1778_v43  ;;  %v1993_v4 = vpop.permute.xlu0 %1992 }
 0x507   :  { %v2539_v33 = vpop.eup %2538 }
 0x508   :  { %v2541_v23 = vpop.eup %2540  ;;  %v1802_v28 = vadd.f32 %v1800_v48, %v1798_v10  ;;  %v1794_v18 = vmul.f32 0.5, %v2539_v33  ;;  %v4784_v48 = vld [vmem:[#allocation81_spill] sm:$0xff]  ;;  %v4785_v33 = vld [vmem:[#allocation80_spill] sm:$0xff] }
 0x509   :  { %v1805_v49 = vmul.f32 %v2541_v23, %v1795_v50  ;;  %v4786_v50 = vsel %vm3263_vm3, %v4784_v48, %v4785_v33 }
 0x50a   :  { %2542 = vtanh.f32 %v1802_v28  ;;  %v4306_v42 = vsel %vm1836_vm11, %v1802_v28, %v4235_v39  ;;  %v1796_v35 = vadd.f32 0.5, %v1794_v18  ;;  %v4787_v28 = vld [vmem:[#allocation83_spill] sm:$0xff] }
 0x50b   :  { %v1837_v40 = vsel %vm1835_vm10, %v1805_v49, 0.0  ;;  %v4319_v39 = vsel %vm1835_vm10, %v1805_v49, %v4248_v32  ;;  %v4788_v49 = vld [vmem:[#allocation82_spill] sm:$0xff] }
 0x50c   :  { %v1843_v44 = vpack.c.bf16 %v1837_v40, %v1837_v40  ;;  %v4789_v40 = vsel %vm3273_vm4, %v4787_v28, %v4788_v49 }
 0x50e   :  { %2337 = vst.msk [vmem:[%s4440_s6 + $0x30] sm:$0xf] %vm834_vm6, %v1843_v44 }
 0x50f   :  { %2339 = vst.msk [vmem:[%s4440_s6 + $0x8] sm:$0xf] %vm838_vm7, %v1843_v44  ;;  %v2000_v44 = vsel %vm479_vm1, %v1983_v36, %v1993_v4 }
 0x510   :  { %v2543_v22 = vpop.eup %2542  ;;  %vm2002_vm3 = vcmp.gt.f32.partialorder %v2000_v44, 0.5 }
 0x511   :  { %v1806_v31 = vmul.f32 %v2543_v22, %v1796_v35 }
 0x513   :  { %v1838_v21 = vsel %vm1836_vm11, %v1806_v31, 0.0  ;;  %v4322_v19 = vsel %vm1836_vm11, %v1806_v31, %v4251_v12 }
 0x514   :  { %v1844_v61 = vpack.c.bf16 %v1838_v21, %v1838_v21  ;;  %v1873_v2 = vpack.c.bf16 %v4322_v19, %v4319_v39 }
 0x516   :  { %2338 = vst.msk [vmem:[%s4440_s6 + $0x34] sm:$0xf] %vm834_vm6, %v1844_v61  ;;  %1882 = vmatmul.bf16.vlgmr.msra.gmra.mxu0 %v1873_v2  ;;  %1896 = vmatmul.bf16.vlgmr.msra.gmra.mxu1 %v1873_v2 }
 0x517   :  { %2340 = vst.msk [vmem:[%s4440_s6 + $0xc] sm:$0xf] %vm838_vm7, %v1844_v61  ;;  %1910 = vmatmul.bf16.vlgmr.msra.gmra.mxu2 %v1873_v2  ;;  %1924 = vmatmul.bf16.vlgmr.msra.gmra.mxu3 %v1873_v2 }
 0x593   :  { %v1883_v32 = vpop.f32.mrf.mxu0  ;;  %v1897_v12 = vpop.f32.mrf.mxu1 }
 0x594   :  { %v1930_v30 = vadd.f32 %v1883_v32, %v4770_v29  ;;  %v1931_v51 = vadd.f32 %v1897_v12, %v4773_v47  ;;  %v1998_v29 = vpop.permute.xlu1 %1997 }
 0x596   :  { %v1938_v52 = vmul.f32 0.5, %v1930_v30  ;;  %v1946_v56 = vmul.f32 0.5, %v1931_v51  ;;  %v1988_v30 = vpop.permute.xlu2 %1987 }
 0x598   :  { %2544 = vtanh.f32 %v1938_v52  ;;  %v2001_v52 = vsel %vm479_vm1, %v1988_v30, %v1998_v29 }
 0x599   :  { %2546 = vtanh.f32 %v1946_v56  ;;  %vm2003_vm4 = vcmp.gt.f32.partialorder %v2001_v52, 0.5 }
 0x59a   :  { %v1911_v59 = vpop.f32.mrf.mxu2  ;;  %v1925_v60 = vpop.f32.mrf.mxu3 }
 0x59b   :  { %v1932_v17 = vadd.f32 %v1911_v59, %v4776_v6  ;;  %v1933_v45 = vadd.f32 %v1925_v60, %v4779_v62  ;;  %v1885_v0 = vpop.f32.mrf.mxu0  ;;  %v1899_v54 = vpop.f32.mrf.mxu1 }
 0x59c   :  { %v1934_v53 = vadd.f32 %v1885_v0, %v4780_v15  ;;  %v1935_v38 = vadd.f32 %v1899_v54, %v4783_v11 }
 0x59d   :  { %2548 = vtanh.f32 %v1932_v17  ;;  %v1956_v24 = vmul.f32 0.5, %v1933_v45 }
 0x59e   :  { %v2545_v25 = vpop.eup %2544  ;;  %v1939_v46 = vmul.f32 0.5, %v1934_v53  ;;  %v1947_v57 = vmul.f32 0.5, %v1935_v38 }
 0x59f   :  { %v2547_v63 = vpop.eup %2546  ;;  %v1942_v43 = vmul.f32 0.5, %v2545_v25  ;;  %2550 = vtanh.f32 %v1956_v24 }
 0x5a0   :  { %v1950_v26 = vmul.f32 0.5, %v2547_v63  ;;  %2552 = vtanh.f32 %v1939_v46 }
 0x5a1   :  { %v1944_v3 = vadd.f32 0.5, %v1942_v43  ;;  %2554 = vtanh.f32 %v1947_v57 }
 0x5a2   :  { %v1952_v27 = vadd.f32 0.5, %v1950_v26  ;;  %v1913_v41 = vpop.f32.mrf.mxu2  ;;  %v1927_v14 = vpop.f32.mrf.mxu3 }
 0x5a3   :  { %v2549_v10 = vpop.eup %2548  ;;  %v1936_v23 = vadd.f32 %v1913_v41, %v4786_v50  ;;  %v1937_v18 = vadd.f32 %v1927_v14, %v4789_v40 }
 0x5a4   :  { %v1966_v35 = vmul.f32 %v2549_v10, %v1944_v3  ;;  %v1964_v22 = vmul.f32 %v1952_v27, %v4300_v58 }
 0x5a5   :  { %v2551_v31 = vpop.eup %2550  ;;  %2556 = vtanh.f32 %v1936_v23  ;;  %v1957_v21 = vmul.f32 0.5, %v1937_v18 }
 0x5a6   :  { %v2553_v9 = vpop.eup %2552  ;;  %v1968_v61 = vadd.f32 %v1966_v35, %v1964_v22  ;;  %v1960_v34 = vmul.f32 0.5, %v2551_v31 }
 0x5a7   :  { %v2555_v2 = vpop.eup %2554  ;;  %v1943_v32 = vmul.f32 0.5, %v2553_v9  ;;  %2558 = vtanh.f32 %v1957_v21 }
 0x5a8   :  { %v1951_v7 = vmul.f32 0.5, %v2555_v2  ;;  %2560 = vtanh.f32 %v1968_v61  ;;  %v2008_v12 = vsel %vm2002_vm3, %v1968_v61, %v4300_v58  ;;  %v1962_v60 = vadd.f32 0.5, %v1960_v34 }
 0x5a9   :  { %v1945_v37 = vadd.f32 0.5, %v1943_v32  ;;  %2034 = vrot.lane.b32.xlu1 %v2008_v12, %s2565_s5  ;;  %2030 = vst.msk [vmem:[%s4441_s8] sm:$0xff] %vm2016_vm2, %v2008_v12 }
 0x5aa   :  { %v1953_v47 = vadd.f32 0.5, %v1951_v7 }
 0x5ab   :  { %v2557_v51 = vpop.eup %2556 }
 0x5ac   :  { %v1965_v56 = vmul.f32 %v1953_v47, %v4306_v42  ;;  %v1967_v58 = vmul.f32 %v2557_v51, %v1945_v37 }
 0x5ad   :  { %v2559_v59 = vpop.eup %2558 }
 0x5ae   :  { %v2561_v1 = vpop.eup %2560  ;;  %v1969_v5 = vadd.f32 %v1967_v58, %v1965_v56  ;;  %v1961_v55 = vmul.f32 0.5, %v2559_v59 }
 0x5af   :  { %v1972_v6 = vmul.f32 %v2561_v1, %v1962_v60 }
 0x5b0   :  { %2562 = vtanh.f32 %v1969_v5  ;;  %v2009_v17 = vsel %vm2003_vm4, %v1969_v5, %v4306_v42  ;;  %v1963_v42 = vadd.f32 0.5, %v1961_v55 }
 0x5b1   :  { %v2006_v20 = vsel %vm2002_vm3, %v1972_v6, %v4319_v39  ;;  %v2004_v16 = vsel %vm2002_vm3, %v1972_v6, 0.0  ;;  %2031 = vst.msk [vmem:[%s4441_s8 + $0x8] sm:$0xff] %vm2016_vm2, %v2009_v17 }
 0x5b2   :  { %2021 = vrot.lane.b32.xlu2 %v2006_v20, %s2565_s5  ;;  %v2010_v62 = vpack.c.bf16 %v2004_v16, %v2004_v16  ;;  %2017 = vst.msk [vmem:[%s4442_s7] sm:$0xff] %vm2016_vm2, %v2006_v20 }
 0x5b4   :  { %2345 = vst.msk [vmem:[%s4440_s6 + $0x38] sm:$0xf] %vm834_vm6, %v2010_v62 }
 0x5b5   :  { %2014 = vst.msk [vmem:[%s4440_s6] sm:$0xf] %vm838_vm7, %v2010_v62 }
 0x5b6   :  { %v2563_v39 = vpop.eup %2562 }
 0x5b7   :  { %v1973_v45 = vmul.f32 %v2563_v39, %v1963_v42 }
 0x5b9   :  { %v2005_v0 = vsel %vm2003_vm4, %v1973_v45, 0.0  ;;  %v2007_v54 = vsel %vm2003_vm4, %v1973_v45, %v4322_v19 }
 0x5ba   :  { %v2011_v15 = vpack.c.bf16 %v2005_v0, %v2005_v0  ;;  %2023 = vrot.lane.b32.xlu0 %v2007_v54, %s2565_s5  ;;  %2018 = vst.msk [vmem:[%s4442_s7 + $0x8] sm:$0xff] %vm2016_vm2, %v2007_v54  ;;  %2036 = vrot.lane.b32.xlu2 %v2009_v17, %s2565_s5 }
 0x5bc   :  { %2346 = vst.msk [vmem:[%s4440_s6 + $0x3c] sm:$0xf] %vm834_vm6, %v2011_v15 }
 0x5bd   :  { %2015 = vst.msk [vmem:[%s4440_s6 + $0x4] sm:$0xf] %vm838_vm7, %v2011_v15 }
 0x60c   :  { %v2022_v19 = vpop.permute.xlu2 %2021 }
 0x60d   :  { %2347 = vst.msk [vmem:[%s4442_s7 + $0x10] sm:$0xff] %vm2016_vm2, %v2022_v19 }
 0x614   :  { %v2037_v53 = vpop.permute.xlu2 %2036 }
 0x615   :  { %2350 = vst.msk [vmem:[%s4441_s8 + $0x18] sm:$0xff] %vm2016_vm2, %v2037_v53 }
 0x61b   :  { %v2035_v13 = vpop.permute.xlu1 %2034 }
 0x61c   :  { %2349 = vst.msk [vmem:[%s4441_s8 + $0x10] sm:$0xff] %vm2016_vm2, %v2035_v13 }
 0x62c   :  { %v2024_v8 = vpop.permute.xlu0 %2023 }
 0x62d   :  { %2348 = vst.msk [vmem:[%s4442_s7 + $0x18] sm:$0xff] %vm2016_vm2, %v2024_v8 }

</bundles_post_ra>
